<compile_context>
chip_gen: v5e
topology: v5e:2x2
jax: 0.10.0
libtpu: 0.0.40
codegen_flags: <defaults>
</compile_context>

<pallas_src>
import functools

import jax
import jax.numpy as jnp
from jax.experimental import pallas as pl
from jax.experimental.pallas import tpu as pltpu


def _round_up(x, m):
    return ((x + m - 1) // m) * m


# ----------------------------- Pallas kernel ------------------------------- #
def _api_hypernet_kernel(
    xT_ref,      # [NXROWS+1, TB]  (ally feats, enemy feats, ones row; BT on lanes)
    qT_ref,      # [NA, TB]
    w1e_ref,     # [(NA+NE)*HYP + HED, NXROWS+1]  bf16  (merged layer1 + bias col + B2 fold)
    w2_ref,      # [NXROWS*HED, (NA+NE)*HYP]      bf16  (merged layer2, no bias)
    wq1_ref,     # [HYP, 1] f32
    bq1_ref,     # [HYP, 1] f32
    wtail_ref,   # [HYP*ED + ED + ED+1, HED]      bf16  (wq2 perm | bq2 perm | wm^T)
    bm_ref,      # [ED+1, 1] f32
    mw1_ref,     # out: [NA*ED, TB] f32
    mw2b2_ref,   # out: [ED+1,  TB] f32
    *, NA, NXROWS, HED, ED,
):
    f32 = jnp.float32
    bf16 = jnp.bfloat16
    TB = qT_ref.shape[-1]
    HYP = wq1_ref.shape[0]
    H1HEAD = w1e_ref.shape[0] - HED                    # (NA+NE)*HYP

    # ---- merged hyper-MLP: one bf16 matmul per layer (MXU) ----
    X = xT_ref[...]                                    # [NXROWS+1, TB] f32
    Xb = X.astype(bf16)
    h1full = jnp.dot(w1e_ref[...], Xb, preferred_element_type=f32)
    h1 = jnp.maximum(h1full[:H1HEAD, :], 0.0)          # [(NA+NE)*HYP, TB]
    c2 = h1full[H1HEAD:, :]                            # [HED, TB] = layer-2 bias fold

    o2 = jnp.dot(w2_ref[...], h1.astype(bf16),
                 preferred_element_type=f32)           # [NXROWS*HED, TB]

    # ---- hidden = c2 + sum_r X[r] * o2[r*HED:(r+1)*HED]  (aligned slabs) ----
    acc = c2
    for r in range(NXROWS):
        acc = acc + X[r:r + 1, :] * o2[r * HED:(r + 1) * HED, :]
    hidden = acc                                       # [HED, TB]

    # ---- softmax over agents (XLU reductions + EUP reciprocal) ----
    q = qT_ref[...]                                    # [NA, TB]
    m = jnp.max(q, axis=0, keepdims=True)
    ex = jnp.exp(q - m)
    s = jnp.sum(ex, axis=0, keepdims=True)
    p = ex * pl.reciprocal(s, approx=True)             # [NA, TB]

    # ---- one shared bf16 matmul: hidden x {permuted wq2, permuted bq2, wm} ----
    tail = jnp.dot(wtail_ref[...], hidden.astype(bf16),
                   preferred_element_type=f32)         # [HYP*ED + ED + ED+1, TB]
    HQE = HYP * ED
    GT = tail[:HQE, :]                                 # G[b, j, e]       -> [HYP*ED, TB]
    cT = tail[HQE:HQE + ED, :]                         # sum_h hidden*bq2 -> [ED, TB]
    mw2b2_ref[...] = tail[HQE + ED:, :] + bm_ref[...]  # [ED+1, TB]

    # ---- per-agent hq = relu(p_a * wq1 + bq1), hoisted out of the j-loop ----
    wq1c = wq1_ref[...]                                # [HYP, 1]
    bq1c = bq1_ref[...]                                # [HYP, 1]
    hqs = [jnp.maximum(wq1c * p[a:a + 1, :] + bq1c, 0.0) for a in range(NA)]

    # ---- main_w1: j outer (GT slab reuse), agent inner; NA accumulators ----
    accs = [cT for _ in range(NA)]                     # each [ED, TB]
    for j in range(HYP):
        g = GT[j * ED:(j + 1) * ED, :]                 # aligned [ED, TB] slab, read once
        for a in range(NA):
            accs[a] = accs[a] + hqs[a][j:j + 1, :] * g
    for a in range(NA):
        mw1_ref[a * ED:(a + 1) * ED, :] = accs[a]      # aligned, lane-dense stores


# --------------------------- parameter preparation ------------------------- #
def _prep_params(params, NA, NE, AF, EF):
    (wa1, ba1, wa2, ba2, we1, be1, we2, be2,
     wq1, bq1, wq2, bq2, wm, bm) = [p.astype(jnp.float32) for p in params]
    f32 = jnp.float32
    bf16 = jnp.bfloat16
    HYP = wa1.shape[1]
    HED = wa2.shape[1] // AF
    ED = wm.shape[1] - 1
    NAF, NEF = NA * AF, NE * EF

    def bdiag(w, n):       # block-diag of w.T repeated n times (shared weights)
        return jnp.kron(jnp.eye(n, dtype=f32), w.T)

    # ---- merged layer 1: [ally block | enemy block | bias column], plus the
    #      layer-2-bias fold B2 appended as extra output rows ----
    w1a = bdiag(wa1, NA)                               # [NA*HYP, NAF]
    w1e_ = bdiag(we1, NE)                              # [NE*HYP, NEF]
    b1a = jnp.tile(ba1.T, (NA, 1))                     # [NA*HYP, 1]
    b1e = jnp.tile(be1.T, (NE, 1))                     # [NE*HYP, 1]
    w1_top = jnp.concatenate([
        jnp.concatenate([w1a, jnp.zeros((NA * HYP, NEF), f32), b1a], axis=1),
        jnp.concatenate([jnp.zeros((NE * HYP, NAF), f32), w1e_, b1e], axis=1),
    ], axis=0)                                         # [(NA+NE)*HYP, NAF+NEF+1]

    # layer-2 bias contribution: c2[h,bt] = sum_r X[r,bt] * b2cat[r*HED+h]
    b2cat = jnp.concatenate([jnp.tile(ba2.T, (NA, 1)),
                             jnp.tile(be2.T, (NE, 1))], axis=0)   # [(NAF+NEF)*HED, 1]
    B2mat = b2cat.reshape(NAF + NEF, HED).T            # [HED, NAF+NEF]
    B2row = jnp.concatenate([B2mat, jnp.zeros((HED, 1), f32)], axis=1)
    w1ext = jnp.concatenate([w1_top, B2row], axis=0)   # [(NA+NE)*HYP + HED, NAF+NEF+1]

    # ---- merged layer 2 block-diag (bias already folded above) ----
    w2a = bdiag(wa2, NA)                               # [NAF*HED, NA*HYP]
    w2e = bdiag(we2, NE)                               # [NEF*HED, NE*HYP]
    w2bd = jnp.concatenate([
        jnp.concatenate([w2a, jnp.zeros((NAF * HED, NE * HYP), f32)], axis=1),
        jnp.concatenate([jnp.zeros((NEF * HED, NA * HYP), f32), w2e], axis=1),
    ], axis=0)                                         # [(NAF+NEF)*HED, (NA+NE)*HYP]

    # ---- hyper_w_q / hyper_main_w2b2 tail ----
    wq1T = wq1.T                                       # [HYP, 1]
    bq1T = bq1.T                                       # [HYP, 1]
    # wq2p[j*ED+e, h] = wq2[j, h*ED+e] ; bq2p[e, h] = bq2[0, h*ED+e]
    wq2p = wq2.reshape(HYP, HED, ED).transpose(0, 2, 1).reshape(HYP * ED, HED)
    bq2p = bq2.reshape(HED, ED).T                      # [ED, HED]
    wmT = wm.T                                         # [ED+1, HED]
    bmT = bm.T                                         # [ED+1, 1]
    wtail = jnp.concatenate([wq2p, bq2p, wmT], axis=0)  # [HYP*ED + ED + ED+1, HED]

    weights = (w1ext.astype(bf16), w2bd.astype(bf16),
               wq1T, bq1T, wtail.astype(bf16), bmT)
    return weights, HED, ED


# ------------------------------ JAX wrapper -------------------------------- #
def api_hypernet_forward(ally, enemy, qvals, params, *, block_bt=1024):
    """ally:[BT,NA,AF]  enemy:[BT,NE,EF]  qvals:[B,T,NA] -> (main_w1, main_w2, main_b2)."""
    BT, NA, AF = ally.shape
    _, NE, EF = enemy.shape
    f32 = jnp.float32

    weights, HED, ED = _prep_params(params, NA, NE, AF, EF)
    NXROWS = NA * AF + NE * EF

    # Activations transposed: BT on the lane (last) axis; ones row for bias fold.
    xT = jnp.concatenate([
        ally.astype(f32).reshape(BT, NA * AF),
        enemy.astype(f32).reshape(BT, NE * EF),
        jnp.ones((BT, 1), f32),
    ], axis=1).T                                       # [NXROWS+1, BT]
    qT = qvals.astype(f32).reshape(BT, NA).T           # [NA, BT]

    # BT tiling: lane-aligned blocks, padded batch.
    TB = block_bt if BT >= block_bt else max(128, _round_up(BT, 128))
    TB = _round_up(TB, 128)
    BTp = _round_up(BT, TB)
    pad = BTp - BT
    if pad:
        xT = jnp.pad(xT, ((0, 0), (0, pad)))
        qT = jnp.pad(qT, ((0, 0), (0, pad)))

    kernel = functools.partial(
        _api_hypernet_kernel, NA=NA, NXROWS=NXROWS, HED=HED, ED=ED)

    def w_spec(w):          # full array, constant block index -> stays resident
        return pl.BlockSpec(w.shape, lambda i: (0, 0))

    mw1T, mw2b2T = pl.pallas_call(
        kernel,
        grid=(BTp // TB,),
        out_shape=(
            jax.ShapeDtypeStruct((NA * ED, BTp), f32),
            jax.ShapeDtypeStruct((ED + 1, BTp), f32),
        ),
        in_specs=([pl.BlockSpec((NXROWS + 1, TB), lambda i: (0, i)),
                   pl.BlockSpec((NA, TB), lambda i: (0, i))]
                  + [w_spec(w) for w in weights]),
        out_specs=(
            pl.BlockSpec((NA * ED, TB), lambda i: (0, i)),
            pl.BlockSpec((ED + 1, TB), lambda i: (0, i)),
        ),
        compiler_params=pltpu.CompilerParams(
            dimension_semantics=("parallel",),
            # Intermediates (~10-12 MB at TB=1024) are the VMEM driver; raise
            # the scoped limit past the 16/32 MiB defaults, stay <= v7x's 64 MiB.
            vmem_limit_bytes=64 * 1024 * 1024),
    )(xT, qT, *weights)

    # Wrapper-side layout plumbing back to the module's output shapes.
    main_w1 = mw1T[:, :BT].T.reshape(BT, NA, ED)
    w2b2 = mw2b2T[:, :BT].T
    main_w2 = w2b2[:, :ED][..., None]     # [BT, ED, 1]
    main_b2 = w2b2[:, ED:][..., None]     # [BT, 1, 1]
    return main_w1, main_w2, main_b2


# ------------------------- pure-JAX reference ------------------------------ #
def api_hypernet_reference(ally, enemy, qvals, params):
    (wa1, ba1, wa2, ba2, we1, be1, we2, be2,
     wq1, bq1, wq2, bq2, wm, bm) = params
    BT, NA, AF = ally.shape
    _, NE, EF = enemy.shape
    HED = wa2.shape[1] // AF
    ED = wm.shape[1] - 1

    af = ally.reshape(-1, AF)
    h = jnp.maximum(af @ wa1 + ba1, 0.0)
    w = (h @ wa2 + ba2).reshape(-1, AF, HED)
    hid_a = jnp.einsum('nf,nfh->nh', af, w).reshape(BT, NA, HED).sum(1)

    ef = enemy.reshape(-1, EF)
    h = jnp.maximum(ef @ we1 + be1, 0.0)
    w = (h @ we2 + be2).reshape(-1, EF, HED)
    hid_e = jnp.einsum('nf,nfh->nh', ef, w).reshape(BT, NE, HED).sum(1)

    hidden = hid_a + hid_e

    p = jax.nn.softmax(qvals, axis=-1).reshape(-1, 1)
    hq = jnp.maximum(p @ wq1 + bq1, 0.0)
    w2 = (hq @ wq2 + bq2).reshape(BT, NA, HED, ED)
    w2 = jnp.transpose(w2, (0, 2, 1, 3)).reshape(BT, HED, NA * ED)
    main_w1 = jnp.einsum('bh,bhk->bk', hidden, w2).reshape(BT, NA, ED)

    w2b2 = hidden @ wm + bm
    main_w2 = w2b2[:, :ED][..., None]
    main_b2 = w2b2[:, ED:][..., None]
    return main_w1, main_w2, main_b2


# --------------------------------- main ------------------------------------ #
if __name__ == "__main__":
    # args (small, consistent with the module)
    B, T = 2, 4
    n_agents, n_enemies = 3, 4
    ally_feat, enemy_feat = 5, 6
    api_hyper_dim = 32          # args.api_hyper_dim
    hyper_embed_dim = 32        # args.hypernet_embed
    embed_dim = 8               # args.mixing_embed_dim
    BT = B * T

    key = jax.random.PRNGKey(0)
    ks = jax.random.split(key, 20)

    def init(k, shape, scale=0.1):
        return (scale * jax.random.normal(k, shape)).astype(jnp.float32)

    params = (
        # hyper_w_ally
        init(ks[0], (ally_feat, api_hyper_dim)),
        init(ks[1], (1, api_hyper_dim)),
        init(ks[2], (api_hyper_dim, ally_feat * hyper_embed_dim)),
        init(ks[3], (1, ally_feat * hyper_embed_dim)),
        # hyper_w_enemy
        init(ks[4], (enemy_feat, api_hyper_dim)),
        init(ks[5], (1, api_hyper_dim)),
        init(ks[6], (api_hyper_dim, enemy_feat * hyper_embed_dim)),
        init(ks[7], (1, enemy_feat * hyper_embed_dim)),
        # hyper_w_q
        init(ks[8], (1, api_hyper_dim)),
        init(ks[9], (1, api_hyper_dim)),
        init(ks[10], (api_hyper_dim, hyper_embed_dim * embed_dim)),
        init(ks[11], (1, hyper_embed_dim * embed_dim)),
        # hyper_main_w2b2
        init(ks[12], (hyper_embed_dim, embed_dim + 1)),
        init(ks[13], (1, embed_dim + 1)),
    )

    ally = jax.random.normal(ks[14], (BT, n_agents, ally_feat), jnp.float32)
    enemy = jax.random.normal(ks[15], (BT, n_enemies, enemy_feat), jnp.float32)
    qvals = jax.random.normal(ks[16], (B, T, n_agents), jnp.float32)

    fwd = jax.jit(api_hypernet_forward)
    out = fwd(ally, enemy, qvals, params)
    out = jax.block_until_ready(out)
    main_w1, main_w2, main_b2 = out

    # sanity check against pure-JAX f32 reference (kernel matmuls run in bf16
    # with f32 accumulation, so allow bf16-level tolerance).
    ref = api_hypernet_reference(ally, enemy, qvals, params)
    for got, exp in zip(out, ref):
        assert got.shape == exp.shape, (got.shape, exp.shape)
        assert jnp.allclose(got, exp, rtol=3e-2, atol=1e-2), \
            float(jnp.max(jnp.abs(got - exp)))

    assert main_w1.shape == (BT, n_agents, embed_dim)
    assert main_w2.shape == (BT, embed_dim, 1)
    assert main_b2.shape == (BT, 1, 1)

    print("KERNEL_OK")
</pallas_src>

<mosaic_0001>
module attributes {stable_mosaic.version = 11 : i64} {
  func.func @_api_hypernet_kernel(%arg0: i32, %arg1: memref<40x128xf32, #tpu.memory_space<vmem>>, %arg2: memref<3x128xf32, #tpu.memory_space<vmem>>, %arg3: memref<256x40xbf16, #tpu.memory_space<vmem>>, %arg4: memref<1248x224xbf16, #tpu.memory_space<vmem>>, %arg5: memref<32x1xf32, #tpu.memory_space<vmem>>, %arg6: memref<32x1xf32, #tpu.memory_space<vmem>>, %arg7: memref<273x32xbf16, #tpu.memory_space<vmem>>, %arg8: memref<9x1xf32, #tpu.memory_space<vmem>>, %arg9: memref<24x128xf32, #tpu.memory_space<vmem>>, %arg10: memref<9x128xf32, #tpu.memory_space<vmem>>) attributes {dimension_semantics = [#tpu.dimension_semantics<parallel>], iteration_bounds = array<i64: 1>, scalar_prefetch = 0 : i64, scratch_operands = 0 : i64, tpu.core_type = #tpu.core_type<tc>, window_params = [{transform_indices = @transform_0, window_bounds = array<i64: 40, 128>}, {transform_indices = @transform_1, window_bounds = array<i64: 3, 128>}, {pipeline_mode = #tpu.pipeline_mode<synchronous>, transform_indices = @transform_2, window_bounds = array<i64: 256, 40>}, {pipeline_mode = #tpu.pipeline_mode<synchronous>, transform_indices = @transform_3, window_bounds = array<i64: 1248, 224>}, {pipeline_mode = #tpu.pipeline_mode<synchronous>, transform_indices = @transform_4, window_bounds = array<i64: 32, 1>}, {pipeline_mode = #tpu.pipeline_mode<synchronous>, transform_indices = @transform_5, window_bounds = array<i64: 32, 1>}, {pipeline_mode = #tpu.pipeline_mode<synchronous>, transform_indices = @transform_6, window_bounds = array<i64: 273, 32>}, {pipeline_mode = #tpu.pipeline_mode<synchronous>, transform_indices = @transform_7, window_bounds = array<i64: 9, 1>}, {transform_indices = @transform_8, window_bounds = array<i64: 24, 128>}, {transform_indices = @transform_9, window_bounds = array<i64: 9, 128>}]} {
    %c0 = arith.constant 0 : index
    %c0_0 = arith.constant 0 : index
    %0 = vector.load %arg1[%c0, %c0_0] : memref<40x128xf32, #tpu.memory_space<vmem>>, vector<40x128xf32>
    %1 = arith.truncf %0 : vector<40x128xf32> to vector<40x128xbf16>
    %c0_1 = arith.constant 0 : index
    %c0_2 = arith.constant 0 : index
    %2 = vector.load %arg3[%c0_1, %c0_2] : memref<256x40xbf16, #tpu.memory_space<vmem>>, vector<256x40xbf16>
    %cst = arith.constant dense<0.000000e+00> : vector<256x128xf32>
    %3 = tpu.matmul %2, %1, %cst {dimension_numbers = #tpu.dot_dimension_numbers<[1], [0], [0], [1], [0, 0, 1, 1], [], []>} : vector<256x40xbf16>, vector<40x128xbf16>, vector<256x128xf32> -> vector<256x128xf32>
    %4 = vector.extract_strided_slice %3 {offsets = [0, 0], sizes = [224, 128], strides = [1, 1]} : vector<256x128xf32> to vector<224x128xf32>
    %cst_3 = arith.constant 0.000000e+00 : f32
    %5 = vector.broadcast %cst_3 : f32 to vector<224x128xf32>
    %6 = arith.maximumf %4, %5 : vector<224x128xf32>
    %7 = vector.extract_strided_slice %3 {offsets = [224, 0], sizes = [32, 128], strides = [1, 1]} : vector<256x128xf32> to vector<32x128xf32>
    %c0_4 = arith.constant 0 : index
    %c0_5 = arith.constant 0 : index
    %8 = vector.load %arg4[%c0_4, %c0_5] : memref<1248x224xbf16, #tpu.memory_space<vmem>>, vector<1248x224xbf16>
    %9 = arith.truncf %6 : vector<224x128xf32> to vector<224x128xbf16>
    %cst_6 = arith.constant dense<0.000000e+00> : vector<1248x128xf32>
    %10 = tpu.matmul %8, %9, %cst_6 {dimension_numbers = #tpu.dot_dimension_numbers<[1], [0], [0], [1], [0, 0, 1, 1], [], []>} : vector<1248x224xbf16>, vector<224x128xbf16>, vector<1248x128xf32> -> vector<1248x128xf32>
    %11 = vector.extract_strided_slice %0 {offsets = [0, 0], sizes = [1, 128], strides = [1, 1]} : vector<40x128xf32> to vector<1x128xf32>
    %12 = vector.extract_strided_slice %10 {offsets = [0, 0], sizes = [32, 128], strides = [1, 1]} : vector<1248x128xf32> to vector<32x128xf32>
    %13 = vector.broadcast %11 : vector<1x128xf32> to vector<32x128xf32>
    %14 = arith.mulf %13, %12 : vector<32x128xf32>
    %15 = arith.addf %7, %14 : vector<32x128xf32>
    %16 = vector.extract_strided_slice %0 {offsets = [1, 0], sizes = [1, 128], strides = [1, 1]} : vector<40x128xf32> to vector<1x128xf32>
    %17 = vector.extract_strided_slice %10 {offsets = [32, 0], sizes = [32, 128], strides = [1, 1]} : vector<1248x128xf32> to vector<32x128xf32>
    %18 = vector.broadcast %16 : vector<1x128xf32> to vector<32x128xf32>
    %19 = arith.mulf %18, %17 : vector<32x128xf32>
    %20 = arith.addf %15, %19 : vector<32x128xf32>
    %21 = vector.extract_strided_slice %0 {offsets = [2, 0], sizes = [1, 128], strides = [1, 1]} : vector<40x128xf32> to vector<1x128xf32>
    %22 = vector.extract_strided_slice %10 {offsets = [64, 0], sizes = [32, 128], strides = [1, 1]} : vector<1248x128xf32> to vector<32x128xf32>
    %23 = vector.broadcast %21 : vector<1x128xf32> to vector<32x128xf32>
    %24 = arith.mulf %23, %22 : vector<32x128xf32>
    %25 = arith.addf %20, %24 : vector<32x128xf32>
    %26 = vector.extract_strided_slice %0 {offsets = [3, 0], sizes = [1, 128], strides = [1, 1]} : vector<40x128xf32> to vector<1x128xf32>
    %27 = vector.extract_strided_slice %10 {offsets = [96, 0], sizes = [32, 128], strides = [1, 1]} : vector<1248x128xf32> to vector<32x128xf32>
    %28 = vector.broadcast %26 : vector<1x128xf32> to vector<32x128xf32>
    %29 = arith.mulf %28, %27 : vector<32x128xf32>
    %30 = arith.addf %25, %29 : vector<32x128xf32>
    %31 = vector.extract_strided_slice %0 {offsets = [4, 0], sizes = [1, 128], strides = [1, 1]} : vector<40x128xf32> to vector<1x128xf32>
    %32 = vector.extract_strided_slice %10 {offsets = [128, 0], sizes = [32, 128], strides = [1, 1]} : vector<1248x128xf32> to vector<32x128xf32>
    %33 = vector.broadcast %31 : vector<1x128xf32> to vector<32x128xf32>
    %34 = arith.mulf %33, %32 : vector<32x128xf32>
    %35 = arith.addf %30, %34 : vector<32x128xf32>
    %36 = vector.extract_strided_slice %0 {offsets = [5, 0], sizes = [1, 128], strides = [1, 1]} : vector<40x128xf32> to vector<1x128xf32>
    %37 = vector.extract_strided_slice %10 {offsets = [160, 0], sizes = [32, 128], strides = [1, 1]} : vector<1248x128xf32> to vector<32x128xf32>
    %38 = vector.broadcast %36 : vector<1x128xf32> to vector<32x128xf32>
    %39 = arith.mulf %38, %37 : vector<32x128xf32>
    %40 = arith.addf %35, %39 : vector<32x128xf32>
    %41 = vector.extract_strided_slice %0 {offsets = [6, 0], sizes = [1, 128], strides = [1, 1]} : vector<40x128xf32> to vector<1x128xf32>
    %42 = vector.extract_strided_slice %10 {offsets = [192, 0], sizes = [32, 128], strides = [1, 1]} : vector<1248x128xf32> to vector<32x128xf32>
    %43 = vector.broadcast %41 : vector<1x128xf32> to vector<32x128xf32>
    %44 = arith.mulf %43, %42 : vector<32x128xf32>
    %45 = arith.addf %40, %44 : vector<32x128xf32>
    %46 = vector.extract_strided_slice %0 {offsets = [7, 0], sizes = [1, 128], strides = [1, 1]} : vector<40x128xf32> to vector<1x128xf32>
    %47 = vector.extract_strided_slice %10 {offsets = [224, 0], sizes = [32, 128], strides = [1, 1]} : vector<1248x128xf32> to vector<32x128xf32>
    %48 = vector.broadcast %46 : vector<1x128xf32> to vector<32x128xf32>
    %49 = arith.mulf %48, %47 : vector<32x128xf32>
    %50 = arith.addf %45, %49 : vector<32x128xf32>
    %51 = vector.extract_strided_slice %0 {offsets = [8, 0], sizes = [1, 128], strides = [1, 1]} : vector<40x128xf32> to vector<1x128xf32>
    %52 = vector.extract_strided_slice %10 {offsets = [256, 0], sizes = [32, 128], strides = [1, 1]} : vector<1248x128xf32> to vector<32x128xf32>
    %53 = vector.broadcast %51 : vector<1x128xf32> to vector<32x128xf32>
    %54 = arith.mulf %53, %52 : vector<32x128xf32>
    %55 = arith.addf %50, %54 : vector<32x128xf32>
    %56 = vector.extract_strided_slice %0 {offsets = [9, 0], sizes = [1, 128], strides = [1, 1]} : vector<40x128xf32> to vector<1x128xf32>
    %57 = vector.extract_strided_slice %10 {offsets = [288, 0], sizes = [32, 128], strides = [1, 1]} : vector<1248x128xf32> to vector<32x128xf32>
    %58 = vector.broadcast %56 : vector<1x128xf32> to vector<32x128xf32>
    %59 = arith.mulf %58, %57 : vector<32x128xf32>
    %60 = arith.addf %55, %59 : vector<32x128xf32>
    %61 = vector.extract_strided_slice %0 {offsets = [10, 0], sizes = [1, 128], strides = [1, 1]} : vector<40x128xf32> to vector<1x128xf32>
    %62 = vector.extract_strided_slice %10 {offsets = [320, 0], sizes = [32, 128], strides = [1, 1]} : vector<1248x128xf32> to vector<32x128xf32>
    %63 = vector.broadcast %61 : vector<1x128xf32> to vector<32x128xf32>
    %64 = arith.mulf %63, %62 : vector<32x128xf32>
    %65 = arith.addf %60, %64 : vector<32x128xf32>
    %66 = vector.extract_strided_slice %0 {offsets = [11, 0], sizes = [1, 128], strides = [1, 1]} : vector<40x128xf32> to vector<1x128xf32>
    %67 = vector.extract_strided_slice %10 {offsets = [352, 0], sizes = [32, 128], strides = [1, 1]} : vector<1248x128xf32> to vector<32x128xf32>
    %68 = vector.broadcast %66 : vector<1x128xf32> to vector<32x128xf32>
    %69 = arith.mulf %68, %67 : vector<32x128xf32>
    %70 = arith.addf %65, %69 : vector<32x128xf32>
    %71 = vector.extract_strided_slice %0 {offsets = [12, 0], sizes = [1, 128], strides = [1, 1]} : vector<40x128xf32> to vector<1x128xf32>
    %72 = vector.extract_strided_slice %10 {offsets = [384, 0], sizes = [32, 128], strides = [1, 1]} : vector<1248x128xf32> to vector<32x128xf32>
    %73 = vector.broadcast %71 : vector<1x128xf32> to vector<32x128xf32>
    %74 = arith.mulf %73, %72 : vector<32x128xf32>
    %75 = arith.addf %70, %74 : vector<32x128xf32>
    %76 = vector.extract_strided_slice %0 {offsets = [13, 0], sizes = [1, 128], strides = [1, 1]} : vector<40x128xf32> to vector<1x128xf32>
    %77 = vector.extract_strided_slice %10 {offsets = [416, 0], sizes = [32, 128], strides = [1, 1]} : vector<1248x128xf32> to vector<32x128xf32>
    %78 = vector.broadcast %76 : vector<1x128xf32> to vector<32x128xf32>
    %79 = arith.mulf %78, %77 : vector<32x128xf32>
    %80 = arith.addf %75, %79 : vector<32x128xf32>
    %81 = vector.extract_strided_slice %0 {offsets = [14, 0], sizes = [1, 128], strides = [1, 1]} : vector<40x128xf32> to vector<1x128xf32>
    %82 = vector.extract_strided_slice %10 {offsets = [448, 0], sizes = [32, 128], strides = [1, 1]} : vector<1248x128xf32> to vector<32x128xf32>
    %83 = vector.broadcast %81 : vector<1x128xf32> to vector<32x128xf32>
    %84 = arith.mulf %83, %82 : vector<32x128xf32>
    %85 = arith.addf %80, %84 : vector<32x128xf32>
    %86 = vector.extract_strided_slice %0 {offsets = [15, 0], sizes = [1, 128], strides = [1, 1]} : vector<40x128xf32> to vector<1x128xf32>
    %87 = vector.extract_strided_slice %10 {offsets = [480, 0], sizes = [32, 128], strides = [1, 1]} : vector<1248x128xf32> to vector<32x128xf32>
    %88 = vector.broadcast %86 : vector<1x128xf32> to vector<32x128xf32>
    %89 = arith.mulf %88, %87 : vector<32x128xf32>
    %90 = arith.addf %85, %89 : vector<32x128xf32>
    %91 = vector.extract_strided_slice %0 {offsets = [16, 0], sizes = [1, 128], strides = [1, 1]} : vector<40x128xf32> to vector<1x128xf32>
    %92 = vector.extract_strided_slice %10 {offsets = [512, 0], sizes = [32, 128], strides = [1, 1]} : vector<1248x128xf32> to vector<32x128xf32>
    %93 = vector.broadcast %91 : vector<1x128xf32> to vector<32x128xf32>
    %94 = arith.mulf %93, %92 : vector<32x128xf32>
    %95 = arith.addf %90, %94 : vector<32x128xf32>
    %96 = vector.extract_strided_slice %0 {offsets = [17, 0], sizes = [1, 128], strides = [1, 1]} : vector<40x128xf32> to vector<1x128xf32>
    %97 = vector.extract_strided_slice %10 {offsets = [544, 0], sizes = [32, 128], strides = [1, 1]} : vector<1248x128xf32> to vector<32x128xf32>
    %98 = vector.broadcast %96 : vector<1x128xf32> to vector<32x128xf32>
    %99 = arith.mulf %98, %97 : vector<32x128xf32>
    %100 = arith.addf %95, %99 : vector<32x128xf32>
    %101 = vector.extract_strided_slice %0 {offsets = [18, 0], sizes = [1, 128], strides = [1, 1]} : vector<40x128xf32> to vector<1x128xf32>
    %102 = vector.extract_strided_slice %10 {offsets = [576, 0], sizes = [32, 128], strides = [1, 1]} : vector<1248x128xf32> to vector<32x128xf32>
    %103 = vector.broadcast %101 : vector<1x128xf32> to vector<32x128xf32>
    %104 = arith.mulf %103, %102 : vector<32x128xf32>
    %105 = arith.addf %100, %104 : vector<32x128xf32>
    %106 = vector.extract_strided_slice %0 {offsets = [19, 0], sizes = [1, 128], strides = [1, 1]} : vector<40x128xf32> to vector<1x128xf32>
    %107 = vector.extract_strided_slice %10 {offsets = [608, 0], sizes = [32, 128], strides = [1, 1]} : vector<1248x128xf32> to vector<32x128xf32>
    %108 = vector.broadcast %106 : vector<1x128xf32> to vector<32x128xf32>
    %109 = arith.mulf %108, %107 : vector<32x128xf32>
    %110 = arith.addf %105, %109 : vector<32x128xf32>
    %111 = vector.extract_strided_slice %0 {offsets = [20, 0], sizes = [1, 128], strides = [1, 1]} : vector<40x128xf32> to vector<1x128xf32>
    %112 = vector.extract_strided_slice %10 {offsets = [640, 0], sizes = [32, 128], strides = [1, 1]} : vector<1248x128xf32> to vector<32x128xf32>
    %113 = vector.broadcast %111 : vector<1x128xf32> to vector<32x128xf32>
    %114 = arith.mulf %113, %112 : vector<32x128xf32>
    %115 = arith.addf %110, %114 : vector<32x128xf32>
    %116 = vector.extract_strided_slice %0 {offsets = [21, 0], sizes = [1, 128], strides = [1, 1]} : vector<40x128xf32> to vector<1x128xf32>
    %117 = vector.extract_strided_slice %10 {offsets = [672, 0], sizes = [32, 128], strides = [1, 1]} : vector<1248x128xf32> to vector<32x128xf32>
    %118 = vector.broadcast %116 : vector<1x128xf32> to vector<32x128xf32>
    %119 = arith.mulf %118, %117 : vector<32x128xf32>
    %120 = arith.addf %115, %119 : vector<32x128xf32>
    %121 = vector.extract_strided_slice %0 {offsets = [22, 0], sizes = [1, 128], strides = [1, 1]} : vector<40x128xf32> to vector<1x128xf32>
    %122 = vector.extract_strided_slice %10 {offsets = [704, 0], sizes = [32, 128], strides = [1, 1]} : vector<1248x128xf32> to vector<32x128xf32>
    %123 = vector.broadcast %121 : vector<1x128xf32> to vector<32x128xf32>
    %124 = arith.mulf %123, %122 : vector<32x128xf32>
    %125 = arith.addf %120, %124 : vector<32x128xf32>
    %126 = vector.extract_strided_slice %0 {offsets = [23, 0], sizes = [1, 128], strides = [1, 1]} : vector<40x128xf32> to vector<1x128xf32>
    %127 = vector.extract_strided_slice %10 {offsets = [736, 0], sizes = [32, 128], strides = [1, 1]} : vector<1248x128xf32> to vector<32x128xf32>
    %128 = vector.broadcast %126 : vector<1x128xf32> to vector<32x128xf32>
    %129 = arith.mulf %128, %127 : vector<32x128xf32>
    %130 = arith.addf %125, %129 : vector<32x128xf32>
    %131 = vector.extract_strided_slice %0 {offsets = [24, 0], sizes = [1, 128], strides = [1, 1]} : vector<40x128xf32> to vector<1x128xf32>
    %132 = vector.extract_strided_slice %10 {offsets = [768, 0], sizes = [32, 128], strides = [1, 1]} : vector<1248x128xf32> to vector<32x128xf32>
    %133 = vector.broadcast %131 : vector<1x128xf32> to vector<32x128xf32>
    %134 = arith.mulf %133, %132 : vector<32x128xf32>
    %135 = arith.addf %130, %134 : vector<32x128xf32>
    %136 = vector.extract_strided_slice %0 {offsets = [25, 0], sizes = [1, 128], strides = [1, 1]} : vector<40x128xf32> to vector<1x128xf32>
    %137 = vector.extract_strided_slice %10 {offsets = [800, 0], sizes = [32, 128], strides = [1, 1]} : vector<1248x128xf32> to vector<32x128xf32>
    %138 = vector.broadcast %136 : vector<1x128xf32> to vector<32x128xf32>
    %139 = arith.mulf %138, %137 : vector<32x128xf32>
    %140 = arith.addf %135, %139 : vector<32x128xf32>
    %141 = vector.extract_strided_slice %0 {offsets = [26, 0], sizes = [1, 128], strides = [1, 1]} : vector<40x128xf32> to vector<1x128xf32>
    %142 = vector.extract_strided_slice %10 {offsets = [832, 0], sizes = [32, 128], strides = [1, 1]} : vector<1248x128xf32> to vector<32x128xf32>
    %143 = vector.broadcast %141 : vector<1x128xf32> to vector<32x128xf32>
    %144 = arith.mulf %143, %142 : vector<32x128xf32>
    %145 = arith.addf %140, %144 : vector<32x128xf32>
    %146 = vector.extract_strided_slice %0 {offsets = [27, 0], sizes = [1, 128], strides = [1, 1]} : vector<40x128xf32> to vector<1x128xf32>
    %147 = vector.extract_strided_slice %10 {offsets = [864, 0], sizes = [32, 128], strides = [1, 1]} : vector<1248x128xf32> to vector<32x128xf32>
    %148 = vector.broadcast %146 : vector<1x128xf32> to vector<32x128xf32>
    %149 = arith.mulf %148, %147 : vector<32x128xf32>
    %150 = arith.addf %145, %149 : vector<32x128xf32>
    %151 = vector.extract_strided_slice %0 {offsets = [28, 0], sizes = [1, 128], strides = [1, 1]} : vector<40x128xf32> to vector<1x128xf32>
    %152 = vector.extract_strided_slice %10 {offsets = [896, 0], sizes = [32, 128], strides = [1, 1]} : vector<1248x128xf32> to vector<32x128xf32>
    %153 = vector.broadcast %151 : vector<1x128xf32> to vector<32x128xf32>
    %154 = arith.mulf %153, %152 : vector<32x128xf32>
    %155 = arith.addf %150, %154 : vector<32x128xf32>
    %156 = vector.extract_strided_slice %0 {offsets = [29, 0], sizes = [1, 128], strides = [1, 1]} : vector<40x128xf32> to vector<1x128xf32>
    %157 = vector.extract_strided_slice %10 {offsets = [928, 0], sizes = [32, 128], strides = [1, 1]} : vector<1248x128xf32> to vector<32x128xf32>
    %158 = vector.broadcast %156 : vector<1x128xf32> to vector<32x128xf32>
    %159 = arith.mulf %158, %157 : vector<32x128xf32>
    %160 = arith.addf %155, %159 : vector<32x128xf32>
    %161 = vector.extract_strided_slice %0 {offsets = [30, 0], sizes = [1, 128], strides = [1, 1]} : vector<40x128xf32> to vector<1x128xf32>
    %162 = vector.extract_strided_slice %10 {offsets = [960, 0], sizes = [32, 128], strides = [1, 1]} : vector<1248x128xf32> to vector<32x128xf32>
    %163 = vector.broadcast %161 : vector<1x128xf32> to vector<32x128xf32>
    %164 = arith.mulf %163, %162 : vector<32x128xf32>
    %165 = arith.addf %160, %164 : vector<32x128xf32>
    %166 = vector.extract_strided_slice %0 {offsets = [31, 0], sizes = [1, 128], strides = [1, 1]} : vector<40x128xf32> to vector<1x128xf32>
    %167 = vector.extract_strided_slice %10 {offsets = [992, 0], sizes = [32, 128], strides = [1, 1]} : vector<1248x128xf32> to vector<32x128xf32>
    %168 = vector.broadcast %166 : vector<1x128xf32> to vector<32x128xf32>
    %169 = arith.mulf %168, %167 : vector<32x128xf32>
    %170 = arith.addf %165, %169 : vector<32x128xf32>
    %171 = vector.extract_strided_slice %0 {offsets = [32, 0], sizes = [1, 128], strides = [1, 1]} : vector<40x128xf32> to vector<1x128xf32>
    %172 = vector.extract_strided_slice %10 {offsets = [1024, 0], sizes = [32, 128], strides = [1, 1]} : vector<1248x128xf32> to vector<32x128xf32>
    %173 = vector.broadcast %171 : vector<1x128xf32> to vector<32x128xf32>
    %174 = arith.mulf %173, %172 : vector<32x128xf32>
    %175 = arith.addf %170, %174 : vector<32x128xf32>
    %176 = vector.extract_strided_slice %0 {offsets = [33, 0], sizes = [1, 128], strides = [1, 1]} : vector<40x128xf32> to vector<1x128xf32>
    %177 = vector.extract_strided_slice %10 {offsets = [1056, 0], sizes = [32, 128], strides = [1, 1]} : vector<1248x128xf32> to vector<32x128xf32>
    %178 = vector.broadcast %176 : vector<1x128xf32> to vector<32x128xf32>
    %179 = arith.mulf %178, %177 : vector<32x128xf32>
    %180 = arith.addf %175, %179 : vector<32x128xf32>
    %181 = vector.extract_strided_slice %0 {offsets = [34, 0], sizes = [1, 128], strides = [1, 1]} : vector<40x128xf32> to vector<1x128xf32>
    %182 = vector.extract_strided_slice %10 {offsets = [1088, 0], sizes = [32, 128], strides = [1, 1]} : vector<1248x128xf32> to vector<32x128xf32>
    %183 = vector.broadcast %181 : vector<1x128xf32> to vector<32x128xf32>
    %184 = arith.mulf %183, %182 : vector<32x128xf32>
    %185 = arith.addf %180, %184 : vector<32x128xf32>
    %186 = vector.extract_strided_slice %0 {offsets = [35, 0], sizes = [1, 128], strides = [1, 1]} : vector<40x128xf32> to vector<1x128xf32>
    %187 = vector.extract_strided_slice %10 {offsets = [1120, 0], sizes = [32, 128], strides = [1, 1]} : vector<1248x128xf32> to vector<32x128xf32>
    %188 = vector.broadcast %186 : vector<1x128xf32> to vector<32x128xf32>
    %189 = arith.mulf %188, %187 : vector<32x128xf32>
    %190 = arith.addf %185, %189 : vector<32x128xf32>
    %191 = vector.extract_strided_slice %0 {offsets = [36, 0], sizes = [1, 128], strides = [1, 1]} : vector<40x128xf32> to vector<1x128xf32>
    %192 = vector.extract_strided_slice %10 {offsets = [1152, 0], sizes = [32, 128], strides = [1, 1]} : vector<1248x128xf32> to vector<32x128xf32>
    %193 = vector.broadcast %191 : vector<1x128xf32> to vector<32x128xf32>
    %194 = arith.mulf %193, %192 : vector<32x128xf32>
    %195 = arith.addf %190, %194 : vector<32x128xf32>
    %196 = vector.extract_strided_slice %0 {offsets = [37, 0], sizes = [1, 128], strides = [1, 1]} : vector<40x128xf32> to vector<1x128xf32>
    %197 = vector.extract_strided_slice %10 {offsets = [1184, 0], sizes = [32, 128], strides = [1, 1]} : vector<1248x128xf32> to vector<32x128xf32>
    %198 = vector.broadcast %196 : vector<1x128xf32> to vector<32x128xf32>
    %199 = arith.mulf %198, %197 : vector<32x128xf32>
    %200 = arith.addf %195, %199 : vector<32x128xf32>
    %201 = vector.extract_strided_slice %0 {offsets = [38, 0], sizes = [1, 128], strides = [1, 1]} : vector<40x128xf32> to vector<1x128xf32>
    %202 = vector.extract_strided_slice %10 {offsets = [1216, 0], sizes = [32, 128], strides = [1, 1]} : vector<1248x128xf32> to vector<32x128xf32>
    %203 = vector.broadcast %201 : vector<1x128xf32> to vector<32x128xf32>
    %204 = arith.mulf %203, %202 : vector<32x128xf32>
    %205 = arith.addf %200, %204 : vector<32x128xf32>
    %c0_7 = arith.constant 0 : index
    %c0_8 = arith.constant 0 : index
    %206 = vector.load %arg2[%c0_7, %c0_8] : memref<3x128xf32, #tpu.memory_space<vmem>>, vector<3x128xf32>
    %cst_9 = arith.constant dense<0xFF800000> : vector<128xf32>
    %207 = vector.multi_reduction <maximumf>, %206, %cst_9 [0] : vector<3x128xf32> to vector<128xf32>
    %208 = vector.shape_cast %207 : vector<128xf32> to vector<1x128xf32>
    %209 = vector.broadcast %208 : vector<1x128xf32> to vector<3x128xf32>
    %210 = arith.subf %206, %209 : vector<3x128xf32>
    %211 = math.exp %210 : vector<3x128xf32>
    %cst_10 = arith.constant dense<0.000000e+00> : vector<128xf32>
    %212 = vector.multi_reduction <add>, %211, %cst_10 [0] : vector<3x128xf32> to vector<128xf32>
    %213 = vector.shape_cast %212 : vector<128xf32> to vector<1x128xf32>
    %214 = tpu.reciprocal %213 {approx = true} : vector<1x128xf32> -> vector<1x128xf32>
    %215 = vector.broadcast %214 : vector<1x128xf32> to vector<3x128xf32>
    %216 = arith.mulf %211, %215 : vector<3x128xf32>
    %c0_11 = arith.constant 0 : index
    %c0_12 = arith.constant 0 : index
    %217 = vector.load %arg7[%c0_11, %c0_12] : memref<273x32xbf16, #tpu.memory_space<vmem>>, vector<273x32xbf16>
    %218 = arith.truncf %205 : vector<32x128xf32> to vector<32x128xbf16>
    %cst_13 = arith.constant dense<0.000000e+00> : vector<273x128xf32>
    %219 = tpu.matmul %217, %218, %cst_13 {dimension_numbers = #tpu.dot_dimension_numbers<[1], [0], [0], [1], [0, 0, 1, 1], [], []>} : vector<273x32xbf16>, vector<32x128xbf16>, vector<273x128xf32> -> vector<273x128xf32>
    %220 = vector.extract_strided_slice %219 {offsets = [0, 0], sizes = [256, 128], strides = [1, 1]} : vector<273x128xf32> to vector<256x128xf32>
    %221 = vector.extract_strided_slice %219 {offsets = [256, 0], sizes = [8, 128], strides = [1, 1]} : vector<273x128xf32> to vector<8x128xf32>
    %222 = vector.extract_strided_slice %219 {offsets = [264, 0], sizes = [9, 128], strides = [1, 1]} : vector<273x128xf32> to vector<9x128xf32>
    %c0_14 = arith.constant 0 : index
    %c0_15 = arith.constant 0 : index
    %223 = vector.load %arg8[%c0_14, %c0_15] : memref<9x1xf32, #tpu.memory_space<vmem>>, vector<9x1xf32>
    %224 = vector.broadcast %223 : vector<9x1xf32> to vector<9x128xf32>
    %225 = arith.addf %222, %224 : vector<9x128xf32>
    %c0_16 = arith.constant 0 : index
    %c0_17 = arith.constant 0 : index
    %226 = vector.load %arg10[%c0_16, %c0_17] : memref<9x128xf32, #tpu.memory_space<vmem>>, vector<9x128xf32>
    tpu.vector_store %arg10[%c0_16, %c0_17], %225 {strides = array<i32>} : memref<9x128xf32, #tpu.memory_space<vmem>>, vector<9x128xf32>,
    %c0_18 = arith.constant 0 : index
    %c0_19 = arith.constant 0 : index
    %227 = vector.load %arg5[%c0_18, %c0_19] : memref<32x1xf32, #tpu.memory_space<vmem>>, vector<32x1xf32>
    %c0_20 = arith.constant 0 : index
    %c0_21 = arith.constant 0 : index
    %228 = vector.load %arg6[%c0_20, %c0_21] : memref<32x1xf32, #tpu.memory_space<vmem>>, vector<32x1xf32>
    %229 = vector.extract_strided_slice %216 {offsets = [0, 0], sizes = [1, 128], strides = [1, 1]} : vector<3x128xf32> to vector<1x128xf32>
    %230 = vector.broadcast %227 : vector<32x1xf32> to vector<32x128xf32>
    %231 = vector.broadcast %229 : vector<1x128xf32> to vector<32x128xf32>
    %232 = arith.mulf %230, %231 : vector<32x128xf32>
    %233 = vector.broadcast %228 : vector<32x1xf32> to vector<32x128xf32>
    %234 = arith.addf %232, %233 : vector<32x128xf32>
    %cst_22 = arith.constant 0.000000e+00 : f32
    %235 = vector.broadcast %cst_22 : f32 to vector<32x128xf32>
    %236 = arith.maximumf %234, %235 : vector<32x128xf32>
    %237 = vector.extract_strided_slice %216 {offsets = [1, 0], sizes = [1, 128], strides = [1, 1]} : vector<3x128xf32> to vector<1x128xf32>
    %238 = vector.broadcast %227 : vector<32x1xf32> to vector<32x128xf32>
    %239 = vector.broadcast %237 : vector<1x128xf32> to vector<32x128xf32>
    %240 = arith.mulf %238, %239 : vector<32x128xf32>
    %241 = vector.broadcast %228 : vector<32x1xf32> to vector<32x128xf32>
    %242 = arith.addf %240, %241 : vector<32x128xf32>
    %cst_23 = arith.constant 0.000000e+00 : f32
    %243 = vector.broadcast %cst_23 : f32 to vector<32x128xf32>
    %244 = arith.maximumf %242, %243 : vector<32x128xf32>
    %245 = vector.extract_strided_slice %216 {offsets = [2, 0], sizes = [1, 128], strides = [1, 1]} : vector<3x128xf32> to vector<1x128xf32>
    %246 = vector.broadcast %227 : vector<32x1xf32> to vector<32x128xf32>
    %247 = vector.broadcast %245 : vector<1x128xf32> to vector<32x128xf32>
    %248 = arith.mulf %246, %247 : vector<32x128xf32>
    %249 = vector.broadcast %228 : vector<32x1xf32> to vector<32x128xf32>
    %250 = arith.addf %248, %249 : vector<32x128xf32>
    %cst_24 = arith.constant 0.000000e+00 : f32
    %251 = vector.broadcast %cst_24 : f32 to vector<32x128xf32>
    %252 = arith.maximumf %250, %251 : vector<32x128xf32>
    %253 = vector.extract_strided_slice %220 {offsets = [0, 0], sizes = [8, 128], strides = [1, 1]} : vector<256x128xf32> to vector<8x128xf32>
    %254 = vector.extract_strided_slice %236 {offsets = [0, 0], sizes = [1, 128], strides = [1, 1]} : vector<32x128xf32> to vector<1x128xf32>
    %255 = vector.broadcast %254 : vector<1x128xf32> to vector<8x128xf32>
    %256 = arith.mulf %255, %253 : vector<8x128xf32>
    %257 = arith.addf %221, %256 : vector<8x128xf32>
    %258 = vector.extract_strided_slice %244 {offsets = [0, 0], sizes = [1, 128], strides = [1, 1]} : vector<32x128xf32> to vector<1x128xf32>
    %259 = vector.broadcast %258 : vector<1x128xf32> to vector<8x128xf32>
    %260 = arith.mulf %259, %253 : vector<8x128xf32>
    %261 = arith.addf %221, %260 : vector<8x128xf32>
    %262 = vector.extract_strided_slice %252 {offsets = [0, 0], sizes = [1, 128], strides = [1, 1]} : vector<32x128xf32> to vector<1x128xf32>
    %263 = vector.broadcast %262 : vector<1x128xf32> to vector<8x128xf32>
    %264 = arith.mulf %263, %253 : vector<8x128xf32>
    %265 = arith.addf %221, %264 : vector<8x128xf32>
    %266 = vector.extract_strided_slice %220 {offsets = [8, 0], sizes = [8, 128], strides = [1, 1]} : vector<256x128xf32> to vector<8x128xf32>
    %267 = vector.extract_strided_slice %236 {offsets = [1, 0], sizes = [1, 128], strides = [1, 1]} : vector<32x128xf32> to vector<1x128xf32>
    %268 = vector.broadcast %267 : vector<1x128xf32> to vector<8x128xf32>
    %269 = arith.mulf %268, %266 : vector<8x128xf32>
    %270 = arith.addf %257, %269 : vector<8x128xf32>
    %271 = vector.extract_strided_slice %244 {offsets = [1, 0], sizes = [1, 128], strides = [1, 1]} : vector<32x128xf32> to vector<1x128xf32>
    %272 = vector.broadcast %271 : vector<1x128xf32> to vector<8x128xf32>
    %273 = arith.mulf %272, %266 : vector<8x128xf32>
    %274 = arith.addf %261, %273 : vector<8x128xf32>
    %275 = vector.extract_strided_slice %252 {offsets = [1, 0], sizes = [1, 128], strides = [1, 1]} : vector<32x128xf32> to vector<1x128xf32>
    %276 = vector.broadcast %275 : vector<1x128xf32> to vector<8x128xf32>
    %277 = arith.mulf %276, %266 : vector<8x128xf32>
    %278 = arith.addf %265, %277 : vector<8x128xf32>
    %279 = vector.extract_strided_slice %220 {offsets = [16, 0], sizes = [8, 128], strides = [1, 1]} : vector<256x128xf32> to vector<8x128xf32>
    %280 = vector.extract_strided_slice %236 {offsets = [2, 0], sizes = [1, 128], strides = [1, 1]} : vector<32x128xf32> to vector<1x128xf32>
    %281 = vector.broadcast %280 : vector<1x128xf32> to vector<8x128xf32>
    %282 = arith.mulf %281, %279 : vector<8x128xf32>
    %283 = arith.addf %270, %282 : vector<8x128xf32>
    %284 = vector.extract_strided_slice %244 {offsets = [2, 0], sizes = [1, 128], strides = [1, 1]} : vector<32x128xf32> to vector<1x128xf32>
    %285 = vector.broadcast %284 : vector<1x128xf32> to vector<8x128xf32>
    %286 = arith.mulf %285, %279 : vector<8x128xf32>
    %287 = arith.addf %274, %286 : vector<8x128xf32>
    %288 = vector.extract_strided_slice %252 {offsets = [2, 0], sizes = [1, 128], strides = [1, 1]} : vector<32x128xf32> to vector<1x128xf32>
    %289 = vector.broadcast %288 : vector<1x128xf32> to vector<8x128xf32>
    %290 = arith.mulf %289, %279 : vector<8x128xf32>
    %291 = arith.addf %278, %290 : vector<8x128xf32>
    %292 = vector.extract_strided_slice %220 {offsets = [24, 0], sizes = [8, 128], strides = [1, 1]} : vector<256x128xf32> to vector<8x128xf32>
    %293 = vector.extract_strided_slice %236 {offsets = [3, 0], sizes = [1, 128], strides = [1, 1]} : vector<32x128xf32> to vector<1x128xf32>
    %294 = vector.broadcast %293 : vector<1x128xf32> to vector<8x128xf32>
    %295 = arith.mulf %294, %292 : vector<8x128xf32>
    %296 = arith.addf %283, %295 : vector<8x128xf32>
    %297 = vector.extract_strided_slice %244 {offsets = [3, 0], sizes = [1, 128], strides = [1, 1]} : vector<32x128xf32> to vector<1x128xf32>
    %298 = vector.broadcast %297 : vector<1x128xf32> to vector<8x128xf32>
    %299 = arith.mulf %298, %292 : vector<8x128xf32>
    %300 = arith.addf %287, %299 : vector<8x128xf32>
    %301 = vector.extract_strided_slice %252 {offsets = [3, 0], sizes = [1, 128], strides = [1, 1]} : vector<32x128xf32> to vector<1x128xf32>
    %302 = vector.broadcast %301 : vector<1x128xf32> to vector<8x128xf32>
    %303 = arith.mulf %302, %292 : vector<8x128xf32>
    %304 = arith.addf %291, %303 : vector<8x128xf32>
    %305 = vector.extract_strided_slice %220 {offsets = [32, 0], sizes = [8, 128], strides = [1, 1]} : vector<256x128xf32> to vector<8x128xf32>
    %306 = vector.extract_strided_slice %236 {offsets = [4, 0], sizes = [1, 128], strides = [1, 1]} : vector<32x128xf32> to vector<1x128xf32>
    %307 = vector.broadcast %306 : vector<1x128xf32> to vector<8x128xf32>
    %308 = arith.mulf %307, %305 : vector<8x128xf32>
    %309 = arith.addf %296, %308 : vector<8x128xf32>
    %310 = vector.extract_strided_slice %244 {offsets = [4, 0], sizes = [1, 128], strides = [1, 1]} : vector<32x128xf32> to vector<1x128xf32>
    %311 = vector.broadcast %310 : vector<1x128xf32> to vector<8x128xf32>
    %312 = arith.mulf %311, %305 : vector<8x128xf32>
    %313 = arith.addf %300, %312 : vector<8x128xf32>
    %314 = vector.extract_strided_slice %252 {offsets = [4, 0], sizes = [1, 128], strides = [1, 1]} : vector<32x128xf32> to vector<1x128xf32>
    %315 = vector.broadcast %314 : vector<1x128xf32> to vector<8x128xf32>
    %316 = arith.mulf %315, %305 : vector<8x128xf32>
    %317 = arith.addf %304, %316 : vector<8x128xf32>
    %318 = vector.extract_strided_slice %220 {offsets = [40, 0], sizes = [8, 128], strides = [1, 1]} : vector<256x128xf32> to vector<8x128xf32>
    %319 = vector.extract_strided_slice %236 {offsets = [5, 0], sizes = [1, 128], strides = [1, 1]} : vector<32x128xf32> to vector<1x128xf32>
    %320 = vector.broadcast %319 : vector<1x128xf32> to vector<8x128xf32>
    %321 = arith.mulf %320, %318 : vector<8x128xf32>
    %322 = arith.addf %309, %321 : vector<8x128xf32>
    %323 = vector.extract_strided_slice %244 {offsets = [5, 0], sizes = [1, 128], strides = [1, 1]} : vector<32x128xf32> to vector<1x128xf32>
    %324 = vector.broadcast %323 : vector<1x128xf32> to vector<8x128xf32>
    %325 = arith.mulf %324, %318 : vector<8x128xf32>
    %326 = arith.addf %313, %325 : vector<8x128xf32>
    %327 = vector.extract_strided_slice %252 {offsets = [5, 0], sizes = [1, 128], strides = [1, 1]} : vector<32x128xf32> to vector<1x128xf32>
    %328 = vector.broadcast %327 : vector<1x128xf32> to vector<8x128xf32>
    %329 = arith.mulf %328, %318 : vector<8x128xf32>
    %330 = arith.addf %317, %329 : vector<8x128xf32>
    %331 = vector.extract_strided_slice %220 {offsets = [48, 0], sizes = [8, 128], strides = [1, 1]} : vector<256x128xf32> to vector<8x128xf32>
    %332 = vector.extract_strided_slice %236 {offsets = [6, 0], sizes = [1, 128], strides = [1, 1]} : vector<32x128xf32> to vector<1x128xf32>
    %333 = vector.broadcast %332 : vector<1x128xf32> to vector<8x128xf32>
    %334 = arith.mulf %333, %331 : vector<8x128xf32>
    %335 = arith.addf %322, %334 : vector<8x128xf32>
    %336 = vector.extract_strided_slice %244 {offsets = [6, 0], sizes = [1, 128], strides = [1, 1]} : vector<32x128xf32> to vector<1x128xf32>
    %337 = vector.broadcast %336 : vector<1x128xf32> to vector<8x128xf32>
    %338 = arith.mulf %337, %331 : vector<8x128xf32>
    %339 = arith.addf %326, %338 : vector<8x128xf32>
    %340 = vector.extract_strided_slice %252 {offsets = [6, 0], sizes = [1, 128], strides = [1, 1]} : vector<32x128xf32> to vector<1x128xf32>
    %341 = vector.broadcast %340 : vector<1x128xf32> to vector<8x128xf32>
    %342 = arith.mulf %341, %331 : vector<8x128xf32>
    %343 = arith.addf %330, %342 : vector<8x128xf32>
    %344 = vector.extract_strided_slice %220 {offsets = [56, 0], sizes = [8, 128], strides = [1, 1]} : vector<256x128xf32> to vector<8x128xf32>
    %345 = vector.extract_strided_slice %236 {offsets = [7, 0], sizes = [1, 128], strides = [1, 1]} : vector<32x128xf32> to vector<1x128xf32>
    %346 = vector.broadcast %345 : vector<1x128xf32> to vector<8x128xf32>
    %347 = arith.mulf %346, %344 : vector<8x128xf32>
    %348 = arith.addf %335, %347 : vector<8x128xf32>
    %349 = vector.extract_strided_slice %244 {offsets = [7, 0], sizes = [1, 128], strides = [1, 1]} : vector<32x128xf32> to vector<1x128xf32>
    %350 = vector.broadcast %349 : vector<1x128xf32> to vector<8x128xf32>
    %351 = arith.mulf %350, %344 : vector<8x128xf32>
    %352 = arith.addf %339, %351 : vector<8x128xf32>
    %353 = vector.extract_strided_slice %252 {offsets = [7, 0], sizes = [1, 128], strides = [1, 1]} : vector<32x128xf32> to vector<1x128xf32>
    %354 = vector.broadcast %353 : vector<1x128xf32> to vector<8x128xf32>
    %355 = arith.mulf %354, %344 : vector<8x128xf32>
    %356 = arith.addf %343, %355 : vector<8x128xf32>
    %357 = vector.extract_strided_slice %220 {offsets = [64, 0], sizes = [8, 128], strides = [1, 1]} : vector<256x128xf32> to vector<8x128xf32>
    %358 = vector.extract_strided_slice %236 {offsets = [8, 0], sizes = [1, 128], strides = [1, 1]} : vector<32x128xf32> to vector<1x128xf32>
    %359 = vector.broadcast %358 : vector<1x128xf32> to vector<8x128xf32>
    %360 = arith.mulf %359, %357 : vector<8x128xf32>
    %361 = arith.addf %348, %360 : vector<8x128xf32>
    %362 = vector.extract_strided_slice %244 {offsets = [8, 0], sizes = [1, 128], strides = [1, 1]} : vector<32x128xf32> to vector<1x128xf32>
    %363 = vector.broadcast %362 : vector<1x128xf32> to vector<8x128xf32>
    %364 = arith.mulf %363, %357 : vector<8x128xf32>
    %365 = arith.addf %352, %364 : vector<8x128xf32>
    %366 = vector.extract_strided_slice %252 {offsets = [8, 0], sizes = [1, 128], strides = [1, 1]} : vector<32x128xf32> to vector<1x128xf32>
    %367 = vector.broadcast %366 : vector<1x128xf32> to vector<8x128xf32>
    %368 = arith.mulf %367, %357 : vector<8x128xf32>
    %369 = arith.addf %356, %368 : vector<8x128xf32>
    %370 = vector.extract_strided_slice %220 {offsets = [72, 0], sizes = [8, 128], strides = [1, 1]} : vector<256x128xf32> to vector<8x128xf32>
    %371 = vector.extract_strided_slice %236 {offsets = [9, 0], sizes = [1, 128], strides = [1, 1]} : vector<32x128xf32> to vector<1x128xf32>
    %372 = vector.broadcast %371 : vector<1x128xf32> to vector<8x128xf32>
    %373 = arith.mulf %372, %370 : vector<8x128xf32>
    %374 = arith.addf %361, %373 : vector<8x128xf32>
    %375 = vector.extract_strided_slice %244 {offsets = [9, 0], sizes = [1, 128], strides = [1, 1]} : vector<32x128xf32> to vector<1x128xf32>
    %376 = vector.broadcast %375 : vector<1x128xf32> to vector<8x128xf32>
    %377 = arith.mulf %376, %370 : vector<8x128xf32>
    %378 = arith.addf %365, %377 : vector<8x128xf32>
    %379 = vector.extract_strided_slice %252 {offsets = [9, 0], sizes = [1, 128], strides = [1, 1]} : vector<32x128xf32> to vector<1x128xf32>
    %380 = vector.broadcast %379 : vector<1x128xf32> to vector<8x128xf32>
    %381 = arith.mulf %380, %370 : vector<8x128xf32>
    %382 = arith.addf %369, %381 : vector<8x128xf32>
    %383 = vector.extract_strided_slice %220 {offsets = [80, 0], sizes = [8, 128], strides = [1, 1]} : vector<256x128xf32> to vector<8x128xf32>
    %384 = vector.extract_strided_slice %236 {offsets = [10, 0], sizes = [1, 128], strides = [1, 1]} : vector<32x128xf32> to vector<1x128xf32>
    %385 = vector.broadcast %384 : vector<1x128xf32> to vector<8x128xf32>
    %386 = arith.mulf %385, %383 : vector<8x128xf32>
    %387 = arith.addf %374, %386 : vector<8x128xf32>
    %388 = vector.extract_strided_slice %244 {offsets = [10, 0], sizes = [1, 128], strides = [1, 1]} : vector<32x128xf32> to vector<1x128xf32>
    %389 = vector.broadcast %388 : vector<1x128xf32> to vector<8x128xf32>
    %390 = arith.mulf %389, %383 : vector<8x128xf32>
    %391 = arith.addf %378, %390 : vector<8x128xf32>
    %392 = vector.extract_strided_slice %252 {offsets = [10, 0], sizes = [1, 128], strides = [1, 1]} : vector<32x128xf32> to vector<1x128xf32>
    %393 = vector.broadcast %392 : vector<1x128xf32> to vector<8x128xf32>
    %394 = arith.mulf %393, %383 : vector<8x128xf32>
    %395 = arith.addf %382, %394 : vector<8x128xf32>
    %396 = vector.extract_strided_slice %220 {offsets = [88, 0], sizes = [8, 128], strides = [1, 1]} : vector<256x128xf32> to vector<8x128xf32>
    %397 = vector.extract_strided_slice %236 {offsets = [11, 0], sizes = [1, 128], strides = [1, 1]} : vector<32x128xf32> to vector<1x128xf32>
    %398 = vector.broadcast %397 : vector<1x128xf32> to vector<8x128xf32>
    %399 = arith.mulf %398, %396 : vector<8x128xf32>
    %400 = arith.addf %387, %399 : vector<8x128xf32>
    %401 = vector.extract_strided_slice %244 {offsets = [11, 0], sizes = [1, 128], strides = [1, 1]} : vector<32x128xf32> to vector<1x128xf32>
    %402 = vector.broadcast %401 : vector<1x128xf32> to vector<8x128xf32>
    %403 = arith.mulf %402, %396 : vector<8x128xf32>
    %404 = arith.addf %391, %403 : vector<8x128xf32>
    %405 = vector.extract_strided_slice %252 {offsets = [11, 0], sizes = [1, 128], strides = [1, 1]} : vector<32x128xf32> to vector<1x128xf32>
    %406 = vector.broadcast %405 : vector<1x128xf32> to vector<8x128xf32>
    %407 = arith.mulf %406, %396 : vector<8x128xf32>
    %408 = arith.addf %395, %407 : vector<8x128xf32>
    %409 = vector.extract_strided_slice %220 {offsets = [96, 0], sizes = [8, 128], strides = [1, 1]} : vector<256x128xf32> to vector<8x128xf32>
    %410 = vector.extract_strided_slice %236 {offsets = [12, 0], sizes = [1, 128], strides = [1, 1]} : vector<32x128xf32> to vector<1x128xf32>
    %411 = vector.broadcast %410 : vector<1x128xf32> to vector<8x128xf32>
    %412 = arith.mulf %411, %409 : vector<8x128xf32>
    %413 = arith.addf %400, %412 : vector<8x128xf32>
    %414 = vector.extract_strided_slice %244 {offsets = [12, 0], sizes = [1, 128], strides = [1, 1]} : vector<32x128xf32> to vector<1x128xf32>
    %415 = vector.broadcast %414 : vector<1x128xf32> to vector<8x128xf32>
    %416 = arith.mulf %415, %409 : vector<8x128xf32>
    %417 = arith.addf %404, %416 : vector<8x128xf32>
    %418 = vector.extract_strided_slice %252 {offsets = [12, 0], sizes = [1, 128], strides = [1, 1]} : vector<32x128xf32> to vector<1x128xf32>
    %419 = vector.broadcast %418 : vector<1x128xf32> to vector<8x128xf32>
    %420 = arith.mulf %419, %409 : vector<8x128xf32>
    %421 = arith.addf %408, %420 : vector<8x128xf32>
    %422 = vector.extract_strided_slice %220 {offsets = [104, 0], sizes = [8, 128], strides = [1, 1]} : vector<256x128xf32> to vector<8x128xf32>
    %423 = vector.extract_strided_slice %236 {offsets = [13, 0], sizes = [1, 128], strides = [1, 1]} : vector<32x128xf32> to vector<1x128xf32>
    %424 = vector.broadcast %423 : vector<1x128xf32> to vector<8x128xf32>
    %425 = arith.mulf %424, %422 : vector<8x128xf32>
    %426 = arith.addf %413, %425 : vector<8x128xf32>
    %427 = vector.extract_strided_slice %244 {offsets = [13, 0], sizes = [1, 128], strides = [1, 1]} : vector<32x128xf32> to vector<1x128xf32>
    %428 = vector.broadcast %427 : vector<1x128xf32> to vector<8x128xf32>
    %429 = arith.mulf %428, %422 : vector<8x128xf32>
    %430 = arith.addf %417, %429 : vector<8x128xf32>
    %431 = vector.extract_strided_slice %252 {offsets = [13, 0], sizes = [1, 128], strides = [1, 1]} : vector<32x128xf32> to vector<1x128xf32>
    %432 = vector.broadcast %431 : vector<1x128xf32> to vector<8x128xf32>
    %433 = arith.mulf %432, %422 : vector<8x128xf32>
    %434 = arith.addf %421, %433 : vector<8x128xf32>
    %435 = vector.extract_strided_slice %220 {offsets = [112, 0], sizes = [8, 128], strides = [1, 1]} : vector<256x128xf32> to vector<8x128xf32>
    %436 = vector.extract_strided_slice %236 {offsets = [14, 0], sizes = [1, 128], strides = [1, 1]} : vector<32x128xf32> to vector<1x128xf32>
    %437 = vector.broadcast %436 : vector<1x128xf32> to vector<8x128xf32>
    %438 = arith.mulf %437, %435 : vector<8x128xf32>
    %439 = arith.addf %426, %438 : vector<8x128xf32>
    %440 = vector.extract_strided_slice %244 {offsets = [14, 0], sizes = [1, 128], strides = [1, 1]} : vector<32x128xf32> to vector<1x128xf32>
    %441 = vector.broadcast %440 : vector<1x128xf32> to vector<8x128xf32>
    %442 = arith.mulf %441, %435 : vector<8x128xf32>
    %443 = arith.addf %430, %442 : vector<8x128xf32>
    %444 = vector.extract_strided_slice %252 {offsets = [14, 0], sizes = [1, 128], strides = [1, 1]} : vector<32x128xf32> to vector<1x128xf32>
    %445 = vector.broadcast %444 : vector<1x128xf32> to vector<8x128xf32>
    %446 = arith.mulf %445, %435 : vector<8x128xf32>
    %447 = arith.addf %434, %446 : vector<8x128xf32>
    %448 = vector.extract_strided_slice %220 {offsets = [120, 0], sizes = [8, 128], strides = [1, 1]} : vector<256x128xf32> to vector<8x128xf32>
    %449 = vector.extract_strided_slice %236 {offsets = [15, 0], sizes = [1, 128], strides = [1, 1]} : vector<32x128xf32> to vector<1x128xf32>
    %450 = vector.broadcast %449 : vector<1x128xf32> to vector<8x128xf32>
    %451 = arith.mulf %450, %448 : vector<8x128xf32>
    %452 = arith.addf %439, %451 : vector<8x128xf32>
    %453 = vector.extract_strided_slice %244 {offsets = [15, 0], sizes = [1, 128], strides = [1, 1]} : vector<32x128xf32> to vector<1x128xf32>
    %454 = vector.broadcast %453 : vector<1x128xf32> to vector<8x128xf32>
    %455 = arith.mulf %454, %448 : vector<8x128xf32>
    %456 = arith.addf %443, %455 : vector<8x128xf32>
    %457 = vector.extract_strided_slice %252 {offsets = [15, 0], sizes = [1, 128], strides = [1, 1]} : vector<32x128xf32> to vector<1x128xf32>
    %458 = vector.broadcast %457 : vector<1x128xf32> to vector<8x128xf32>
    %459 = arith.mulf %458, %448 : vector<8x128xf32>
    %460 = arith.addf %447, %459 : vector<8x128xf32>
    %461 = vector.extract_strided_slice %220 {offsets = [128, 0], sizes = [8, 128], strides = [1, 1]} : vector<256x128xf32> to vector<8x128xf32>
    %462 = vector.extract_strided_slice %236 {offsets = [16, 0], sizes = [1, 128], strides = [1, 1]} : vector<32x128xf32> to vector<1x128xf32>
    %463 = vector.broadcast %462 : vector<1x128xf32> to vector<8x128xf32>
    %464 = arith.mulf %463, %461 : vector<8x128xf32>
    %465 = arith.addf %452, %464 : vector<8x128xf32>
    %466 = vector.extract_strided_slice %244 {offsets = [16, 0], sizes = [1, 128], strides = [1, 1]} : vector<32x128xf32> to vector<1x128xf32>
    %467 = vector.broadcast %466 : vector<1x128xf32> to vector<8x128xf32>
    %468 = arith.mulf %467, %461 : vector<8x128xf32>
    %469 = arith.addf %456, %468 : vector<8x128xf32>
    %470 = vector.extract_strided_slice %252 {offsets = [16, 0], sizes = [1, 128], strides = [1, 1]} : vector<32x128xf32> to vector<1x128xf32>
    %471 = vector.broadcast %470 : vector<1x128xf32> to vector<8x128xf32>
    %472 = arith.mulf %471, %461 : vector<8x128xf32>
    %473 = arith.addf %460, %472 : vector<8x128xf32>
    %474 = vector.extract_strided_slice %220 {offsets = [136, 0], sizes = [8, 128], strides = [1, 1]} : vector<256x128xf32> to vector<8x128xf32>
    %475 = vector.extract_strided_slice %236 {offsets = [17, 0], sizes = [1, 128], strides = [1, 1]} : vector<32x128xf32> to vector<1x128xf32>
    %476 = vector.broadcast %475 : vector<1x128xf32> to vector<8x128xf32>
    %477 = arith.mulf %476, %474 : vector<8x128xf32>
    %478 = arith.addf %465, %477 : vector<8x128xf32>
    %479 = vector.extract_strided_slice %244 {offsets = [17, 0], sizes = [1, 128], strides = [1, 1]} : vector<32x128xf32> to vector<1x128xf32>
    %480 = vector.broadcast %479 : vector<1x128xf32> to vector<8x128xf32>
    %481 = arith.mulf %480, %474 : vector<8x128xf32>
    %482 = arith.addf %469, %481 : vector<8x128xf32>
    %483 = vector.extract_strided_slice %252 {offsets = [17, 0], sizes = [1, 128], strides = [1, 1]} : vector<32x128xf32> to vector<1x128xf32>
    %484 = vector.broadcast %483 : vector<1x128xf32> to vector<8x128xf32>
    %485 = arith.mulf %484, %474 : vector<8x128xf32>
    %486 = arith.addf %473, %485 : vector<8x128xf32>
    %487 = vector.extract_strided_slice %220 {offsets = [144, 0], sizes = [8, 128], strides = [1, 1]} : vector<256x128xf32> to vector<8x128xf32>
    %488 = vector.extract_strided_slice %236 {offsets = [18, 0], sizes = [1, 128], strides = [1, 1]} : vector<32x128xf32> to vector<1x128xf32>
    %489 = vector.broadcast %488 : vector<1x128xf32> to vector<8x128xf32>
    %490 = arith.mulf %489, %487 : vector<8x128xf32>
    %491 = arith.addf %478, %490 : vector<8x128xf32>
    %492 = vector.extract_strided_slice %244 {offsets = [18, 0], sizes = [1, 128], strides = [1, 1]} : vector<32x128xf32> to vector<1x128xf32>
    %493 = vector.broadcast %492 : vector<1x128xf32> to vector<8x128xf32>
    %494 = arith.mulf %493, %487 : vector<8x128xf32>
    %495 = arith.addf %482, %494 : vector<8x128xf32>
    %496 = vector.extract_strided_slice %252 {offsets = [18, 0], sizes = [1, 128], strides = [1, 1]} : vector<32x128xf32> to vector<1x128xf32>
    %497 = vector.broadcast %496 : vector<1x128xf32> to vector<8x128xf32>
    %498 = arith.mulf %497, %487 : vector<8x128xf32>
    %499 = arith.addf %486, %498 : vector<8x128xf32>
    %500 = vector.extract_strided_slice %220 {offsets = [152, 0], sizes = [8, 128], strides = [1, 1]} : vector<256x128xf32> to vector<8x128xf32>
    %501 = vector.extract_strided_slice %236 {offsets = [19, 0], sizes = [1, 128], strides = [1, 1]} : vector<32x128xf32> to vector<1x128xf32>
    %502 = vector.broadcast %501 : vector<1x128xf32> to vector<8x128xf32>
    %503 = arith.mulf %502, %500 : vector<8x128xf32>
    %504 = arith.addf %491, %503 : vector<8x128xf32>
    %505 = vector.extract_strided_slice %244 {offsets = [19, 0], sizes = [1, 128], strides = [1, 1]} : vector<32x128xf32> to vector<1x128xf32>
    %506 = vector.broadcast %505 : vector<1x128xf32> to vector<8x128xf32>
    %507 = arith.mulf %506, %500 : vector<8x128xf32>
    %508 = arith.addf %495, %507 : vector<8x128xf32>
    %509 = vector.extract_strided_slice %252 {offsets = [19, 0], sizes = [1, 128], strides = [1, 1]} : vector<32x128xf32> to vector<1x128xf32>
    %510 = vector.broadcast %509 : vector<1x128xf32> to vector<8x128xf32>
    %511 = arith.mulf %510, %500 : vector<8x128xf32>
    %512 = arith.addf %499, %511 : vector<8x128xf32>
    %513 = vector.extract_strided_slice %220 {offsets = [160, 0], sizes = [8, 128], strides = [1, 1]} : vector<256x128xf32> to vector<8x128xf32>
    %514 = vector.extract_strided_slice %236 {offsets = [20, 0], sizes = [1, 128], strides = [1, 1]} : vector<32x128xf32> to vector<1x128xf32>
    %515 = vector.broadcast %514 : vector<1x128xf32> to vector<8x128xf32>
    %516 = arith.mulf %515, %513 : vector<8x128xf32>
    %517 = arith.addf %504, %516 : vector<8x128xf32>
    %518 = vector.extract_strided_slice %244 {offsets = [20, 0], sizes = [1, 128], strides = [1, 1]} : vector<32x128xf32> to vector<1x128xf32>
    %519 = vector.broadcast %518 : vector<1x128xf32> to vector<8x128xf32>
    %520 = arith.mulf %519, %513 : vector<8x128xf32>
    %521 = arith.addf %508, %520 : vector<8x128xf32>
    %522 = vector.extract_strided_slice %252 {offsets = [20, 0], sizes = [1, 128], strides = [1, 1]} : vector<32x128xf32> to vector<1x128xf32>
    %523 = vector.broadcast %522 : vector<1x128xf32> to vector<8x128xf32>
    %524 = arith.mulf %523, %513 : vector<8x128xf32>
    %525 = arith.addf %512, %524 : vector<8x128xf32>
    %526 = vector.extract_strided_slice %220 {offsets = [168, 0], sizes = [8, 128], strides = [1, 1]} : vector<256x128xf32> to vector<8x128xf32>
    %527 = vector.extract_strided_slice %236 {offsets = [21, 0], sizes = [1, 128], strides = [1, 1]} : vector<32x128xf32> to vector<1x128xf32>
    %528 = vector.broadcast %527 : vector<1x128xf32> to vector<8x128xf32>
    %529 = arith.mulf %528, %526 : vector<8x128xf32>
    %530 = arith.addf %517, %529 : vector<8x128xf32>
    %531 = vector.extract_strided_slice %244 {offsets = [21, 0], sizes = [1, 128], strides = [1, 1]} : vector<32x128xf32> to vector<1x128xf32>
    %532 = vector.broadcast %531 : vector<1x128xf32> to vector<8x128xf32>
    %533 = arith.mulf %532, %526 : vector<8x128xf32>
    %534 = arith.addf %521, %533 : vector<8x128xf32>
    %535 = vector.extract_strided_slice %252 {offsets = [21, 0], sizes = [1, 128], strides = [1, 1]} : vector<32x128xf32> to vector<1x128xf32>
    %536 = vector.broadcast %535 : vector<1x128xf32> to vector<8x128xf32>
    %537 = arith.mulf %536, %526 : vector<8x128xf32>
    %538 = arith.addf %525, %537 : vector<8x128xf32>
    %539 = vector.extract_strided_slice %220 {offsets = [176, 0], sizes = [8, 128], strides = [1, 1]} : vector<256x128xf32> to vector<8x128xf32>
    %540 = vector.extract_strided_slice %236 {offsets = [22, 0], sizes = [1, 128], strides = [1, 1]} : vector<32x128xf32> to vector<1x128xf32>
    %541 = vector.broadcast %540 : vector<1x128xf32> to vector<8x128xf32>
    %542 = arith.mulf %541, %539 : vector<8x128xf32>
    %543 = arith.addf %530, %542 : vector<8x128xf32>
    %544 = vector.extract_strided_slice %244 {offsets = [22, 0], sizes = [1, 128], strides = [1, 1]} : vector<32x128xf32> to vector<1x128xf32>
    %545 = vector.broadcast %544 : vector<1x128xf32> to vector<8x128xf32>
    %546 = arith.mulf %545, %539 : vector<8x128xf32>
    %547 = arith.addf %534, %546 : vector<8x128xf32>
    %548 = vector.extract_strided_slice %252 {offsets = [22, 0], sizes = [1, 128], strides = [1, 1]} : vector<32x128xf32> to vector<1x128xf32>
    %549 = vector.broadcast %548 : vector<1x128xf32> to vector<8x128xf32>
    %550 = arith.mulf %549, %539 : vector<8x128xf32>
    %551 = arith.addf %538, %550 : vector<8x128xf32>
    %552 = vector.extract_strided_slice %220 {offsets = [184, 0], sizes = [8, 128], strides = [1, 1]} : vector<256x128xf32> to vector<8x128xf32>
    %553 = vector.extract_strided_slice %236 {offsets = [23, 0], sizes = [1, 128], strides = [1, 1]} : vector<32x128xf32> to vector<1x128xf32>
    %554 = vector.broadcast %553 : vector<1x128xf32> to vector<8x128xf32>
    %555 = arith.mulf %554, %552 : vector<8x128xf32>
    %556 = arith.addf %543, %555 : vector<8x128xf32>
    %557 = vector.extract_strided_slice %244 {offsets = [23, 0], sizes = [1, 128], strides = [1, 1]} : vector<32x128xf32> to vector<1x128xf32>
    %558 = vector.broadcast %557 : vector<1x128xf32> to vector<8x128xf32>
    %559 = arith.mulf %558, %552 : vector<8x128xf32>
    %560 = arith.addf %547, %559 : vector<8x128xf32>
    %561 = vector.extract_strided_slice %252 {offsets = [23, 0], sizes = [1, 128], strides = [1, 1]} : vector<32x128xf32> to vector<1x128xf32>
    %562 = vector.broadcast %561 : vector<1x128xf32> to vector<8x128xf32>
    %563 = arith.mulf %562, %552 : vector<8x128xf32>
    %564 = arith.addf %551, %563 : vector<8x128xf32>
    %565 = vector.extract_strided_slice %220 {offsets = [192, 0], sizes = [8, 128], strides = [1, 1]} : vector<256x128xf32> to vector<8x128xf32>
    %566 = vector.extract_strided_slice %236 {offsets = [24, 0], sizes = [1, 128], strides = [1, 1]} : vector<32x128xf32> to vector<1x128xf32>
    %567 = vector.broadcast %566 : vector<1x128xf32> to vector<8x128xf32>
    %568 = arith.mulf %567, %565 : vector<8x128xf32>
    %569 = arith.addf %556, %568 : vector<8x128xf32>
    %570 = vector.extract_strided_slice %244 {offsets = [24, 0], sizes = [1, 128], strides = [1, 1]} : vector<32x128xf32> to vector<1x128xf32>
    %571 = vector.broadcast %570 : vector<1x128xf32> to vector<8x128xf32>
    %572 = arith.mulf %571, %565 : vector<8x128xf32>
    %573 = arith.addf %560, %572 : vector<8x128xf32>
    %574 = vector.extract_strided_slice %252 {offsets = [24, 0], sizes = [1, 128], strides = [1, 1]} : vector<32x128xf32> to vector<1x128xf32>
    %575 = vector.broadcast %574 : vector<1x128xf32> to vector<8x128xf32>
    %576 = arith.mulf %575, %565 : vector<8x128xf32>
    %577 = arith.addf %564, %576 : vector<8x128xf32>
    %578 = vector.extract_strided_slice %220 {offsets = [200, 0], sizes = [8, 128], strides = [1, 1]} : vector<256x128xf32> to vector<8x128xf32>
    %579 = vector.extract_strided_slice %236 {offsets = [25, 0], sizes = [1, 128], strides = [1, 1]} : vector<32x128xf32> to vector<1x128xf32>
    %580 = vector.broadcast %579 : vector<1x128xf32> to vector<8x128xf32>
    %581 = arith.mulf %580, %578 : vector<8x128xf32>
    %582 = arith.addf %569, %581 : vector<8x128xf32>
    %583 = vector.extract_strided_slice %244 {offsets = [25, 0], sizes = [1, 128], strides = [1, 1]} : vector<32x128xf32> to vector<1x128xf32>
    %584 = vector.broadcast %583 : vector<1x128xf32> to vector<8x128xf32>
    %585 = arith.mulf %584, %578 : vector<8x128xf32>
    %586 = arith.addf %573, %585 : vector<8x128xf32>
    %587 = vector.extract_strided_slice %252 {offsets = [25, 0], sizes = [1, 128], strides = [1, 1]} : vector<32x128xf32> to vector<1x128xf32>
    %588 = vector.broadcast %587 : vector<1x128xf32> to vector<8x128xf32>
    %589 = arith.mulf %588, %578 : vector<8x128xf32>
    %590 = arith.addf %577, %589 : vector<8x128xf32>
    %591 = vector.extract_strided_slice %220 {offsets = [208, 0], sizes = [8, 128], strides = [1, 1]} : vector<256x128xf32> to vector<8x128xf32>
    %592 = vector.extract_strided_slice %236 {offsets = [26, 0], sizes = [1, 128], strides = [1, 1]} : vector<32x128xf32> to vector<1x128xf32>
    %593 = vector.broadcast %592 : vector<1x128xf32> to vector<8x128xf32>
    %594 = arith.mulf %593, %591 : vector<8x128xf32>
    %595 = arith.addf %582, %594 : vector<8x128xf32>
    %596 = vector.extract_strided_slice %244 {offsets = [26, 0], sizes = [1, 128], strides = [1, 1]} : vector<32x128xf32> to vector<1x128xf32>
    %597 = vector.broadcast %596 : vector<1x128xf32> to vector<8x128xf32>
    %598 = arith.mulf %597, %591 : vector<8x128xf32>
    %599 = arith.addf %586, %598 : vector<8x128xf32>
    %600 = vector.extract_strided_slice %252 {offsets = [26, 0], sizes = [1, 128], strides = [1, 1]} : vector<32x128xf32> to vector<1x128xf32>
    %601 = vector.broadcast %600 : vector<1x128xf32> to vector<8x128xf32>
    %602 = arith.mulf %601, %591 : vector<8x128xf32>
    %603 = arith.addf %590, %602 : vector<8x128xf32>
    %604 = vector.extract_strided_slice %220 {offsets = [216, 0], sizes = [8, 128], strides = [1, 1]} : vector<256x128xf32> to vector<8x128xf32>
    %605 = vector.extract_strided_slice %236 {offsets = [27, 0], sizes = [1, 128], strides = [1, 1]} : vector<32x128xf32> to vector<1x128xf32>
    %606 = vector.broadcast %605 : vector<1x128xf32> to vector<8x128xf32>
    %607 = arith.mulf %606, %604 : vector<8x128xf32>
    %608 = arith.addf %595, %607 : vector<8x128xf32>
    %609 = vector.extract_strided_slice %244 {offsets = [27, 0], sizes = [1, 128], strides = [1, 1]} : vector<32x128xf32> to vector<1x128xf32>
    %610 = vector.broadcast %609 : vector<1x128xf32> to vector<8x128xf32>
    %611 = arith.mulf %610, %604 : vector<8x128xf32>
    %612 = arith.addf %599, %611 : vector<8x128xf32>
    %613 = vector.extract_strided_slice %252 {offsets = [27, 0], sizes = [1, 128], strides = [1, 1]} : vector<32x128xf32> to vector<1x128xf32>
    %614 = vector.broadcast %613 : vector<1x128xf32> to vector<8x128xf32>
    %615 = arith.mulf %614, %604 : vector<8x128xf32>
    %616 = arith.addf %603, %615 : vector<8x128xf32>
    %617 = vector.extract_strided_slice %220 {offsets = [224, 0], sizes = [8, 128], strides = [1, 1]} : vector<256x128xf32> to vector<8x128xf32>
    %618 = vector.extract_strided_slice %236 {offsets = [28, 0], sizes = [1, 128], strides = [1, 1]} : vector<32x128xf32> to vector<1x128xf32>
    %619 = vector.broadcast %618 : vector<1x128xf32> to vector<8x128xf32>
    %620 = arith.mulf %619, %617 : vector<8x128xf32>
    %621 = arith.addf %608, %620 : vector<8x128xf32>
    %622 = vector.extract_strided_slice %244 {offsets = [28, 0], sizes = [1, 128], strides = [1, 1]} : vector<32x128xf32> to vector<1x128xf32>
    %623 = vector.broadcast %622 : vector<1x128xf32> to vector<8x128xf32>
    %624 = arith.mulf %623, %617 : vector<8x128xf32>
    %625 = arith.addf %612, %624 : vector<8x128xf32>
    %626 = vector.extract_strided_slice %252 {offsets = [28, 0], sizes = [1, 128], strides = [1, 1]} : vector<32x128xf32> to vector<1x128xf32>
    %627 = vector.broadcast %626 : vector<1x128xf32> to vector<8x128xf32>
    %628 = arith.mulf %627, %617 : vector<8x128xf32>
    %629 = arith.addf %616, %628 : vector<8x128xf32>
    %630 = vector.extract_strided_slice %220 {offsets = [232, 0], sizes = [8, 128], strides = [1, 1]} : vector<256x128xf32> to vector<8x128xf32>
    %631 = vector.extract_strided_slice %236 {offsets = [29, 0], sizes = [1, 128], strides = [1, 1]} : vector<32x128xf32> to vector<1x128xf32>
    %632 = vector.broadcast %631 : vector<1x128xf32> to vector<8x128xf32>
    %633 = arith.mulf %632, %630 : vector<8x128xf32>
    %634 = arith.addf %621, %633 : vector<8x128xf32>
    %635 = vector.extract_strided_slice %244 {offsets = [29, 0], sizes = [1, 128], strides = [1, 1]} : vector<32x128xf32> to vector<1x128xf32>
    %636 = vector.broadcast %635 : vector<1x128xf32> to vector<8x128xf32>
    %637 = arith.mulf %636, %630 : vector<8x128xf32>
    %638 = arith.addf %625, %637 : vector<8x128xf32>
    %639 = vector.extract_strided_slice %252 {offsets = [29, 0], sizes = [1, 128], strides = [1, 1]} : vector<32x128xf32> to vector<1x128xf32>
    %640 = vector.broadcast %639 : vector<1x128xf32> to vector<8x128xf32>
    %641 = arith.mulf %640, %630 : vector<8x128xf32>
    %642 = arith.addf %629, %641 : vector<8x128xf32>
    %643 = vector.extract_strided_slice %220 {offsets = [240, 0], sizes = [8, 128], strides = [1, 1]} : vector<256x128xf32> to vector<8x128xf32>
    %644 = vector.extract_strided_slice %236 {offsets = [30, 0], sizes = [1, 128], strides = [1, 1]} : vector<32x128xf32> to vector<1x128xf32>
    %645 = vector.broadcast %644 : vector<1x128xf32> to vector<8x128xf32>
    %646 = arith.mulf %645, %643 : vector<8x128xf32>
    %647 = arith.addf %634, %646 : vector<8x128xf32>
    %648 = vector.extract_strided_slice %244 {offsets = [30, 0], sizes = [1, 128], strides = [1, 1]} : vector<32x128xf32> to vector<1x128xf32>
    %649 = vector.broadcast %648 : vector<1x128xf32> to vector<8x128xf32>
    %650 = arith.mulf %649, %643 : vector<8x128xf32>
    %651 = arith.addf %638, %650 : vector<8x128xf32>
    %652 = vector.extract_strided_slice %252 {offsets = [30, 0], sizes = [1, 128], strides = [1, 1]} : vector<32x128xf32> to vector<1x128xf32>
    %653 = vector.broadcast %652 : vector<1x128xf32> to vector<8x128xf32>
    %654 = arith.mulf %653, %643 : vector<8x128xf32>
    %655 = arith.addf %642, %654 : vector<8x128xf32>
    %656 = vector.extract_strided_slice %220 {offsets = [248, 0], sizes = [8, 128], strides = [1, 1]} : vector<256x128xf32> to vector<8x128xf32>
    %657 = vector.extract_strided_slice %236 {offsets = [31, 0], sizes = [1, 128], strides = [1, 1]} : vector<32x128xf32> to vector<1x128xf32>
    %658 = vector.broadcast %657 : vector<1x128xf32> to vector<8x128xf32>
    %659 = arith.mulf %658, %656 : vector<8x128xf32>
    %660 = arith.addf %647, %659 : vector<8x128xf32>
    %661 = vector.extract_strided_slice %244 {offsets = [31, 0], sizes = [1, 128], strides = [1, 1]} : vector<32x128xf32> to vector<1x128xf32>
    %662 = vector.broadcast %661 : vector<1x128xf32> to vector<8x128xf32>
    %663 = arith.mulf %662, %656 : vector<8x128xf32>
    %664 = arith.addf %651, %663 : vector<8x128xf32>
    %665 = vector.extract_strided_slice %252 {offsets = [31, 0], sizes = [1, 128], strides = [1, 1]} : vector<32x128xf32> to vector<1x128xf32>
    %666 = vector.broadcast %665 : vector<1x128xf32> to vector<8x128xf32>
    %667 = arith.mulf %666, %656 : vector<8x128xf32>
    %668 = arith.addf %655, %667 : vector<8x128xf32>
    %c0_25 = arith.constant 0 : index
    %c0_26 = arith.constant 0 : index
    %669 = vector.load %arg9[%c0_25, %c0_26] : memref<24x128xf32, #tpu.memory_space<vmem>>, vector<8x128xf32>
    tpu.vector_store %arg9[%c0_25, %c0_26], %660 {strides = array<i32>} : memref<24x128xf32, #tpu.memory_space<vmem>>, vector<8x128xf32>,
    %c8 = arith.constant 8 : index
    %c0_27 = arith.constant 0 : index
    %670 = vector.load %arg9[%c8, %c0_27] : memref<24x128xf32, #tpu.memory_space<vmem>>, vector<8x128xf32>
    tpu.vector_store %arg9[%c8, %c0_27], %664 {strides = array<i32>} : memref<24x128xf32, #tpu.memory_space<vmem>>, vector<8x128xf32>,
    %c16 = arith.constant 16 : index
    %c0_28 = arith.constant 0 : index
    %671 = vector.load %arg9[%c16, %c0_28] : memref<24x128xf32, #tpu.memory_space<vmem>>, vector<8x128xf32>
    tpu.vector_store %arg9[%c16, %c0_28], %668 {strides = array<i32>} : memref<24x128xf32, #tpu.memory_space<vmem>>, vector<8x128xf32>,
    return
  }
  func.func @transform_0(%arg0: i32) -> (i32, i32) {
    %c0_i32 = arith.constant 0 : i32
    %c0_i32_0 = arith.constant 0 : i32
    return %c0_i32, %arg0 : i32, i32
  }
  func.func @transform_1(%arg0: i32) -> (i32, i32) {
    %c0_i32 = arith.constant 0 : i32
    %c0_i32_0 = arith.constant 0 : i32
    return %c0_i32, %arg0 : i32, i32
  }
  func.func @transform_2(%arg0: i32) -> (i32, i32) {
    %c0_i32 = arith.constant 0 : i32
    %c0_i32_0 = arith.constant 0 : i32
    %c0_i32_1 = arith.constant 0 : i32
    return %c0_i32, %c0_i32_0 : i32, i32
  }
  func.func @transform_3(%arg0: i32) -> (i32, i32) {
    %c0_i32 = arith.constant 0 : i32
    %c0_i32_0 = arith.constant 0 : i32
    %c0_i32_1 = arith.constant 0 : i32
    return %c0_i32, %c0_i32_0 : i32, i32
  }
  func.func @transform_4(%arg0: i32) -> (i32, i32) {
    %c0_i32 = arith.constant 0 : i32
    %c0_i32_0 = arith.constant 0 : i32
    %c0_i32_1 = arith.constant 0 : i32
    return %c0_i32, %c0_i32_0 : i32, i32
  }
  func.func @transform_5(%arg0: i32) -> (i32, i32) {
    %c0_i32 = arith.constant 0 : i32
    %c0_i32_0 = arith.constant 0 : i32
    %c0_i32_1 = arith.constant 0 : i32
    return %c0_i32, %c0_i32_0 : i32, i32
  }
  func.func @transform_6(%arg0: i32) -> (i32, i32) {
    %c0_i32 = arith.constant 0 : i32
    %c0_i32_0 = arith.constant 0 : i32
    %c0_i32_1 = arith.constant 0 : i32
    return %c0_i32, %c0_i32_0 : i32, i32
  }
  func.func @transform_7(%arg0: i32) -> (i32, i32) {
    %c0_i32 = arith.constant 0 : i32
    %c0_i32_0 = arith.constant 0 : i32
    %c0_i32_1 = arith.constant 0 : i32
    return %c0_i32, %c0_i32_0 : i32, i32
  }
  func.func @transform_8(%arg0: i32) -> (i32, i32) {
    %c0_i32 = arith.constant 0 : i32
    %c0_i32_0 = arith.constant 0 : i32
    return %c0_i32, %arg0 : i32, i32
  }
  func.func @transform_9(%arg0: i32) -> (i32, i32) {
    %c0_i32 = arith.constant 0 : i32
    %c0_i32_0 = arith.constant 0 : i32
    return %c0_i32, %arg0 : i32, i32
  }
}

</mosaic_0001>

<bundles_post_ra>
// kernel: api_hypernet_forward.1
= control target key start
LH: loop header
LB: loop body
LE: loop exit
PB: predicated region body
PF: predicated region fallthrough
CT: control target
= control target key end

     0   :  { %vm201_vm0 = vcmask 1043456   ;;  %vm152_vm1 = vcmask 326656   ;;  %vm1194_vm2 = vcmask 785408   ;;  %vm2724_vm3 = vcmask 261120   ;;  %s6509_s0 = inlined_call_operand.vmem [shape: f32[40,128], index: 0, kind: input, shape index: {}]   ;;  %s6510_s2 = inlined_call_operand.vmem [shape: bf16[256,40], index: 2, kind: input, shape index: {}]   ;;  %s6511_s3 = inlined_call_operand.vmem [shape: bf16[1248,224], index: 3, kind: input, shape index: {}]   ;;  %s6512_s4 = inlined_call_operand.vmem [shape: f32[32,1], index: 4, kind: input, shape index: {}]   ;;  %s6513_s5 = inlined_call_operand.vmem [shape: f32[32,1], index: 5, kind: input, shape index: {}]   ;;  %s6514_s6 = inlined_call_operand.vmem [shape: bf16[273,32], index: 6, kind: input, shape index: {}]   ;;  %s6515_s7 = inlined_call_operand.vmem [shape: f32[9,1], index: 7, kind: input, shape index: {}]   ;;  %s6516_s1 = inlined_call_operand.vmem [shape: f32[3,128], index: 1, kind: input, shape index: {}]   ;;  %s6517_s9 = inlined_call_operand.vmem [shape: f32[9,128], index: 9, kind: output, shape index: {1}]   ;;  %s6518_s8 = inlined_call_operand.vmem [shape: f32[24,128], index: 8, kind: output, shape index: {0}]  }
   0x1   :  { %v36_v0 = vld [vmem:[%s6509_s0 + $0x20] sm:$0xff]  ;;  %v34_v2 = vld [vmem:[%s6509_s0 + $0x10] sm:$0xff]  ;;  %v35_v3 = vld [vmem:[%s6509_s0 + $0x18] sm:$0xff]  ;;  %vm2579_vm4 = vcmask 1042432  }
   0x2   :  { %v39_v1 = vpack.c.bf16 %v36_v0, %v36_v0  ;;  %v38_v5 = vpack.c.bf16 %v35_v3, %v34_v2  ;;  %v4426_v6 = vld [vmem:[%s6509_s0] sm:$0xff]  ;;  %v33_v7 = vld [vmem:[%s6509_s0 + $0x8] sm:$0xff]  ;;  %v4149_v11 = vld [vmem:[%s6510_s2 + $0x10] sm:$0xff] }
   0x3   :  { %v37_v8 = vpack.c.bf16 %v33_v7, %v4426_v6  ;;  %v4147_v9 = vld [vmem:[%s6510_s2] sm:$0xff]  ;;  %v4148_v10 = vld [vmem:[%s6510_s2 + $0x8] sm:$0xff]  ;;  %v4150_v12 = vld [vmem:[%s6510_s2 + $0x18] sm:$0xff] }
   0x4   :  { %v203_v4 = vsel %vm201_vm0, %v39_v1, 0  ;;  %v4151_v13 = vld [vmem:[%s6510_s2 + $0x20] sm:$0xff]  ;;  %v4152_v14 = vld [vmem:[%s6510_s2 + $0x28] sm:$0xff]  ;;  %v4153_v15 = vld [vmem:[%s6510_s2 + $0x30] sm:$0xff] }
   0x5   :  { %210 = vmatpush.bf16.msra.mxu0 %v203_v4  ;;  %v4154_v16 = vld [vmem:[%s6510_s2 + $0x38] sm:$0xff]  ;;  %v4155_v17 = vld [vmem:[%s6510_s2 + $0x40] sm:$0xff]  ;;  %v4156_v23 = vld [vmem:[%s6510_s2 + $0x48] sm:$0xff] }
   0x6   :  { %v4157_v29 = vld [vmem:[%s6510_s2 + $0x50] sm:$0xff]  ;;  %v4158_v32 = vld [vmem:[%s6510_s2 + $0x58] sm:$0xff]  ;;  %v4159_v35 = vld [vmem:[%s6510_s2 + $0x60] sm:$0xff] }
   0x7   :  { %v4160_v38 = vld [vmem:[%s6510_s2 + $0x68] sm:$0xff] }
   0x9   :  { %211 = vmatpush.bf16.msra.mxu0 %v38_v5 }
   0xd   :  { %212 = vmatpush.bf16.msra.mxu0 %v37_v8  ;;  %v4161_v8 = vld [vmem:[%s6510_s2 + $0x70] sm:$0xff] }
  0x10   :  { %3343 = vmatmul.msk.bf16.vlgmr.msra.gmra.mxu0 %vm152_vm1, %v4147_v9 }
  0x20   :  { %3344 = vmatmul.msk.bf16.gmra.mxu0 %vm152_vm1, %v4148_v10 }
  0x30   :  { %3345 = vmatmul.msk.bf16.gmra.mxu0 %vm152_vm1, %v4149_v11  ;;  %v4162_v11 = vld [vmem:[%s6510_s2 + $0x78] sm:$0xff] }
  0x40   :  { %3346 = vmatmul.msk.bf16.gmra.mxu0 %vm152_vm1, %v4150_v12 }
  0x50   :  { %3347 = vmatmul.msk.bf16.gmra.mxu0 %vm152_vm1, %v4151_v13  ;;  %v3361_v13 = vld [vmem:[%s6511_s3] sm:$0xf] }
  0x60   :  { %3348 = vmatmul.msk.bf16.gmra.mxu0 %vm152_vm1, %v4152_v14  ;;  %v4164_v14 = vld [vmem:[%s6511_s3 + $0x4] sm:$0xf0] }
  0x70   :  { %3349 = vmatmul.msk.bf16.gmra.mxu0 %vm152_vm1, %v4153_v15  ;;  %v3362_v15 = vor.u32 %v4164_v14, %v3361_v13  ;;  %v3409_v14 = vld [vmem:[%s6511_s3 + $0x60] sm:$0xf] }
  0x80   :  { %3350 = vmatmul.msk.bf16.gmra.mxu0 %vm152_vm1, %v4154_v16 }
  0x8d   :  { %v214_v18 = vpop.f32.mrf.mxu0 }
  0x8e   :  { %v294_v20 = vmax.f32 %v214_v18, 0.0 }
  0x90   :  { %3351 = vmatmul.msk.bf16.gmra.mxu0 %vm152_vm1, %v4155_v17 }
  0x95   :  { %v216_v19 = vpop.f32.mrf.mxu0 }
  0x96   :  { %v295_v21 = vmax.f32 %v216_v19, 0.0 }
  0x98   :  { %v4468_v22 = vpack.c.bf16 %v295_v21, %v294_v20 }
  0x9d   :  { %v219_v24 = vpop.f32.mrf.mxu0 }
  0x9e   :  { %v296_v26 = vmax.f32 %v219_v24, 0.0 }
  0xa0   :  { %3352 = vmatmul.msk.bf16.gmra.mxu0 %vm152_vm1, %v4156_v23 }
  0xa5   :  { %v221_v25 = vpop.f32.mrf.mxu0 }
  0xa6   :  { %v297_v27 = vmax.f32 %v221_v25, 0.0 }
  0xa8   :  { %v479_v28 = vpack.c.bf16 %v297_v27, %v296_v26  ;;  %v3369_v27 = vld [vmem:[%s6511_s3 + $0x10] sm:$0xf] }
  0xad   :  { %v224_v30 = vpop.f32.mrf.mxu0 }
  0xae   :  { %v298_v63 = vmax.f32 %v224_v30, 0.0 }
  0xb0   :  { %3353 = vmatmul.msk.bf16.gmra.mxu0 %vm152_vm1, %v4157_v29 }
  0xb5   :  { %v226_v31 = vpop.f32.mrf.mxu0 }
  0xb6   :  { %v299_v61 = vmax.f32 %v226_v31, 0.0 }
  0xb8   :  { %v480_v0 = vpack.c.bf16 %v299_v61, %v298_v63  ;;  %v3625_v61 = vld [vmem:[%s6511_s3 + $0x210] sm:$0xf] }
  0xbd   :  { %v229_v33 = vpop.f32.mrf.mxu0 }
  0xbe   :  { %v300_v60 = vmax.f32 %v229_v33, 0.0 }
  0xc0   :  { %3354 = vmatmul.msk.bf16.gmra.mxu0 %vm152_vm1, %v4158_v32 }
  0xc5   :  { %v231_v34 = vpop.f32.mrf.mxu0 }
  0xc6   :  { %v301_v57 = vmax.f32 %v231_v34, 0.0 }
  0xc8   :  { %v481_v62 = vpack.c.bf16 %v301_v57, %v300_v60  ;;  %v3379_v57 = vld [vmem:[%s6511_s3 + $0x28] sm:$0xf0]  ;;  %v4172_v60 = vld [vmem:[%s6511_s3 + $0x44] sm:$0xf0] }
  0xcd   :  { %v234_v36 = vpop.f32.mrf.mxu0 }
  0xce   :  { %v302_v56 = vmax.f32 %v234_v36, 0.0 }
  0xd0   :  { %3355 = vmatmul.msk.bf16.gmra.mxu0 %vm152_vm1, %v4159_v35 }
  0xd5   :  { %v236_v37 = vpop.f32.mrf.mxu0 }
  0xd6   :  { %v303_v54 = vmax.f32 %v236_v37, 0.0  ;;  %v4163_v37 = vld [vmem:[%s6511_s3 + $0x4] sm:$0xf] }
  0xd8   :  { %v482_v58 = vpack.c.bf16 %v303_v54, %v302_v56  ;;  %v4167_v56 = vld [vmem:[%s6511_s3 + $0x24] sm:$0xf] }
  0xdd   :  { %v239_v39 = vpop.f32.mrf.mxu0 }
  0xde   :  { %v304_v53 = vmax.f32 %v239_v39, 0.0 }
  0xe0   :  { %3356 = vmatmul.msk.bf16.gmra.mxu0 %vm152_vm1, %v4160_v38  ;;  %v3363_v38 = vld [vmem:[%s6511_s3 + $0x8] sm:$0xf0] }
  0xe5   :  { %v241_v40 = vpop.f32.mrf.mxu0 }
  0xe6   :  { %v305_v50 = vmax.f32 %v241_v40, 0.0  ;;  %v3366_v40 = vor.u32 %v4163_v37, %v3363_v38  ;;  %v3425_v37 = vld [vmem:[%s6511_s3 + $0x80] sm:$0xf]  ;;  %v4180_v38 = vld [vmem:[%s6511_s3 + $0x84] sm:$0xf0] }
  0xe8   :  { %v483_v55 = vpack.c.bf16 %v305_v50, %v304_v53  ;;  %v3385_v50 = vld [vmem:[%s6511_s3 + $0x30] sm:$0xf]  ;;  %v4228_v53 = vld [vmem:[%s6511_s3 + $0x204] sm:$0xf0] }
  0xed   :  { %v244_v41 = vpop.f32.mrf.mxu0 }
  0xee   :  { %v306_v49 = vmax.f32 %v244_v41, 0.0  ;;  %v3377_v41 = vld [vmem:[%s6511_s3 + $0x20] sm:$0xf] }
  0xf0   :  { %3357 = vmatmul.msk.bf16.gmra.mxu0 %vm152_vm1, %v4161_v8  ;;  %v4232_v8 = vld [vmem:[%s6511_s3 + $0x224] sm:$0xf0] }
  0xf5   :  { %v246_v42 = vpop.f32.mrf.mxu0 }
  0xf6   :  { %v307_v47 = vmax.f32 %v246_v42, 0.0  ;;  %v4168_v42 = vld [vmem:[%s6511_s3 + $0x24] sm:$0xf0] }
  0xf8   :  { %v484_v51 = vpack.c.bf16 %v307_v47, %v306_v49  ;;  %v4165_v47 = vld [vmem:[%s6511_s3 + $0x14] sm:$0xf] }
  0xfd   :  { %v249_v43 = vpop.f32.mrf.mxu0 }
  0xfe   :  { %v308_v45 = vmax.f32 %v249_v43, 0.0  ;;  %v3609_v43 = vld [vmem:[%s6511_s3 + $0x1f0] sm:$0xf] }
 0x100   :  { %3358 = vmatmul.msk.bf16.gmra.mxu0 %vm152_vm1, %v4162_v11  ;;  %v4171_v11 = vld [vmem:[%s6511_s3 + $0x44] sm:$0xf] }
 0x105   :  { %v251_v44 = vpop.f32.mrf.mxu0 }
 0x106   :  { %v309_v46 = vmax.f32 %v251_v44, 0.0  ;;  %v4226_v44 = vld [vmem:[%s6511_s3 + $0x1f4] sm:$0xf0] }
 0x108   :  { %v485_v48 = vpack.c.bf16 %v309_v46, %v308_v45  ;;  %v3378_v45 = vor.u32 %v4168_v42, %v3377_v41  ;;  %v3610_v46 = vor.u32 %v4226_v44, %v3609_v43  ;;  %v3419_v41 = vld [vmem:[%s6511_s3 + $0x78] sm:$0xf0]  ;;  %v3657_v42 = vld [vmem:[%s6511_s3 + $0x250] sm:$0xf]  ;;  %v4238_v43 = vld [vmem:[%s6511_s3 + $0x254] sm:$0xf0] }
 0x109   :  { %v3658_v44 = vor.u32 %v4238_v43, %v3657_v42  ;;  %v3457_v42 = vld [vmem:[%s6511_s3 + $0xc0] sm:$0xf]  ;;  %v4188_v43 = vld [vmem:[%s6511_s3 + $0xc4] sm:$0xf0] }
 0x10a   :  { %1429 = vmatpush.bf16.msrb.mxu0 %v485_v48  ;;  %4336 = vmatpush.bf16.msra.mxu1 %v485_v48  ;;  %v3371_v48 = vld [vmem:[%s6511_s3 + $0x18] sm:$0xf0] }
 0x10b   :  { %v3374_v49 = vor.u32 %v4165_v47, %v3371_v48  ;;  %v3433_v48 = vld [vmem:[%s6511_s3 + $0x90] sm:$0xf] }
 0x10d   :  { %v4490_v52 = vpop.f32.mrf.mxu0 }
 0x10e   :  { %1430 = vmatpush.bf16.msrb.mxu0 %v484_v51  ;;  %4337 = vmatpush.bf16.msra.mxu1 %v484_v51  ;;  %v310_v36 = vmax.f32 %v4490_v52, 0.0  ;;  %v4170_v51 = vld [vmem:[%s6511_s3 + $0x34] sm:$0xf0]  ;;  %v3617_v52 = vld [vmem:[%s6511_s3 + $0x200] sm:$0xf] }
 0x10f   :  { %v3386_v54 = vor.u32 %v4170_v51, %v3385_v50  ;;  %v4179_v51 = vld [vmem:[%s6511_s3 + $0x84] sm:$0xf] }
 0x112   :  { %1431 = vmatpush.bf16.msrb.mxu0 %v483_v55  ;;  %4338 = vmatpush.bf16.msra.mxu1 %v483_v55  ;;  %v3618_v55 = vor.u32 %v4228_v53, %v3617_v52  ;;  %v3427_v52 = vld [vmem:[%s6511_s3 + $0x88] sm:$0xf0]  ;;  %v3665_v53 = vld [vmem:[%s6511_s3 + $0x260] sm:$0xf] }
 0x115   :  { %v4492_v59 = vpop.f32.mrf.mxu0 }
 0x116   :  { %1432 = vmatpush.bf16.msrb.mxu0 %v482_v58  ;;  %4339 = vmatpush.bf16.msra.mxu1 %v482_v58  ;;  %v311_v34 = vmax.f32 %v4492_v59, 0.0  ;;  %v3382_v58 = vor.u32 %v4167_v56, %v3379_v57  ;;  %v3393_v59 = vld [vmem:[%s6511_s3 + $0x40] sm:$0xf]  ;;  %v3430_v57 = vor.u32 %v4179_v51, %v3427_v52  ;;  %v4246_v51 = vld [vmem:[%s6511_s3 + $0x294] sm:$0xf0] }
 0x117   :  { %v3394_v63 = vor.u32 %v4172_v60, %v3393_v59 }
 0x118   :  { %v486_v39 = vpack.c.bf16 %v311_v34, %v310_v36 }
 0x11a   :  { %1433 = vmatpush.bf16.msrb.mxu0 %v481_v62  ;;  %4340 = vmatpush.bf16.msra.mxu1 %v481_v62  ;;  %v4230_v62 = vld [vmem:[%s6511_s3 + $0x214] sm:$0xf0] }
 0x11d   :  { %v259_v1 = vpop.f32.mrf.mxu0 }
 0x11e   :  { %1434 = vmatpush.bf16.msrb.mxu0 %v480_v0  ;;  %4341 = vmatpush.bf16.msra.mxu1 %v480_v0  ;;  %v312_v33 = vmax.f32 %v259_v1, 0.0  ;;  %v3626_v0 = vor.u32 %v4230_v62, %v3625_v61  ;;  %v4169_v1 = vld [vmem:[%s6511_s3 + $0x34] sm:$0xf]  ;;  %v3441_v61 = vld [vmem:[%s6511_s3 + $0xa0] sm:$0xf] }
 0x11f   :  { %v4184_v62 = vld [vmem:[%s6511_s3 + $0xa4] sm:$0xf0] }
 0x122   :  { %1435 = vmatpush.bf16.msrb.mxu0 %v479_v28  ;;  %4342 = vmatpush.bf16.msra.mxu1 %v479_v28  ;;  %v4166_v28 = vld [vmem:[%s6511_s3 + $0x14] sm:$0xf0] }
 0x123   :  { %v3370_v30 = vor.u32 %v4166_v28, %v3369_v27  ;;  %v3649_v27 = vld [vmem:[%s6511_s3 + $0x240] sm:$0xf]  ;;  %v4236_v28 = vld [vmem:[%s6511_s3 + $0x244] sm:$0xf0] }
 0x125   :  { %v261_v2 = vpop.f32.mrf.mxu0 }
 0x126   :  { %1436 = vmatpush.bf16.msrb.mxu0 %v4468_v22  ;;  %4343 = vmatpush.bf16.msra.mxu1 %v4468_v22  ;;  %v313_v31 = vmax.f32 %v261_v2, 0.0  ;;  %v3387_v2 = vld [vmem:[%s6511_s3 + $0x38] sm:$0xf0] }
 0x128   :  { %v487_v35 = vpack.c.bf16 %v313_v31, %v312_v33  ;;  %v3411_v33 = vld [vmem:[%s6511_s3 + $0x68] sm:$0xf0] }
 0x129   :  { %1437 = vmatmul.bf16.vlgmr.msrb.gmra.mxu0 %v3362_v15  ;;  %1592 = vmatmul.bf16.vlgmr.msra.gmra.mxu1 %v3610_v46  ;;  %v4176_v15 = vld [vmem:[%s6511_s3 + $0x64] sm:$0xf0] }
 0x12d   :  { %v264_v3 = vpop.f32.mrf.mxu0 }
 0x12e   :  { %v314_v29 = vmax.f32 %v264_v3, 0.0  ;;  %v3390_v3 = vor.u32 %v4169_v1, %v3387_v2 }
 0x135   :  { %v266_v4 = vpop.f32.mrf.mxu0 }
 0x136   :  { %v315_v25 = vmax.f32 %v266_v4, 0.0  ;;  %v3401_v4 = vld [vmem:[%s6511_s3 + $0x50] sm:$0xf] }
 0x138   :  { %v488_v32 = vpack.c.bf16 %v315_v25, %v314_v29  ;;  %v3417_v25 = vld [vmem:[%s6511_s3 + $0x70] sm:$0xf] }
 0x139   :  { %1442 = vmatmul.bf16.gmra.mxu0 %v3370_v30  ;;  %1597 = vmatmul.bf16.gmra.mxu1 %v3618_v55  ;;  %v3650_v30 = vor.u32 %v4236_v28, %v3649_v27  ;;  %v3443_v27 = vld [vmem:[%s6511_s3 + $0xa8] sm:$0xf0]  ;;  %v3681_v28 = vld [vmem:[%s6511_s3 + $0x280] sm:$0xf] }
 0x13d   :  { %v269_v5 = vpop.f32.mrf.mxu0 }
 0x13e   :  { %v316_v24 = vmax.f32 %v269_v5, 0.0  ;;  %v4174_v5 = vld [vmem:[%s6511_s3 + $0x54] sm:$0xf0] }
 0x145   :  { %v271_v7 = vpop.f32.mrf.mxu0 }
 0x146   :  { %v317_v22 = vmax.f32 %v271_v7, 0.0  ;;  %v3633_v7 = vld [vmem:[%s6511_s3 + $0x220] sm:$0xf] }
 0x148   :  { %v489_v26 = vpack.c.bf16 %v317_v22, %v316_v24  ;;  %v3403_v22 = vld [vmem:[%s6511_s3 + $0x58] sm:$0xf0] }
 0x149   :  { %1447 = vmatmul.bf16.gmra.mxu0 %v3378_v45  ;;  %1602 = vmatmul.bf16.gmra.mxu1 %v3626_v0  ;;  %v3442_v0 = vor.u32 %v4184_v62, %v3441_v61  ;;  %v3465_v62 = vld [vmem:[%s6511_s3 + $0xd0] sm:$0xf] }
 0x14d   :  { %v274_v9 = vpop.f32.mrf.mxu0 }
 0x14e   :  { %v318_v21 = vmax.f32 %v274_v9, 0.0  ;;  %v3402_v9 = vor.u32 %v4174_v5, %v3401_v4  ;;  %v3435_v5 = vld [vmem:[%s6511_s3 + $0x98] sm:$0xf0] }
 0x155   :  { %v276_v10 = vpop.f32.mrf.mxu0 }
 0x156   :  { %v319_v19 = vmax.f32 %v276_v10, 0.0  ;;  %v3634_v10 = vor.u32 %v4232_v8, %v3633_v7  ;;  %v3673_v7 = vld [vmem:[%s6511_s3 + $0x270] sm:$0xf]  ;;  %v4242_v8 = vld [vmem:[%s6511_s3 + $0x274] sm:$0xf0] }
 0x158   :  { %v490_v23 = vpack.c.bf16 %v319_v19, %v318_v21  ;;  %v4173_v21 = vld [vmem:[%s6511_s3 + $0x54] sm:$0xf] }
 0x159   :  { %1452 = vmatmul.bf16.gmra.mxu0 %v3386_v54  ;;  %1607 = vmatmul.bf16.gmra.mxu1 %v3634_v10  ;;  %v3406_v24 = vor.u32 %v4173_v21, %v3403_v22  ;;  %v4240_v54 = vld [vmem:[%s6511_s3 + $0x264] sm:$0xf0] }
 0x15a   :  { %v3666_v55 = vor.u32 %v4240_v54, %v3665_v53 }
 0x15d   :  { %v279_v12 = vpop.f32.mrf.mxu0 }
 0x15e   :  { %v320_v17 = vmax.f32 %v279_v12, 0.0  ;;  %v3395_v12 = vld [vmem:[%s6511_s3 + $0x48] sm:$0xf0] }
 0x15f   :  { %v3398_v13 = vor.u32 %v4171_v11, %v3395_v12 }
 0x165   :  { %v281_v16 = vpop.f32.mrf.mxu0 }
 0x166   :  { %v321_v18 = vmax.f32 %v281_v16, 0.0  ;;  %v3641_v16 = vld [vmem:[%s6511_s3 + $0x230] sm:$0xf] }
 0x168   :  { %v491_v20 = vpack.c.bf16 %v321_v18, %v320_v17  ;;  %v4234_v17 = vld [vmem:[%s6511_s3 + $0x234] sm:$0xf0]  ;;  %v3410_v18 = vor.u32 %v4176_v15, %v3409_v14 }
 0x169   :  { %1457 = vmatmul.bf16.gmra.mxu0 %v3394_v63  ;;  %v3642_v19 = vor.u32 %v4234_v17, %v3641_v16 }
 0x16a   :  { %1830 = vmatpush.bf16.msra.mxu2 %v491_v20  ;;  %4344 = vmatpush.bf16.msra.mxu3 %v491_v20 }
 0x16b   :  { %1612 = vmatmul.bf16.gmra.mxu1 %v3642_v19  ;;  %v3449_v19 = vld [vmem:[%s6511_s3 + $0xb0] sm:$0xf] }
 0x16d   :  { %v284_v20 = vpop.f32.mrf.mxu0 }
 0x16e   :  { %1831 = vmatpush.bf16.msra.mxu2 %v490_v23  ;;  %4345 = vmatpush.bf16.msra.mxu3 %v490_v23 }
 0x172   :  { %1832 = vmatpush.bf16.msra.mxu2 %v489_v26  ;;  %4346 = vmatpush.bf16.msra.mxu3 %v489_v26  ;;  %v4178_v26 = vld [vmem:[%s6511_s3 + $0x74] sm:$0xf0] }
 0x173   :  { %v3418_v29 = vor.u32 %v4178_v26, %v3417_v25  ;;  %v4183_v25 = vld [vmem:[%s6511_s3 + $0xa4] sm:$0xf] }
 0x175   :  { %v4619_v23 = vpop.f32.mrf.mxu0 }
 0x176   :  { %1833 = vmatpush.bf16.msra.mxu2 %v488_v32  ;;  %4347 = vmatpush.bf16.msra.mxu3 %v488_v32  ;;  %v4175_v32 = vld [vmem:[%s6511_s3 + $0x64] sm:$0xf] }
 0x179   :  { %1462 = vmatmul.bf16.gmra.mxu0 %v3402_v9  ;;  %v3674_v9 = vor.u32 %v4242_v8, %v3673_v7  ;;  %v3459_v8 = vld [vmem:[%s6511_s3 + $0xc8] sm:$0xf0] }
 0x17a   :  { %1834 = vmatpush.bf16.msra.mxu2 %v487_v35  ;;  %4348 = vmatpush.bf16.msra.mxu3 %v487_v35  ;;  %v3414_v35 = vor.u32 %v4175_v32, %v3411_v33 }
 0x17b   :  { %1617 = vmatmul.bf16.gmra.mxu1 %v3650_v30 }
 0x17d   :  { %v4634_v31 = vpop.f32.mrf.mxu0 }
 0x17e   :  { %1835 = vmatpush.bf16.msra.mxu2 %v486_v39  ;;  %4349 = vmatpush.bf16.msra.mxu3 %v486_v39  ;;  %v3426_v39 = vor.u32 %v4180_v38, %v3425_v37 }
 0x181   :  { %3983 = vmatmul.msk.bf16.vlgmr.msra.gmra.mxu2 %vm1194_vm2, %v3366_v40  ;;  %v4177_v40 = vld [vmem:[%s6511_s3 + $0x74] sm:$0xf] }
 0x182   :  { %v3422_v46 = vor.u32 %v4177_v40, %v3419_v41 }
 0x185   :  { %v4642_v34 = vpop.f32.mrf.mxu0 }
 0x189   :  { %1467 = vmatmul.bf16.gmra.mxu0 %v3410_v18 }
 0x18b   :  { %1622 = vmatmul.bf16.gmra.mxu1 %v3658_v44 }
 0x191   :  { %3984 = vmatmul.msk.bf16.gmra.mxu2 %vm1194_vm2, %v3374_v49  ;;  %v4182_v49 = vld [vmem:[%s6511_s3 + $0x94] sm:$0xf0] }
 0x192   :  { %v3434_v50 = vor.u32 %v4182_v49, %v3433_v48  ;;  %v3451_v49 = vld [vmem:[%s6511_s3 + $0xb8] sm:$0xf0] }
 0x199   :  { %1472 = vmatmul.bf16.gmra.mxu0 %v3418_v29  ;;  %v4244_v29 = vld [vmem:[%s6511_s3 + $0x284] sm:$0xf0] }
 0x19a   :  { %v3682_v30 = vor.u32 %v4244_v29, %v3681_v28 }
 0x19b   :  { %1627 = vmatmul.bf16.gmra.mxu1 %v3666_v55 }
 0x1a1   :  { %3985 = vmatmul.msk.bf16.gmra.mxu2 %vm1194_vm2, %v3382_v58  ;;  %v2227_v58 = vperm.slane %v4426_v6, 0 }
 0x1a6   :  { %v1438_v36 = vpop.f32.mrf.mxu0  ;;  %v4693_v4 = vpop.f32.mrf.mxu1 }
 0x1a9   :  { %1477 = vmatmul.bf16.gmra.mxu0 %v3426_v39  ;;  %v2236_v39 = vperm.slane %v4426_v6, 1 }
 0x1ab   :  { %1632 = vmatmul.bf16.gmra.mxu1 %v3674_v9  ;;  %v3697_v9 = vld [vmem:[%s6511_s3 + $0x2a0] sm:$0xf] }
 0x1ae   :  { %v1440_v45 = vpop.f32.mrf.mxu0  ;;  %v4706_v16 = vpop.f32.mrf.mxu1 }
 0x1b1   :  { %3986 = vmatmul.msk.bf16.gmra.mxu2 %vm1194_vm2, %v3390_v3  ;;  %v4181_v3 = vld [vmem:[%s6511_s3 + $0x94] sm:$0xf] }
 0x1b6   :  { %v1443_v47 = vpop.f32.mrf.mxu0  ;;  %v4718_v26 = vpop.f32.mrf.mxu1 }
 0x1b9   :  { %1482 = vmatmul.bf16.gmra.mxu0 %v3434_v50  ;;  %v3689_v50 = vld [vmem:[%s6511_s3 + $0x290] sm:$0xf] }
 0x1ba   :  { %v3690_v52 = vor.u32 %v4246_v51, %v3689_v50 }
 0x1bb   :  { %1637 = vmatmul.bf16.gmra.mxu1 %v3682_v30  ;;  %v4189_v30 = vld [vmem:[%s6511_s3 + $0xd4] sm:$0xf] }
 0x1be   :  { %v1445_v56 = vpop.f32.mrf.mxu0  ;;  %v4731_v38 = vpop.f32.mrf.mxu1 }
 0x1c1   :  { %3987 = vmatmul.msk.bf16.gmra.mxu2 %vm1194_vm2, %v3398_v13  ;;  %v3438_v13 = vor.u32 %v4181_v3, %v3435_v5  ;;  %v4187_v5 = vld [vmem:[%s6511_s3 + $0xc4] sm:$0xf] }
 0x1c6   :  { %v1448_v60 = vpop.f32.mrf.mxu0  ;;  %v4743_v48 = vpop.f32.mrf.mxu1 }
 0x1c9   :  { %1487 = vmatmul.bf16.gmra.mxu0 %v3442_v0 }
 0x1cb   :  { %1642 = vmatmul.bf16.gmra.mxu1 %v3690_v52 }
 0x1ce   :  { %v1450_v11 = vpop.f32.mrf.mxu0 }
 0x1d1   :  { %3988 = vmatmul.msk.bf16.gmra.mxu2 %vm1194_vm2, %v3406_v24 }
 0x1d6   :  { %v1453_v18 = vpop.f32.mrf.mxu0 }
 0x1de   :  { %v1455_v32 = vpop.f32.mrf.mxu0 }
 0x1e1   :  { %3989 = vmatmul.msk.bf16.gmra.mxu2 %vm1194_vm2, %v3414_v35  ;;  %v3446_v35 = vor.u32 %v4183_v25, %v3443_v27 }
 0x1e6   :  { %v1458_v41 = vpop.f32.mrf.mxu0 }
 0x1ee   :  { %v1460_v54 = vpop.f32.mrf.mxu0 }
 0x1f1   :  { %3990 = vmatmul.msk.bf16.gmra.mxu2 %vm1194_vm2, %v3422_v46 }
 0x1f6   :  { %v1463_v61 = vpop.f32.mrf.mxu0 }
 0x201   :  { %3991 = vmatmul.msk.bf16.gmra.mxu2 %vm1194_vm2, %v3430_v57 }
 0x204   :  { %v1837_v59 = vpop.f32.mrf.mxu2 }
 0x205   :  { %v1838_v63 = vadd.f32 %v1837_v59, %v1438_v36  ;;  %v4755_v59 = vpop.f32.mrf.mxu1 }
 0x207   :  { %v2228_v1 = vmul.f32 %v2227_v58, %v1838_v63  ;;  %v4190_v63 = vld [vmem:[%s6511_s3 + $0xd4] sm:$0xf0] }
 0x209   :  { %v2232_v2 = vadd.f32 %v2228_v1, %v284_v20  ;;  %v4186_v20 = vld [vmem:[%s6511_s3 + $0xb4] sm:$0xf0]  ;;  %v3466_v1 = vor.u32 %v4190_v63, %v3465_v62 }
 0x20a   :  { %v3450_v22 = vor.u32 %v4186_v20, %v3449_v19  ;;  %v2245_v20 = vperm.slane %v4426_v6, 2 }
 0x20c   :  { %v1839_v10 = vpop.f32.mrf.mxu2  ;;  %1492 = vmatmul.bf16.gmra.mxu0 %v3450_v22 }
 0x20d   :  { %v1840_v12 = vadd.f32 %v1839_v10, %v1440_v45  ;;  %v3458_v45 = vor.u32 %v4188_v43, %v3457_v42  ;;  %v4766_v7 = vpop.f32.mrf.mxu1  ;;  %v4248_v10 = vld [vmem:[%s6511_s3 + $0x2a4] sm:$0xf0] }
 0x20f   :  { %v2229_v14 = vmul.f32 %v2227_v58, %v1840_v12 }
 0x211   :  { %v2233_v15 = vadd.f32 %v2229_v14, %v4619_v23  ;;  %3992 = vmatmul.msk.bf16.gmra.mxu2 %vm1194_vm2, %v3438_v13  ;;  %v1465_v13 = vpop.f32.mrf.mxu0 }
 0x214   :  { %v1842_v17 = vpop.f32.mrf.mxu2 }
 0x215   :  { %v1843_v21 = vadd.f32 %v1842_v17, %v1443_v47  ;;  %v4185_v47 = vld [vmem:[%s6511_s3 + $0xb4] sm:$0xf]  ;;  %v4778_v19 = vpop.f32.mrf.mxu1 }
 0x217   :  { %v2230_v24 = vmul.f32 %v2227_v58, %v1843_v21 }
 0x219   :  { %v2234_v23 = vadd.f32 %v2230_v24, %v4634_v31  ;;  %v1468_v22 = vpop.f32.mrf.mxu0  ;;  %v3473_v24 = vld [vmem:[%s6511_s3 + $0xe0] sm:$0xf] }
 0x21c   :  { %v1844_v31 = vpop.f32.mrf.mxu2  ;;  %1497 = vmatmul.bf16.gmra.mxu0 %v3458_v45 }
 0x21d   :  { %v1845_v33 = vadd.f32 %v1844_v31, %v1445_v56  ;;  %v3454_v56 = vor.u32 %v4185_v47, %v3451_v49  ;;  %v4790_v31 = vpop.f32.mrf.mxu1  ;;  %v4194_v47 = vld [vmem:[%s6511_s3 + $0xf4] sm:$0xf0] }
 0x21f   :  { %v2231_v36 = vmul.f32 %v2227_v58, %v1845_v33  ;;  %v3705_v33 = vld [vmem:[%s6511_s3 + $0x2b0] sm:$0xf] }
 0x221   :  { %v2235_v37 = vadd.f32 %v2231_v36, %v4642_v34  ;;  %3993 = vmatmul.msk.bf16.gmra.mxu2 %vm1194_vm2, %v3446_v35  ;;  %v4250_v35 = vld [vmem:[%s6511_s3 + $0x2b4] sm:$0xf0] }
 0x222   :  { %v3706_v36 = vor.u32 %v4250_v35, %v3705_v33  ;;  %v3497_v35 = vld [vmem:[%s6511_s3 + $0x110] sm:$0xf] }
 0x224   :  { %v1847_v40 = vpop.f32.mrf.mxu2 }
 0x225   :  { %v1848_v44 = vadd.f32 %v1847_v40, %v1448_v60 }
 0x227   :  { %v2237_v46 = vmul.f32 %v2236_v39, %v1848_v44  ;;  %v4802_v44 = vpop.f32.mrf.mxu1 }
 0x229   :  { %v2241_v34 = vadd.f32 %v2237_v46, %v2232_v2 }
 0x22c   :  { %v1849_v53 = vpop.f32.mrf.mxu2  ;;  %1502 = vmatmul.bf16.gmra.mxu0 %v3466_v1 }
 0x22d   :  { %v1850_v55 = vadd.f32 %v1849_v53, %v1450_v11  ;;  %v3698_v11 = vor.u32 %v4248_v10, %v3697_v9  ;;  %v4191_v53 = vld [vmem:[%s6511_s3 + $0xe4] sm:$0xf]  ;;  %v3489_v9 = vld [vmem:[%s6511_s3 + $0x100] sm:$0xf]  ;;  %v4196_v10 = vld [vmem:[%s6511_s3 + $0x104] sm:$0xf0] }
 0x22f   :  { %v2238_v57 = vmul.f32 %v2236_v39, %v1850_v55  ;;  %1647 = vmatmul.bf16.gmra.mxu1 %v3698_v11  ;;  %v3475_v55 = vld [vmem:[%s6511_s3 + $0xe8] sm:$0xf0] }
 0x230   :  { %v3478_v63 = vor.u32 %v4191_v53, %v3475_v55 }
 0x231   :  { %v2242_v58 = vadd.f32 %v2238_v57, %v2233_v15  ;;  %3994 = vmatmul.msk.bf16.gmra.mxu2 %vm1194_vm2, %v3454_v56  ;;  %v3462_v15 = vor.u32 %v4187_v5, %v3459_v8  ;;  %v3713_v56 = vld [vmem:[%s6511_s3 + $0x2c0] sm:$0xf]  ;;  %v4252_v57 = vld [vmem:[%s6511_s3 + $0x2c4] sm:$0xf0] }
 0x234   :  { %v1852_v60 = vpop.f32.mrf.mxu2 }
 0x235   :  { %v1853_v0 = vadd.f32 %v1852_v60, %v1453_v18 }
 0x237   :  { %v2239_v2 = vmul.f32 %v2236_v39, %v1853_v0 }
 0x239   :  { %v2243_v3 = vadd.f32 %v2239_v2, %v2234_v23  ;;  %v4192_v23 = vld [vmem:[%s6511_s3 + $0xe4] sm:$0xf0] }
 0x23a   :  { %v3474_v27 = vor.u32 %v4192_v23, %v3473_v24 }
 0x23c   :  { %v1854_v12 = vpop.f32.mrf.mxu2  ;;  %1507 = vmatmul.bf16.gmra.mxu0 %v3474_v27 }
 0x23d   :  { %v1855_v14 = vadd.f32 %v1854_v12, %v1455_v32  ;;  %v3467_v32 = vld [vmem:[%s6511_s3 + $0xd8] sm:$0xf0]  ;;  %v3490_v12 = vor.u32 %v4196_v10, %v3489_v9 }
 0x23e   :  { %v3499_v9 = vld [vmem:[%s6511_s3 + $0x118] sm:$0xf0] }
 0x23f   :  { %v2240_v17 = vmul.f32 %v2236_v39, %v1855_v14  ;;  %v1470_v39 = vpop.f32.mrf.mxu0  ;;  %1652 = vmatmul.bf16.gmra.mxu1 %v3706_v36  ;;  %v4198_v36 = vld [vmem:[%s6511_s3 + $0x114] sm:$0xf0] }
 0x241   :  { %v2244_v18 = vadd.f32 %v2240_v17, %v2235_v37  ;;  %3995 = vmatmul.msk.bf16.gmra.mxu2 %vm1194_vm2, %v3462_v15  ;;  %v4193_v15 = vld [vmem:[%s6511_s3 + $0xf4] sm:$0xf]  ;;  %v3483_v17 = vld [vmem:[%s6511_s3 + $0xf8] sm:$0xf0] }
 0x242   :  { %v3486_v27 = vor.u32 %v4193_v15, %v3483_v17 }
 0x244   :  { %v1857_v21 = vpop.f32.mrf.mxu2 }
 0x245   :  { %v1858_v25 = vadd.f32 %v1857_v21, %v1458_v41  ;;  %v3470_v41 = vor.u32 %v4189_v30, %v3467_v32  ;;  %v4254_v21 = vld [vmem:[%s6511_s3 + $0x2d4] sm:$0xf0] }
 0x247   :  { %v2246_v28 = vmul.f32 %v2245_v20, %v1858_v25  ;;  %v1473_v46 = vpop.f32.mrf.mxu0 }
 0x249   :  { %v2250_v29 = vadd.f32 %v2246_v28, %v2241_v34  ;;  %v3481_v34 = vld [vmem:[%s6511_s3 + $0xf0] sm:$0xf] }
 0x24a   :  { %v3482_v50 = vor.u32 %v4194_v47, %v3481_v34  ;;  %v3729_v34 = vld [vmem:[%s6511_s3 + $0x2e0] sm:$0xf] }
 0x24c   :  { %v1859_v37 = vpop.f32.mrf.mxu2  ;;  %1512 = vmatmul.bf16.gmra.mxu0 %v3482_v50 }
 0x24d   :  { %v1860_v40 = vadd.f32 %v1859_v37, %v1460_v54  ;;  %v4813_v54 = vpop.f32.mrf.mxu1 }
 0x24f   :  { %v2247_v42 = vmul.f32 %v2245_v20, %v1860_v40 }
 0x251   :  { %v2251_v43 = vadd.f32 %v2247_v42, %v2242_v58  ;;  %3996 = vmatmul.msk.bf16.gmra.mxu2 %vm1194_vm2, %v3470_v41  ;;  %v3714_v58 = vor.u32 %v4252_v57, %v3713_v56  ;;  %v4195_v42 = vld [vmem:[%s6511_s3 + $0x104] sm:$0xf]  ;;  %v2263_v57 = vperm.slane %v4426_v6, 4 }
 0x253   :  { %1657 = vmatmul.bf16.gmra.mxu1 %v3714_v58 }
 0x254   :  { %v1862_v45 = vpop.f32.mrf.mxu2 }
 0x255   :  { %v1863_v49 = vadd.f32 %v1862_v45, %v1463_v61  ;;  %v1475_v61 = vpop.f32.mrf.mxu0  ;;  %v4825_v2 = vpop.f32.mrf.mxu1 }
 0x257   :  { %v2248_v51 = vmul.f32 %v2245_v20, %v1863_v49 }
 0x259   :  { %v2252_v52 = vadd.f32 %v2248_v51, %v2243_v3  ;;  %v2254_v3 = vperm.slane %v4426_v6, 3 }
 0x25c   :  { %v1864_v60 = vpop.f32.mrf.mxu2  ;;  %1517 = vmatmul.bf16.gmra.mxu0 %v3490_v12 }
 0x25d   :  { %v1865_v62 = vadd.f32 %v1864_v60, %v1465_v13  ;;  %v1478_v8 = vpop.f32.mrf.mxu0 }
 0x25f   :  { %v2249_v0 = vmul.f32 %v2245_v20, %v1865_v62  ;;  %v3721_v20 = vld [vmem:[%s6511_s3 + $0x2d0] sm:$0xf]  ;;  %v3505_v62 = vld [vmem:[%s6511_s3 + $0x120] sm:$0xf] }
 0x261   :  { %v2253_v1 = vadd.f32 %v2249_v0, %v2244_v18  ;;  %3997 = vmatmul.msk.bf16.gmra.mxu2 %vm1194_vm2, %v3478_v63  ;;  %v4840_v18 = vpop.f32.mrf.mxu1 }
 0x264   :  { %v1867_v5 = vpop.f32.mrf.mxu2 }
 0x265   :  { %v1868_v11 = vadd.f32 %v1867_v5, %v1468_v22  ;;  %v3722_v22 = vor.u32 %v4254_v21, %v3721_v20  ;;  %v1480_v23 = vpop.f32.mrf.mxu0  ;;  %v4197_v5 = vld [vmem:[%s6511_s3 + $0x114] sm:$0xf] }
 0x266   :  { %v3502_v17 = vor.u32 %v4197_v5, %v3499_v9 }
 0x267   :  { %v2255_v13 = vmul.f32 %v2254_v3, %v1868_v11  ;;  %1662 = vmatmul.bf16.gmra.mxu1 %v3722_v22  ;;  %v3737_v11 = vld [vmem:[%s6511_s3 + $0x2f0] sm:$0xf] }
 0x269   :  { %v2259_v14 = vadd.f32 %v2255_v13, %v2250_v29  ;;  %v4849_v30 = vpop.f32.mrf.mxu1 }
 0x26c   :  { %v1869_v24 = vpop.f32.mrf.mxu2 }
 0x26d   :  { %v1870_v25 = vadd.f32 %v1869_v24, %v1470_v39  ;;  %v1483_v33 = vpop.f32.mrf.mxu0  ;;  %v3498_v39 = vor.u32 %v4198_v36, %v3497_v35  ;;  %v3747_v35 = vld [vmem:[%s6511_s3 + $0x308] sm:$0xf0] }
 0x26f   :  { %v2256_v28 = vmul.f32 %v2254_v3, %v1870_v25  ;;  %1522 = vmatmul.bf16.gmra.mxu0 %v3498_v39 }
 0x271   :  { %v2260_v29 = vadd.f32 %v2256_v28, %v2251_v43  ;;  %3998 = vmatmul.msk.bf16.gmra.mxu2 %vm1194_vm2, %v3486_v27  ;;  %v3491_v43 = vld [vmem:[%s6511_s3 + $0x108] sm:$0xf0]  ;;  %v4863_v45 = vpop.f32.mrf.mxu1  ;;  %v3513_v27 = vld [vmem:[%s6511_s3 + $0x130] sm:$0xf]  ;;  %v4202_v28 = vld [vmem:[%s6511_s3 + $0x134] sm:$0xf0] }
 0x274   :  { %v1872_v32 = vpop.f32.mrf.mxu2 }
 0x275   :  { %v1873_v37 = vadd.f32 %v1872_v32, %v1473_v46  ;;  %v4256_v46 = vld [vmem:[%s6511_s3 + $0x2e4] sm:$0xf0]  ;;  %v1485_v50 = vpop.f32.mrf.mxu0 }
 0x276   :  { %v3730_v47 = vor.u32 %v4256_v46, %v3729_v34  ;;  %v4260_v34 = vld [vmem:[%s6511_s3 + $0x304] sm:$0xf0] }
 0x277   :  { %v2257_v40 = vmul.f32 %v2254_v3, %v1873_v37 }
 0x278   :  { %1667 = vmatmul.bf16.gmra.mxu1 %v3730_v47 }
 0x279   :  { %v2261_v41 = vadd.f32 %v2257_v40, %v2252_v52  ;;  %v3494_v52 = vor.u32 %v4195_v42, %v3491_v43  ;;  %v4872_v56 = vpop.f32.mrf.mxu1  ;;  %v4199_v40 = vld [vmem:[%s6511_s3 + $0x124] sm:$0xf]  ;;  %v3507_v42 = vld [vmem:[%s6511_s3 + $0x128] sm:$0xf0]  ;;  %v3745_v43 = vld [vmem:[%s6511_s3 + $0x300] sm:$0xf] }
 0x27a   :  { %v3746_v46 = vor.u32 %v4260_v34, %v3745_v43 }
 0x27c   :  { %v1874_v49 = vpop.f32.mrf.mxu2 }
 0x27d   :  { %v1875_v51 = vadd.f32 %v1874_v49, %v1475_v61  ;;  %v1488_v60 = vpop.f32.mrf.mxu0  ;;  %v4200_v61 = vld [vmem:[%s6511_s3 + $0x124] sm:$0xf0] }
 0x27e   :  { %v3506_v0 = vor.u32 %v4200_v61, %v3505_v62  ;;  %v2272_v62 = vperm.slane %v4426_v6, 5  ;;  %v3755_v6 = vld [vmem:[%s6511_s3 + $0x318] sm:$0xf0] }
 0x27f   :  { %v2258_v53 = vmul.f32 %v2254_v3, %v1875_v51  ;;  %v3510_v51 = vor.u32 %v4199_v40, %v3507_v42  ;;  %v3763_v42 = vld [vmem:[%s6511_s3 + $0x328] sm:$0xf0] }
 0x280   :  { %1527 = vmatmul.bf16.gmra.mxu0 %v3506_v0  ;;  %v3521_v0 = vld [vmem:[%s6511_s3 + $0x140] sm:$0xf] }
 0x281   :  { %v2262_v55 = vadd.f32 %v2258_v53, %v2253_v1  ;;  %3999 = vmatmul.msk.bf16.gmra.mxu2 %vm1194_vm2, %v3494_v52  ;;  %v4887_v10 = vpop.f32.mrf.mxu1 }
 0x284   :  { %v1877_v58 = vpop.f32.mrf.mxu2 }
 0x285   :  { %v1878_v63 = vadd.f32 %v1877_v58, %v1478_v8  ;;  %v4258_v8 = vld [vmem:[%s6511_s3 + $0x2f4] sm:$0xf0] }
 0x286   :  { %v3738_v12 = vor.u32 %v4258_v8, %v3737_v11  ;;  %v4201_v8 = vld [vmem:[%s6511_s3 + $0x134] sm:$0xf] }
 0x287   :  { %v2264_v3 = vmul.f32 %v2263_v57, %v1878_v63 }
 0x288   :  { %1672 = vmatmul.bf16.gmra.mxu1 %v3738_v12  ;;  %v3515_v12 = vld [vmem:[%s6511_s3 + $0x138] sm:$0xf0] }
 0x289   :  { %v2268_v1 = vadd.f32 %v2264_v3, %v2259_v14  ;;  %v1490_v14 = vpop.f32.mrf.mxu0  ;;  %v4896_v22 = vpop.f32.mrf.mxu1 }
 0x28c   :  { %v1879_v13 = vpop.f32.mrf.mxu2 }
 0x28d   :  { %v1880_v15 = vadd.f32 %v1879_v13, %v1480_v23  ;;  %v4259_v23 = vld [vmem:[%s6511_s3 + $0x304] sm:$0xf]  ;;  %v3753_v13 = vld [vmem:[%s6511_s3 + $0x310] sm:$0xf] }
 0x28e   :  { %v3750_v36 = vor.u32 %v4259_v23, %v3747_v35 }
 0x28f   :  { %v2265_v20 = vmul.f32 %v2263_v57, %v1880_v15  ;;  %v4262_v15 = vld [vmem:[%s6511_s3 + $0x314] sm:$0xf0] }
 0x290   :  { %4031 = vmatmul.msk.bf16.vlgmr.msra.gmra.mxu3 %vm1194_vm2, %v3750_v36  ;;  %v3529_v36 = vld [vmem:[%s6511_s3 + $0x150] sm:$0xf] }
 0x291   :  { %v2269_v21 = vadd.f32 %v2265_v20, %v2260_v29  ;;  %4000 = vmatmul.msk.bf16.gmra.mxu2 %vm1194_vm2, %v3502_v17  ;;  %v1493_v25 = vpop.f32.mrf.mxu0  ;;  %v3514_v29 = vor.u32 %v4202_v28, %v3513_v27  ;;  %v3754_v17 = vor.u32 %v4262_v15, %v3753_v13  ;;  %v3518_v27 = vor.u32 %v4201_v8, %v3515_v12  ;;  %v3537_v13 = vld [vmem:[%s6511_s3 + $0x160] sm:$0xf] }
 0x293   :  { %1532 = vmatmul.bf16.gmra.mxu0 %v3514_v29 }
 0x294   :  { %v1882_v24 = vpop.f32.mrf.mxu2 }
 0x295   :  { %v1883_v32 = vadd.f32 %v1882_v24, %v1483_v33  ;;  %v4917_v33 = vpop.f32.mrf.mxu1 }
 0x297   :  { %v2266_v37 = vmul.f32 %v2263_v57, %v1883_v32 }
 0x298   :  { %1677 = vmatmul.bf16.gmra.mxu1 %v3746_v46 }
 0x299   :  { %v2270_v39 = vadd.f32 %v2266_v37, %v2261_v41  ;;  %v1495_v47 = vpop.f32.mrf.mxu0  ;;  %v4206_v37 = vld [vmem:[%s6511_s3 + $0x154] sm:$0xf0] }
 0x29c   :  { %v1884_v41 = vpop.f32.mrf.mxu2 }
 0x29d   :  { %v1885_v49 = vadd.f32 %v1884_v41, %v1485_v50  ;;  %v4926_v58 = vpop.f32.mrf.mxu1  ;;  %v4204_v50 = vld [vmem:[%s6511_s3 + $0x144] sm:$0xf0]  ;;  %v4203_v41 = vld [vmem:[%s6511_s3 + $0x144] sm:$0xf] }
 0x29e   :  { %v3522_v3 = vor.u32 %v4204_v50, %v3521_v0 }
 0x29f   :  { %v2267_v52 = vmul.f32 %v2263_v57, %v1885_v49  ;;  %v3523_v49 = vld [vmem:[%s6511_s3 + $0x148] sm:$0xf0] }
 0x2a1   :  { %v2271_v53 = vadd.f32 %v2267_v52, %v2262_v55  ;;  %4001 = vmatmul.msk.bf16.gmra.mxu2 %vm1194_vm2, %v3510_v51  ;;  %v1498_v63 = vpop.f32.mrf.mxu0  ;;  %v4261_v55 = vld [vmem:[%s6511_s3 + $0x314] sm:$0xf]  ;;  %v3761_v51 = vld [vmem:[%s6511_s3 + $0x320] sm:$0xf]  ;;  %v4264_v52 = vld [vmem:[%s6511_s3 + $0x324] sm:$0xf0] }
 0x2a2   :  { %v3758_v5 = vor.u32 %v4261_v55, %v3755_v6  ;;  %v3526_v55 = vor.u32 %v4203_v41, %v3523_v49 }
 0x2a3   :  { %1537 = vmatmul.bf16.gmra.mxu0 %v3522_v3 }
 0x2a4   :  { %v1887_v61 = vpop.f32.mrf.mxu2  ;;  %4032 = vmatmul.msk.bf16.gmra.mxu3 %vm1194_vm2, %v3758_v5  ;;  %v4358_v5 = vld [vmem:[%s6509_s0] sm:$0xff] }
 0x2a5   :  { %v1888_v57 = vadd.f32 %v1887_v61, %v1488_v60  ;;  %v4948_v60 = vpop.f32.mrf.mxu1  ;;  %v3762_v61 = vor.u32 %v4264_v52, %v3761_v51  ;;  %v3545_v52 = vld [vmem:[%s6511_s3 + $0x170] sm:$0xf] }
 0x2a7   :  { %v2273_v9 = vmul.f32 %v2272_v62, %v1888_v57 }
 0x2a8   :  { %1682 = vmatmul.bf16.gmra.mxu1 %v3754_v17  ;;  %v3771_v17 = vld [vmem:[%s6511_s3 + $0x338] sm:$0xf0] }
 0x2a9   :  { %v2277_v11 = vadd.f32 %v2273_v9, %v2268_v1  ;;  %v1500_v20 = vpop.f32.mrf.mxu0  ;;  %v2281_v9 = vperm.slane %v4358_v5, 6 }
 0x2ac   :  { %v1889_v1 = vpop.f32.mrf.mxu2 }
 0x2ad   :  { %v1890_v24 = vadd.f32 %v1889_v1, %v1490_v14  ;;  %v4957_v32 = vpop.f32.mrf.mxu1  ;;  %v4263_v14 = vld [vmem:[%s6511_s3 + $0x324] sm:$0xf] }
 0x2ae   :  { %v3766_v43 = vor.u32 %v4263_v14, %v3763_v42 }
 0x2af   :  { %v2274_v28 = vmul.f32 %v2272_v62, %v1890_v24 }
 0x2b1   :  { %v2278_v23 = vadd.f32 %v2274_v28, %v2269_v21  ;;  %4002 = vmatmul.msk.bf16.gmra.mxu2 %vm1194_vm2, %v3518_v27  ;;  %v1503_v35 = vpop.f32.mrf.mxu0  ;;  %v3530_v21 = vor.u32 %v4206_v37, %v3529_v36  ;;  %v4205_v28 = vld [vmem:[%s6511_s3 + $0x154] sm:$0xf]  ;;  %v3769_v36 = vld [vmem:[%s6511_s3 + $0x330] sm:$0xf]  ;;  %v4266_v37 = vld [vmem:[%s6511_s3 + $0x334] sm:$0xf0] }
 0x2b2   :  { %v3770_v14 = vor.u32 %v4266_v37, %v3769_v36  ;;  %v2290_v37 = vperm.slane %v4358_v5, 7  ;;  %v3787_v5 = vld [vmem:[%s6511_s3 + $0x358] sm:$0xf0] }
 0x2b3   :  { %1542 = vmatmul.bf16.gmra.mxu0 %v3530_v21 }
 0x2b4   :  { %v1892_v29 = vpop.f32.mrf.mxu2  ;;  %4033 = vmatmul.msk.bf16.gmra.mxu3 %vm1194_vm2, %v3766_v43 }
 0x2b5   :  { %v1893_v40 = vadd.f32 %v1892_v29, %v1493_v25  ;;  %v4978_v25 = vpop.f32.mrf.mxu1  ;;  %v3531_v29 = vld [vmem:[%s6511_s3 + $0x158] sm:$0xf0] }
 0x2b6   :  { %v3534_v42 = vor.u32 %v4205_v28, %v3531_v29 }
 0x2b7   :  { %v2275_v34 = vmul.f32 %v2272_v62, %v1893_v40 }
 0x2b8   :  { %1687 = vmatmul.bf16.gmra.mxu1 %v3762_v61  ;;  %v4210_v61 = vld [vmem:[%s6511_s3 + $0x174] sm:$0xf0] }
 0x2b9   :  { %v2279_v46 = vadd.f32 %v2275_v34, %v2270_v39  ;;  %v1505_v0 = vpop.f32.mrf.mxu0 }
 0x2bc   :  { %v1894_v39 = vpop.f32.mrf.mxu2 }
 0x2bd   :  { %v1895_v50 = vadd.f32 %v1894_v39, %v1495_v47  ;;  %v4987_v6 = vpop.f32.mrf.mxu1  ;;  %v4208_v47 = vld [vmem:[%s6511_s3 + $0x164] sm:$0xf0] }
 0x2be   :  { %v3538_v15 = vor.u32 %v4208_v47, %v3537_v13  ;;  %v4207_v13 = vld [vmem:[%s6511_s3 + $0x164] sm:$0xf]  ;;  %v3539_v47 = vld [vmem:[%s6511_s3 + $0x168] sm:$0xf0] }
 0x2bf   :  { %v2276_v57 = vmul.f32 %v2272_v62, %v1895_v50  ;;  %v3779_v50 = vld [vmem:[%s6511_s3 + $0x348] sm:$0xf0] }
 0x2c1   :  { %v2280_v3 = vadd.f32 %v2276_v57, %v2271_v53  ;;  %4003 = vmatmul.msk.bf16.gmra.mxu2 %vm1194_vm2, %v3526_v55  ;;  %v1508_v12 = vpop.f32.mrf.mxu0  ;;  %v4265_v53 = vld [vmem:[%s6511_s3 + $0x334] sm:$0xf] }
 0x2c2   :  { %v3774_v1 = vor.u32 %v4265_v53, %v3771_v17  ;;  %v3777_v53 = vld [vmem:[%s6511_s3 + $0x340] sm:$0xf] }
 0x2c3   :  { %1547 = vmatmul.bf16.gmra.mxu0 %v3538_v15 }
 0x2c4   :  { %v1897_v8 = vpop.f32.mrf.mxu2  ;;  %4034 = vmatmul.msk.bf16.gmra.mxu3 %vm1194_vm2, %v3774_v1 }
 0x2c5   :  { %v1898_v62 = vadd.f32 %v1897_v8, %v1498_v63  ;;  %v5011_v63 = vpop.f32.mrf.mxu1 }
 0x2c7   :  { %v2282_v24 = vmul.f32 %v2281_v9, %v1898_v62  ;;  %v4268_v62 = vld [vmem:[%s6511_s3 + $0x344] sm:$0xf0] }
 0x2c8   :  { %1692 = vmatmul.bf16.gmra.mxu1 %v3770_v14  ;;  %v3778_v15 = vor.u32 %v4268_v62, %v3777_v53 }
 0x2c9   :  { %v2286_v27 = vadd.f32 %v2282_v24, %v2277_v11  ;;  %v1510_v40 = vpop.f32.mrf.mxu0  ;;  %v3542_v24 = vor.u32 %v4207_v13, %v3539_v47 }
 0x2cc   :  { %v1899_v11 = vpop.f32.mrf.mxu2 }
 0x2cd   :  { %v1900_v21 = vadd.f32 %v1899_v11, %v1500_v20  ;;  %v5020_v41 = vpop.f32.mrf.mxu1  ;;  %v4267_v20 = vld [vmem:[%s6511_s3 + $0x344] sm:$0xf] }
 0x2ce   :  { %6540 = vst [vmem:[#allocation2_spill] sm:$0xff] %v5020_v41  ;;  %v3782_v55 = vor.u32 %v4267_v20, %v3779_v50  ;;  %v3547_v20 = vld [vmem:[%s6511_s3 + $0x178] sm:$0xf0] }
 0x2cf   :  { %v2283_v43 = vmul.f32 %v2281_v9, %v1900_v21  ;;  %v3553_v21 = vld [vmem:[%s6511_s3 + $0x180] sm:$0xf] }
 0x2d1   :  { %v2287_v34 = vadd.f32 %v2283_v43, %v2278_v23  ;;  %4004 = vmatmul.msk.bf16.gmra.mxu2 %vm1194_vm2, %v3534_v42  ;;  %v1513_v51 = vpop.f32.mrf.mxu0  ;;  %v3546_v23 = vor.u32 %v4210_v61, %v3545_v52  ;;  %v4212_v42 = vld [vmem:[%s6511_s3 + $0x184] sm:$0xf0]  ;;  %v4209_v61 = vld [vmem:[%s6511_s3 + $0x174] sm:$0xf] }
 0x2d2   :  { %v3550_v13 = vor.u32 %v4209_v61, %v3547_v20 }
 0x2d3   :  { %1552 = vmatmul.bf16.gmra.mxu0 %v3546_v23  ;;  %v4270_v23 = vld [vmem:[%s6511_s3 + $0x354] sm:$0xf0] }
 0x2d4   :  { %v1902_v49 = vpop.f32.mrf.mxu2  ;;  %4035 = vmatmul.msk.bf16.gmra.mxu3 %vm1194_vm2, %v3782_v55 }
 0x2d5   :  { %v1903_v39 = vadd.f32 %v1902_v49, %v1503_v35  ;;  %v5041_v35 = vpop.f32.mrf.mxu1 }
 0x2d7   :  { %v2284_v57 = vmul.f32 %v2281_v9, %v1903_v39  ;;  %v3785_v39 = vld [vmem:[%s6511_s3 + $0x350] sm:$0xf] }
 0x2d8   :  { %1697 = vmatmul.bf16.gmra.mxu1 %v3778_v15  ;;  %v3786_v50 = vor.u32 %v4270_v23, %v3785_v39 }
 0x2d9   :  { %v2288_v8 = vadd.f32 %v2284_v57, %v2279_v46  ;;  %v1515_v17 = vpop.f32.mrf.mxu0 }
 0x2dc   :  { %v1904_v46 = vpop.f32.mrf.mxu2 }
 0x2dd   :  { %v1905_v1 = vadd.f32 %v1904_v46, %v1505_v0  ;;  %v5050_v36 = vpop.f32.mrf.mxu1  ;;  %v4269_v0 = vld [vmem:[%s6511_s3 + $0x354] sm:$0xf] }
 0x2de   :  { %v3790_v43 = vor.u32 %v4269_v0, %v3787_v5  ;;  %v3793_v5 = vld [vmem:[%s6511_s3 + $0x360] sm:$0xf] }
 0x2df   :  { %v2285_v28 = vmul.f32 %v2281_v9, %v1905_v1  ;;  %v3554_v9 = vor.u32 %v4212_v42, %v3553_v21  ;;  %v3561_v1 = vld [vmem:[%s6511_s3 + $0x190] sm:$0xf] }
 0x2e1   :  { %v2289_v29 = vadd.f32 %v2285_v28, %v2280_v3  ;;  %4005 = vmatmul.msk.bf16.gmra.mxu2 %vm1194_vm2, %v3542_v24  ;;  %v1518_v11 = vpop.f32.mrf.mxu0  ;;  %v4214_v24 = vld [vmem:[%s6511_s3 + $0x194] sm:$0xf0] }
 0x2e3   :  { %1557 = vmatmul.bf16.gmra.mxu0 %v3554_v9  ;;  %v3555_v9 = vld [vmem:[%s6511_s3 + $0x188] sm:$0xf0] }
 0x2e4   :  { %v1907_v14 = vpop.f32.mrf.mxu2  ;;  %4036 = vmatmul.msk.bf16.gmra.mxu3 %vm1194_vm2, %v3790_v43  ;;  %v4272_v43 = vld [vmem:[%s6511_s3 + $0x364] sm:$0xf0] }
 0x2e5   :  { %v1908_v3 = vadd.f32 %v1907_v14, %v1508_v12  ;;  %v5071_v12 = vpop.f32.mrf.mxu1  ;;  %v3795_v14 = vld [vmem:[%s6511_s3 + $0x368] sm:$0xf0] }
 0x2e7   :  { %v2291_v49 = vmul.f32 %v2290_v37, %v1908_v3  ;;  %v4211_v3 = vld [vmem:[%s6511_s3 + $0x184] sm:$0xf] }
 0x2e8   :  { %1702 = vmatmul.bf16.gmra.mxu1 %v3786_v50  ;;  %v3558_v39 = vor.u32 %v4211_v3, %v3555_v9  ;;  %v3801_v3 = vld [vmem:[%s6511_s3 + $0x370] sm:$0xf]  ;;  %v4274_v9 = vld [vmem:[%s6511_s3 + $0x374] sm:$0xf0] }
 0x2e9   :  { %v2295_v52 = vadd.f32 %v2291_v49, %v2286_v27  ;;  %v1520_v55 = vpop.f32.mrf.mxu0  ;;  %v3794_v49 = vor.u32 %v4272_v43, %v3793_v5  ;;  %v3802_v5 = vor.u32 %v4274_v9, %v3801_v3  ;;  %v3809_v3 = vld [vmem:[%s6511_s3 + $0x380] sm:$0xf]  ;;  %v4276_v9 = vld [vmem:[%s6511_s3 + $0x384] sm:$0xf0] }
 0x2ec   :  { %v1909_v27 = vpop.f32.mrf.mxu2 }
 0x2ed   :  { %v1910_v57 = vadd.f32 %v1909_v27, %v1510_v40  ;;  %v5080_v62 = vpop.f32.mrf.mxu1  ;;  %v4271_v40 = vld [vmem:[%s6511_s3 + $0x364] sm:$0xf] }
 0x2ee   :  { %6541 = vst [vmem:[#allocation3_spill] sm:$0xff] %v5080_v62  ;;  %v3798_v21 = vor.u32 %v4271_v40, %v3795_v14  ;;  %v3803_v40 = vld [vmem:[%s6511_s3 + $0x378] sm:$0xf0] }
 0x2ef   :  { %v2292_v47 = vmul.f32 %v2290_v37, %v1910_v57  ;;  %v5115_v57 = vld [vmem:[%s6509_s0 + $0x8] sm:$0xff] }
 0x2f1   :  { %v2296_v53 = vadd.f32 %v2292_v47, %v2287_v34  ;;  %4006 = vmatmul.msk.bf16.gmra.mxu2 %vm1194_vm2, %v3550_v13  ;;  %v1523_v46 = vpop.f32.mrf.mxu0  ;;  %v3562_v34 = vor.u32 %v4214_v24, %v3561_v1  ;;  %v2299_v13 = vperm.slane %v5115_v57, 0 }
 0x2f3   :  { %1562 = vmatmul.bf16.gmra.mxu0 %v3562_v34 }
 0x2f4   :  { %v1912_v15 = vpop.f32.mrf.mxu2  ;;  %4037 = vmatmul.msk.bf16.gmra.mxu3 %vm1194_vm2, %v3798_v21  ;;  %v4213_v21 = vld [vmem:[%s6511_s3 + $0x194] sm:$0xf] }
 0x2f5   :  { %v1913_v28 = vadd.f32 %v1912_v15, %v1513_v51  ;;  %v5101_v51 = vpop.f32.mrf.mxu1 }
 0x2f7   :  { %v2293_v42 = vmul.f32 %v2290_v37, %v1913_v28 }
 0x2f8   :  { %1707 = vmatmul.bf16.gmra.mxu1 %v3794_v49 }
 0x2f9   :  { %v2297_v0 = vadd.f32 %v2293_v42, %v2288_v8  ;;  %v1525_v61 = vpop.f32.mrf.mxu0  ;;  %v3563_v42 = vld [vmem:[%s6511_s3 + $0x198] sm:$0xf0] }
 0x2fc   :  { %v1914_v8 = vpop.f32.mrf.mxu2 }
 0x2fd   :  { %v1915_v20 = vadd.f32 %v1914_v8, %v1515_v17  ;;  %v5110_v27 = vpop.f32.mrf.mxu1  ;;  %v3569_v17 = vld [vmem:[%s6511_s3 + $0x1a0] sm:$0xf]  ;;  %v3566_v8 = vor.u32 %v4213_v21, %v3563_v42  ;;  %v4215_v21 = vld [vmem:[%s6511_s3 + $0x1a4] sm:$0xf] }
 0x2ff   :  { %v2294_v23 = vmul.f32 %v2290_v37, %v1915_v20  ;;  %v4273_v37 = vld [vmem:[%s6511_s3 + $0x374] sm:$0xf] }
 0x300   :  { %v3806_v28 = vor.u32 %v4273_v37, %v3803_v40 }
 0x301   :  { %v2298_v50 = vadd.f32 %v2294_v23, %v2289_v29  ;;  %4007 = vmatmul.msk.bf16.gmra.mxu2 %vm1194_vm2, %v3558_v39  ;;  %v5118_v15 = vpop.f32.mrf.mxu0  ;;  %v4216_v29 = vld [vmem:[%s6511_s3 + $0x1a4] sm:$0xf0] }
 0x302   :  { %v3570_v24 = vor.u32 %v4216_v29, %v3569_v17  ;;  %v3577_v29 = vld [vmem:[%s6511_s3 + $0x1b0] sm:$0xf] }
 0x304   :  { %v1917_v47 = vpop.f32.mrf.mxu2  ;;  %1567 = vmatmul.bf16.gmra.mxu0 %v3570_v24  ;;  %4038 = vmatmul.msk.bf16.gmra.mxu3 %vm1194_vm2, %v3806_v28  ;;  %v3811_v24 = vld [vmem:[%s6511_s3 + $0x388] sm:$0xf0] }
 0x305   :  { %v1918_v1 = vadd.f32 %v1917_v47, %v1518_v11  ;;  %v5139_v11 = vpop.f32.mrf.mxu1 }
 0x306   :  { %6542 = vst [vmem:[#allocation4_spill] sm:$0xff] %v5139_v11 }
 0x307   :  { %v2300_v34 = vmul.f32 %v2299_v13, %v1918_v1 }
 0x308   :  { %1712 = vmatmul.bf16.gmra.mxu1 %v3802_v5 }
 0x309   :  { %v2304_v14 = vadd.f32 %v2300_v34, %v2295_v52  ;;  %v5147_v43 = vpop.f32.mrf.mxu0 }
 0x30c   :  { %v1919_v52 = vpop.f32.mrf.mxu2 }
 0x30d   :  { %v1920_v49 = vadd.f32 %v1919_v52, %v1520_v55  ;;  %v5152_v23 = vpop.f32.mrf.mxu1  ;;  %v4218_v55 = vld [vmem:[%s6511_s3 + $0x1b4] sm:$0xf0] }
 0x30e   :  { %6543 = vst [vmem:[#allocation5_spill] sm:$0xff] %v5152_v23  ;;  %v3578_v1 = vor.u32 %v4218_v55, %v3577_v29 }
 0x30f   :  { %v2301_v20 = vmul.f32 %v2299_v13, %v1920_v49 }
 0x311   :  { %v5149_v39 = vadd.f32 %v2301_v20, %v2296_v53  ;;  %4008 = vmatmul.msk.bf16.gmra.mxu2 %vm1194_vm2, %v3566_v8  ;;  %v5154_v17 = vpop.f32.mrf.mxu0  ;;  %v4275_v53 = vld [vmem:[%s6511_s3 + $0x384] sm:$0xf] }
 0x312   :  { %v3814_v40 = vor.u32 %v4275_v53, %v3811_v24 }
 0x313   :  { %v2077_v5 = vpop.f32.mrf.mxu3 }
 0x314   :  { %v1922_v47 = vpop.f32.mrf.mxu2  ;;  %1572 = vmatmul.bf16.gmra.mxu0 %v3578_v1  ;;  %4039 = vmatmul.msk.bf16.gmra.mxu3 %vm1194_vm2, %v3814_v40 }
 0x315   :  { %v1923_v37 = vadd.f32 %v1922_v47, %v1523_v46  ;;  %v3571_v46 = vld [vmem:[%s6511_s3 + $0x1a8] sm:$0xf0]  ;;  %v1678_v42 = vpop.f32.mrf.mxu1 }
 0x316   :  { %v5183_v49 = vadd.f32 %v2077_v5, %v1678_v42  ;;  %v3574_v47 = vor.u32 %v4215_v21, %v3571_v46  ;;  %v3819_v42 = vld [vmem:[%s6511_s3 + $0x398] sm:$0xf0] }
 0x317   :  { %v2302_v28 = vmul.f32 %v2299_v13, %v1923_v37  ;;  %v2308_v37 = vperm.slane %v5115_v57, 1 }
 0x319   :  { %v5169_v34 = vadd.f32 %v2302_v28, %v2297_v0  ;;  %v3810_v0 = vor.u32 %v4276_v9, %v3809_v3  ;;  %v5185_v8 = vpop.f32.mrf.mxu0 }
 0x31b   :  { %1717 = vmatmul.bf16.gmra.mxu1 %v3810_v0  ;;  %v2079_v1 = vpop.f32.mrf.mxu3  ;;  %v4217_v0 = vld [vmem:[%s6511_s3 + $0x1b4] sm:$0xf] }
 0x31c   :  { %v1924_v52 = vpop.f32.mrf.mxu2 }
 0x31d   :  { %v1925_v20 = vadd.f32 %v1924_v52, %v1525_v61  ;;  %v1680_v53 = vpop.f32.mrf.mxu1  ;;  %v3585_v61 = vld [vmem:[%s6511_s3 + $0x1c0] sm:$0xf] }
 0x31e   :  { %v5191_v40 = vadd.f32 %v2079_v1, %v1680_v53 }
 0x31f   :  { %v2303_v29 = vmul.f32 %v2299_v13, %v1925_v20  ;;  %v4277_v13 = vld [vmem:[%s6511_s3 + $0x394] sm:$0xf]  ;;  %v3817_v20 = vld [vmem:[%s6511_s3 + $0x390] sm:$0xf] }
 0x320   :  { %v3822_v3 = vor.u32 %v4277_v13, %v3819_v42 }
 0x321   :  { %v5187_v55 = vadd.f32 %v2303_v29, %v2298_v50  ;;  %4009 = vmatmul.msk.bf16.gmra.mxu2 %vm1194_vm2, %v3574_v47  ;;  %v5193_v28 = vpop.f32.mrf.mxu0  ;;  %v4220_v50 = vld [vmem:[%s6511_s3 + $0x1c4] sm:$0xf0]  ;;  %v4278_v47 = vld [vmem:[%s6511_s3 + $0x394] sm:$0xf0] }
 0x322   :  { %v3586_v46 = vor.u32 %v4220_v50, %v3585_v61 }
 0x324   :  { %v1927_v24 = vpop.f32.mrf.mxu2  ;;  %1577 = vmatmul.bf16.gmra.mxu0 %v3586_v46  ;;  %4040 = vmatmul.msk.bf16.gmra.mxu3 %vm1194_vm2, %v3822_v3 }
 0x325   :  { %v1928_v21 = vadd.f32 %v1927_v24, %v5118_v15  ;;  %v3579_v15 = vld [vmem:[%s6511_s3 + $0x1b8] sm:$0xf0]  ;;  %v1683_v52 = vpop.f32.mrf.mxu1 }
 0x326   :  { %v3582_v50 = vor.u32 %v4217_v0, %v3579_v15 }
 0x327   :  { %v2309_v9 = vmul.f32 %v2308_v37, %v1928_v21  ;;  %v2082_v29 = vpop.f32.mrf.mxu3 }
 0x328   :  { %v5223_v1 = vadd.f32 %v2082_v29, %v1683_v52  ;;  %v3593_v52 = vld [vmem:[%s6511_s3 + $0x1d0] sm:$0xf] }
 0x329   :  { %v5209_v5 = vadd.f32 %v2309_v9, %v2304_v14  ;;  %v3818_v14 = vor.u32 %v4278_v47, %v3817_v20  ;;  %v5225_v24 = vpop.f32.mrf.mxu0  ;;  %v3827_v47 = vld [vmem:[%s6511_s3 + $0x3a8] sm:$0xf0] }
 0x32b   :  { %1722 = vmatmul.bf16.gmra.mxu1 %v3818_v14 }
 0x32c   :  { %v1929_v53 = vpop.f32.mrf.mxu2 }
 0x32d   :  { %v1930_v61 = vadd.f32 %v1929_v53, %v5147_v43  ;;  %v1685_v46 = vpop.f32.mrf.mxu1  ;;  %v4222_v43 = vld [vmem:[%s6511_s3 + $0x1d4] sm:$0xf0] }
 0x32e   :  { %v3594_v15 = vor.u32 %v4222_v43, %v3593_v52 }
 0x32f   :  { %v2310_v13 = vmul.f32 %v2308_v37, %v1930_v61  ;;  %v2084_v42 = vpop.f32.mrf.mxu3  ;;  %v4219_v61 = vld [vmem:[%s6511_s3 + $0x1c4] sm:$0xf] }
 0x330   :  { %v5232_v9 = vadd.f32 %v2084_v42, %v1685_v46  ;;  %v4280_v46 = vld [vmem:[%s6511_s3 + $0x3a4] sm:$0xf0] }
 0x331   :  { %v5229_v21 = vadd.f32 %v2310_v13, %v5149_v39  ;;  %4010 = vmatmul.msk.bf16.gmra.mxu2 %vm1194_vm2, %v3582_v50  ;;  %v5234_v20 = vpop.f32.mrf.mxu0  ;;  %v4279_v39 = vld [vmem:[%s6511_s3 + $0x3a4] sm:$0xf]  ;;  %v3825_v13 = vld [vmem:[%s6511_s3 + $0x3a0] sm:$0xf] }
 0x332   :  { %6544 = vst [vmem:[#allocation6_spill] sm:$0xff] %v5232_v9  ;;  %v3830_v29 = vor.u32 %v4279_v39, %v3827_v47 }
 0x334   :  { %v1932_v3 = vpop.f32.mrf.mxu2  ;;  %1582 = vmatmul.bf16.gmra.mxu0 %v3594_v15  ;;  %4041 = vmatmul.msk.bf16.gmra.mxu3 %vm1194_vm2, %v3830_v29 }
 0x335   :  { %v1933_v0 = vadd.f32 %v1932_v3, %v5154_v17  ;;  %v3587_v17 = vld [vmem:[%s6511_s3 + $0x1c8] sm:$0xf0]  ;;  %v1688_v50 = vpop.f32.mrf.mxu1  ;;  %v3826_v3 = vor.u32 %v4280_v46, %v3825_v13 }
 0x337   :  { %v2311_v14 = vmul.f32 %v2308_v37, %v1933_v0  ;;  %v2087_v42 = vpop.f32.mrf.mxu3  ;;  %v3590_v0 = vor.u32 %v4219_v61, %v3587_v17 }
 0x338   :  { %v5263_v52 = vadd.f32 %v2087_v42, %v1688_v50 }
 0x339   :  { %v2315_v53 = vadd.f32 %v2311_v14, %v5169_v34  ;;  %v1545_v43 = vpop.f32.mrf.mxu0  ;;  %v2317_v14 = vperm.slane %v5115_v57, 2 }
 0x33b   :  { %1727 = vmatmul.bf16.gmra.mxu1 %v3826_v3  ;;  %v4221_v3 = vld [vmem:[%s6511_s3 + $0x1d4] sm:$0xf] }
 0x33c   :  { %v1934_v34 = vpop.f32.mrf.mxu2 }
 0x33d   :  { %v1935_v39 = vadd.f32 %v1934_v34, %v5185_v8  ;;  %v1690_v29 = vpop.f32.mrf.mxu1  ;;  %v3601_v8 = vld [vmem:[%s6511_s3 + $0x1e0] sm:$0xf]  ;;  %v3833_v34 = vld [vmem:[%s6511_s3 + $0x3b0] sm:$0xf] }
 0x33f   :  { %v2312_v15 = vmul.f32 %v2308_v37, %v1935_v39  ;;  %v2089_v23 = vpop.f32.mrf.mxu3  ;;  %v4224_v37 = vld [vmem:[%s6511_s3 + $0x1e4] sm:$0xf0]  ;;  %v4282_v39 = vld [vmem:[%s6511_s3 + $0x3b4] sm:$0xf0] }
 0x340   :  { %v5269_v11 = vadd.f32 %v2089_v23, %v1690_v29  ;;  %v3602_v17 = vor.u32 %v4224_v37, %v3601_v8  ;;  %v3835_v23 = vld [vmem:[%s6511_s3 + $0x3b8] sm:$0xf0] }
 0x341   :  { %v2316_v47 = vadd.f32 %v2312_v15, %v5187_v55  ;;  %4011 = vmatmul.msk.bf16.gmra.mxu2 %vm1194_vm2, %v3590_v0  ;;  %v5271_v13 = vpop.f32.mrf.mxu0  ;;  %v4281_v55 = vld [vmem:[%s6511_s3 + $0x3b4] sm:$0xf]  ;;  %v3834_v15 = vor.u32 %v4282_v39, %v3833_v34  ;;  %v4223_v39 = vld [vmem:[%s6511_s3 + $0x1e4] sm:$0xf] }
 0x342   :  { %6545 = vst [vmem:[#allocation7_spill] sm:$0xff] %v5269_v11  ;;  %v3838_v50 = vor.u32 %v4281_v55, %v3835_v23 }
 0x344   :  { %v1937_v62 = vpop.f32.mrf.mxu2  ;;  %1587 = vmatmul.bf16.gmra.mxu0 %v3602_v17  ;;  %4042 = vmatmul.msk.bf16.gmra.mxu3 %vm1194_vm2, %v3838_v50 }
 0x345   :  { %v1938_v61 = vadd.f32 %v1937_v62, %v5193_v28  ;;  %v3595_v62 = vld [vmem:[%s6511_s3 + $0x1d8] sm:$0xf0]  ;;  %v1693_v28 = vpop.f32.mrf.mxu1 }
 0x346   :  { %v3598_v55 = vor.u32 %v4221_v3, %v3595_v62 }
 0x347   :  { %v2318_v46 = vmul.f32 %v2317_v14, %v1938_v61  ;;  %v2092_v0 = vpop.f32.mrf.mxu3 }
 0x348   :  { %v5300_v29 = vadd.f32 %v2092_v0, %v1693_v28  ;;  %v4283_v28 = vld [vmem:[%s6511_s3 + $0x3c4] sm:$0xf]  ;;  %v3603_v0 = vld [vmem:[%s6511_s3 + $0x1e8] sm:$0xf0] }
 0x349   :  { %v2322_v42 = vadd.f32 %v2318_v46, %v5209_v5  ;;  %v1550_v8 = vpop.f32.mrf.mxu0 }
 0x34a   :  { %6546 = vst [vmem:[#allocation8_spill] sm:$0xff] %v5300_v29 }
 0x34b   :  { %1732 = vmatmul.bf16.gmra.mxu1 %v3834_v15 }
 0x34c   :  { %v1939_v5 = vpop.f32.mrf.mxu2 }
 0x34d   :  { %v1940_v37 = vadd.f32 %v1939_v5, %v5225_v24  ;;  %v1695_v23 = vpop.f32.mrf.mxu1  ;;  %v3843_v24 = vld [vmem:[%s6511_s3 + $0x3c8] sm:$0xf0]  ;;  %v3841_v5 = vld [vmem:[%s6511_s3 + $0x3c0] sm:$0xf] }
 0x34e   :  { %v3846_v62 = vor.u32 %v4283_v28, %v3843_v24 }
 0x34f   :  { %v2319_v61 = vmul.f32 %v2317_v14, %v1940_v37  ;;  %v2094_v50 = vpop.f32.mrf.mxu3 }
 0x350   :  { %v5305_v41 = vadd.f32 %v2094_v50, %v1695_v23  ;;  %v3606_v50 = vor.u32 %v4223_v39, %v3603_v0 }
 0x351   :  { %v2323_v17 = vadd.f32 %v2319_v61, %v5229_v21  ;;  %4012 = vmatmul.msk.bf16.gmra.mxu2 %vm1194_vm2, %v3598_v55  ;;  %v1553_v11 = vpop.f32.mrf.mxu0 }
 0x352   :  { %6547 = vst [vmem:[#allocation9_spill] sm:$0xff] %v5305_v41 }
 0x354   :  { %v1942_v46 = vpop.f32.mrf.mxu2  ;;  %4043 = vmatmul.msk.bf16.gmra.mxu3 %vm1194_vm2, %v3846_v62  ;;  %v2326_v62 = vperm.slane %v5115_v57, 3 }
 0x355   :  { %v1943_v3 = vadd.f32 %v1942_v46, %v5234_v20  ;;  %v1698_v15 = vpop.f32.mrf.mxu1  ;;  %v4284_v20 = vld [vmem:[%s6511_s3 + $0x3c4] sm:$0xf0] }
 0x356   :  { %v3842_v55 = vor.u32 %v4284_v20, %v3841_v5  ;;  %v4225_v20 = vld [vmem:[%s6511_s3 + $0x1f4] sm:$0xf] }
 0x357   :  { %v2320_v21 = vmul.f32 %v2317_v14, %v1943_v3  ;;  %v2097_v37 = vpop.f32.mrf.mxu3 }
 0x358   :  { %v5327_v61 = vadd.f32 %v2097_v37, %v1698_v15  ;;  %v4285_v15 = vld [vmem:[%s6511_s3 + $0x3d4] sm:$0xf]  ;;  %v3611_v37 = vld [vmem:[%s6511_s3 + $0x1f8] sm:$0xf0] }
 0x359   :  { %v2324_v34 = vadd.f32 %v2320_v21, %v2315_v53  ;;  %v1555_v46 = vpop.f32.mrf.mxu0 }
 0x35b   :  { %1737 = vmatmul.bf16.gmra.mxu1 %v3842_v55 }
 0x35c   :  { %v1944_v53 = vpop.f32.mrf.mxu2 }
 0x35d   :  { %v1945_v23 = vadd.f32 %v1944_v53, %v1545_v43  ;;  %v1700_v3 = vpop.f32.mrf.mxu1  ;;  %v3851_v43 = vld [vmem:[%s6511_s3 + $0x3d8] sm:$0xf0]  ;;  %v3849_v53 = vld [vmem:[%s6511_s3 + $0x3d0] sm:$0xf] }
 0x35f   :  { %v2321_v28 = vmul.f32 %v2317_v14, %v1945_v23  ;;  %v2099_v21 = vpop.f32.mrf.mxu3 }
 0x360   :  { %v5331_v29 = vadd.f32 %v2099_v21, %v1700_v3  ;;  %v3614_v3 = vor.u32 %v4225_v20, %v3611_v37 }
 0x361   :  { %v2325_v24 = vadd.f32 %v2321_v28, %v2316_v47  ;;  %4013 = vmatmul.msk.bf16.gmra.mxu2 %vm1194_vm2, %v3606_v50  ;;  %v3854_v47 = vor.u32 %v4285_v15, %v3851_v43  ;;  %v1558_v0 = vpop.f32.mrf.mxu0 }
 0x362   :  { %6548 = vst [vmem:[#allocation10_spill] sm:$0xff] %v5331_v29 }
 0x364   :  { %v1947_v41 = vpop.f32.mrf.mxu2  ;;  %4044 = vmatmul.msk.bf16.gmra.mxu3 %vm1194_vm2, %v3854_v47 }
 0x365   :  { %v1948_v14 = vadd.f32 %v1947_v41, %v5271_v13  ;;  %v1703_v55 = vpop.f32.mrf.mxu1  ;;  %v4286_v41 = vld [vmem:[%s6511_s3 + $0x3d4] sm:$0xf0] }
 0x366   :  { %v3850_v23 = vor.u32 %v4286_v41, %v3849_v53  ;;  %v4287_v53 = vld [vmem:[%s6511_s3 + $0x3e4] sm:$0xf] }
 0x367   :  { %v2327_v39 = vmul.f32 %v2326_v62, %v1948_v14  ;;  %v2102_v13 = vpop.f32.mrf.mxu3  ;;  %v4227_v41 = vld [vmem:[%s6511_s3 + $0x204] sm:$0xf] }
 0x368   :  { %v5353_v50 = vadd.f32 %v2102_v13, %v1703_v55  ;;  %v3619_v13 = vld [vmem:[%s6511_s3 + $0x208] sm:$0xf0] }
 0x369   :  { %v2331_v5 = vadd.f32 %v2327_v39, %v2322_v42  ;;  %v1560_v43 = vpop.f32.mrf.mxu0 }
 0x36a   :  { %6549 = vst [vmem:[#allocation11_spill] sm:$0xff] %v5353_v50 }
 0x36b   :  { %1742 = vmatmul.bf16.gmra.mxu1 %v3850_v23 }
 0x36c   :  { %v1949_v42 = vpop.f32.mrf.mxu2 }
 0x36d   :  { %v1950_v28 = vadd.f32 %v1949_v42, %v1550_v8  ;;  %v1705_v14 = vpop.f32.mrf.mxu1  ;;  %v3859_v8 = vld [vmem:[%s6511_s3 + $0x3e8] sm:$0xf0]  ;;  %v3857_v42 = vld [vmem:[%s6511_s3 + $0x3e0] sm:$0xf] }
 0x36e   :  { %v3862_v37 = vor.u32 %v4287_v53, %v3859_v8 }
 0x36f   :  { %v2328_v21 = vmul.f32 %v2326_v62, %v1950_v28  ;;  %v2104_v47 = vpop.f32.mrf.mxu3 }
 0x370   :  { %v5356_v29 = vadd.f32 %v2104_v47, %v1705_v14 }
 0x371   :  { %v2332_v15 = vadd.f32 %v2328_v21, %v2323_v17  ;;  %4014 = vmatmul.msk.bf16.gmra.mxu2 %vm1194_vm2, %v3614_v3  ;;  %v1563_v21 = vpop.f32.mrf.mxu0 }
 0x372   :  { %6550 = vst [vmem:[#allocation12_spill] sm:$0xff] %v5356_v29 }
 0x374   :  { %v1952_v39 = vpop.f32.mrf.mxu2  ;;  %4045 = vmatmul.msk.bf16.gmra.mxu3 %vm1194_vm2, %v3862_v37  ;;  %v2335_v37 = vperm.slane %v5115_v57, 4 }
 0x375   :  { %v1953_v20 = vadd.f32 %v1952_v39, %v1553_v11  ;;  %v1708_v23 = vpop.f32.mrf.mxu1  ;;  %v4288_v11 = vld [vmem:[%s6511_s3 + $0x3e4] sm:$0xf0]  ;;  %v3622_v39 = vor.u32 %v4227_v41, %v3619_v13 }
 0x376   :  { %v3858_v3 = vor.u32 %v4288_v11, %v3857_v42  ;;  %v4289_v42 = vld [vmem:[%s6511_s3 + $0x3f4] sm:$0xf] }
 0x377   :  { %v2329_v55 = vmul.f32 %v2326_v62, %v1953_v20  ;;  %v2107_v28 = vpop.f32.mrf.mxu3  ;;  %v4229_v11 = vld [vmem:[%s6511_s3 + $0x214] sm:$0xf] }
 0x378   :  { %v5377_v14 = vadd.f32 %v2107_v28, %v1708_v23  ;;  %v3627_v28 = vld [vmem:[%s6511_s3 + $0x218] sm:$0xf0] }
 0x379   :  { %v2333_v17 = vadd.f32 %v2329_v55, %v2324_v34 }
 0x37b   :  { %1747 = vmatmul.bf16.gmra.mxu1 %v3858_v3 }
 0x37c   :  { %v1954_v34 = vpop.f32.mrf.mxu2 }
 0x37d   :  { %v1955_v47 = vadd.f32 %v1954_v34, %v1555_v46  ;;  %v1710_v20 = vpop.f32.mrf.mxu1  ;;  %v3867_v46 = vld [vmem:[%s6511_s3 + $0x3f8] sm:$0xf0]  ;;  %v3865_v34 = vld [vmem:[%s6511_s3 + $0x3f0] sm:$0xf] }
 0x37f   :  { %v2330_v53 = vmul.f32 %v2326_v62, %v1955_v47  ;;  %v2109_v55 = vpop.f32.mrf.mxu3  ;;  %v3870_v62 = vor.u32 %v4289_v42, %v3867_v46 }
 0x380   :  { %v5381_v50 = vadd.f32 %v2109_v55, %v1710_v20  ;;  %v3630_v20 = vor.u32 %v4229_v11, %v3627_v28 }
 0x381   :  { %v2334_v8 = vadd.f32 %v2330_v53, %v2325_v24  ;;  %4015 = vmatmul.msk.bf16.gmra.mxu2 %vm1194_vm2, %v3622_v39  ;;  %v1565_v24 = vpop.f32.mrf.mxu0 }
 0x382   :  { %6551 = vst [vmem:[#allocation13_spill] sm:$0xff] %v5381_v50 }
 0x384   :  { %v1957_v29 = vpop.f32.mrf.mxu2  ;;  %4046 = vmatmul.msk.bf16.gmra.mxu3 %vm1194_vm2, %v3870_v62 }
 0x385   :  { %v1958_v41 = vadd.f32 %v1957_v29, %v1558_v0  ;;  %v1713_v3 = vpop.f32.mrf.mxu1  ;;  %v4290_v29 = vld [vmem:[%s6511_s3 + $0x3f4] sm:$0xf0] }
 0x386   :  { %v3866_v47 = vor.u32 %v4290_v29, %v3865_v34  ;;  %v4291_v34 = vld [vmem:[%s6511_s3 + $0x404] sm:$0xf] }
 0x387   :  { %v2336_v13 = vmul.f32 %v2335_v37, %v1958_v41  ;;  %v2112_v0 = vpop.f32.mrf.mxu3  ;;  %v4231_v29 = vld [vmem:[%s6511_s3 + $0x224] sm:$0xf] }
 0x388   :  { %v5402_v39 = vadd.f32 %v2112_v0, %v1713_v3  ;;  %v3635_v0 = vld [vmem:[%s6511_s3 + $0x228] sm:$0xf0] }
 0x389   :  { %v2340_v23 = vadd.f32 %v2336_v13, %v2331_v5  ;;  %v1568_v42 = vpop.f32.mrf.mxu0 }
 0x38a   :  { %6552 = vst [vmem:[#allocation14_spill] sm:$0xff] %v5402_v39 }
 0x38b   :  { %1752 = vmatmul.bf16.gmra.mxu1 %v3866_v47 }
 0x38c   :  { %v1959_v5 = vpop.f32.mrf.mxu2 }
 0x38d   :  { %v1960_v53 = vadd.f32 %v1959_v5, %v1560_v43  ;;  %v1715_v41 = vpop.f32.mrf.mxu1  ;;  %v3875_v43 = vld [vmem:[%s6511_s3 + $0x408] sm:$0xf0] }
 0x38e   :  { %v3878_v28 = vor.u32 %v4291_v34, %v3875_v43 }
 0x38f   :  { %v2337_v55 = vmul.f32 %v2335_v37, %v1960_v53  ;;  %v2114_v62 = vpop.f32.mrf.mxu3  ;;  %v3873_v53 = vld [vmem:[%s6511_s3 + $0x400] sm:$0xf] }
 0x390   :  { %v5405_v50 = vadd.f32 %v2114_v62, %v1715_v41 }
 0x391   :  { %v2341_v46 = vadd.f32 %v2337_v55, %v2332_v15  ;;  %4016 = vmatmul.msk.bf16.gmra.mxu2 %vm1194_vm2, %v3630_v20  ;;  %v1570_v47 = vpop.f32.mrf.mxu0 }
 0x392   :  { %6553 = vst [vmem:[#allocation15_spill] sm:$0xff] %v5405_v50 }
 0x394   :  { %v1962_v13 = vpop.f32.mrf.mxu2  ;;  %4047 = vmatmul.msk.bf16.gmra.mxu3 %vm1194_vm2, %v3878_v28  ;;  %v2344_v28 = vperm.slane %v5115_v57, 5 }
 0x395   :  { %v1963_v11 = vadd.f32 %v1962_v13, %v1563_v21  ;;  %v4292_v21 = vld [vmem:[%s6511_s3 + $0x404] sm:$0xf0]  ;;  %v3638_v13 = vor.u32 %v4231_v29, %v3635_v0 }
 0x397   :  { %v2338_v3 = vmul.f32 %v2335_v37, %v1963_v11  ;;  %v2117_v20 = vpop.f32.mrf.mxu3 }
 0x398   :  { %v1718_v5 = vpop.f32.mrf.mxu1 }
 0x399   :  { %v2342_v15 = vadd.f32 %v2338_v3, %v2333_v17  ;;  %v3874_v17 = vor.u32 %v4292_v21, %v3873_v53  ;;  %v5426_v41 = vadd.f32 %v2117_v20, %v1718_v5  ;;  %v1573_v39 = vpop.f32.mrf.mxu0  ;;  %v4293_v5 = vld [vmem:[%s6511_s3 + $0x414] sm:$0xf]  ;;  %v3643_v21 = vld [vmem:[%s6511_s3 + $0x238] sm:$0xf0] }
 0x39a   :  { %v4233_v53 = vld [vmem:[%s6511_s3 + $0x234] sm:$0xf] }
 0x39b   :  { %1757 = vmatmul.bf16.gmra.mxu1 %v3874_v17  ;;  %v3881_v17 = vld [vmem:[%s6511_s3 + $0x410] sm:$0xf] }
 0x39c   :  { %v1964_v55 = vpop.f32.mrf.mxu2 }
 0x39d   :  { %v1965_v62 = vadd.f32 %v1964_v55, %v1565_v24  ;;  %v3883_v24 = vld [vmem:[%s6511_s3 + $0x418] sm:$0xf0] }
 0x39f   :  { %v2339_v34 = vmul.f32 %v2335_v37, %v1965_v62  ;;  %v2119_v3 = vpop.f32.mrf.mxu3 }
 0x3a0   :  { %v1720_v11 = vpop.f32.mrf.mxu1 }
 0x3a1   :  { %v2343_v43 = vadd.f32 %v2339_v34, %v2334_v8  ;;  %4017 = vmatmul.msk.bf16.gmra.mxu2 %vm1194_vm2, %v3638_v13  ;;  %v5430_v9 = vadd.f32 %v2119_v3, %v1720_v11  ;;  %v3886_v8 = vor.u32 %v4293_v5, %v3883_v24  ;;  %v3646_v34 = vor.u32 %v4233_v53, %v3643_v21  ;;  %v1575_v11 = vpop.f32.mrf.mxu0 }
 0x3a3   :  { %6554 = vst [vmem:[#allocation16_spill] sm:$0xff] %v5430_v9 }
 0x3a4   :  { %v1967_v50 = vpop.f32.mrf.mxu2  ;;  %4048 = vmatmul.msk.bf16.gmra.mxu3 %vm1194_vm2, %v3886_v8 }
 0x3a5   :  { %v1968_v37 = vadd.f32 %v1967_v50, %v1568_v42  ;;  %v4294_v50 = vld [vmem:[%s6511_s3 + $0x414] sm:$0xf0] }
 0x3a6   :  { %v3882_v55 = vor.u32 %v4294_v50, %v3881_v17  ;;  %v4295_v17 = vld [vmem:[%s6511_s3 + $0x424] sm:$0xf] }
 0x3a7   :  { %v2345_v29 = vmul.f32 %v2344_v28, %v1968_v37  ;;  %v2122_v42 = vpop.f32.mrf.mxu3 }
 0x3a8   :  { %v1723_v20 = vpop.f32.mrf.mxu1 }
 0x3a9   :  { %v2349_v0 = vadd.f32 %v2345_v29, %v2340_v23  ;;  %v5451_v62 = vadd.f32 %v2122_v42, %v1723_v20  ;;  %v1578_v50 = vpop.f32.mrf.mxu0  ;;  %v4235_v42 = vld [vmem:[%s6511_s3 + $0x244] sm:$0xf] }
 0x3ab   :  { %6555 = vst [vmem:[#allocation17_spill] sm:$0xff] %v5451_v62  ;;  %1762 = vmatmul.bf16.gmra.mxu1 %v3882_v55  ;;  %v3651_v55 = vld [vmem:[%s6511_s3 + $0x248] sm:$0xf0] }
 0x3ac   :  { %v1969_v23 = vpop.f32.mrf.mxu2 }
 0x3ad   :  { %v1970_v13 = vadd.f32 %v1969_v23, %v1570_v47  ;;  %v3891_v47 = vld [vmem:[%s6511_s3 + $0x428] sm:$0xf0] }
 0x3ae   :  { %v3894_v21 = vor.u32 %v4295_v17, %v3891_v47 }
 0x3af   :  { %v2346_v3 = vmul.f32 %v2344_v28, %v1970_v13  ;;  %v2124_v37 = vpop.f32.mrf.mxu3  ;;  %v3889_v13 = vld [vmem:[%s6511_s3 + $0x420] sm:$0xf] }
 0x3b0   :  { %v1725_v24 = vpop.f32.mrf.mxu1 }
 0x3b1   :  { %v2350_v5 = vadd.f32 %v2346_v3, %v2341_v46  ;;  %4018 = vmatmul.msk.bf16.gmra.mxu2 %vm1194_vm2, %v3646_v34  ;;  %v5454_v29 = vadd.f32 %v2124_v37, %v1725_v24 }
 0x3b3   :  { %6556 = vst [vmem:[#allocation18_spill] sm:$0xff] %v5454_v29 }
 0x3b4   :  { %v1972_v8 = vpop.f32.mrf.mxu2  ;;  %4049 = vmatmul.msk.bf16.gmra.mxu3 %vm1194_vm2, %v3894_v21 }
 0x3b5   :  { %v1973_v53 = vadd.f32 %v1972_v8, %v1573_v39  ;;  %v4296_v39 = vld [vmem:[%s6511_s3 + $0x424] sm:$0xf0]  ;;  %v3654_v8 = vor.u32 %v4235_v42, %v3651_v55 }
 0x3b6   :  { %v3890_v3 = vor.u32 %v4296_v39, %v3889_v13  ;;  %v4237_v13 = vld [vmem:[%s6511_s3 + $0x254] sm:$0xf] }
 0x3b7   :  { %v2347_v20 = vmul.f32 %v2344_v28, %v1973_v53  ;;  %v2127_v34 = vpop.f32.mrf.mxu3  ;;  %v1580_v53 = vpop.f32.mrf.mxu0 }
 0x3b8   :  { %v1728_v23 = vpop.f32.mrf.mxu1 }
 0x3b9   :  { %v2351_v46 = vadd.f32 %v2347_v20, %v2342_v15  ;;  %v5475_v24 = vadd.f32 %v2127_v34, %v1728_v23  ;;  %v2353_v20 = vperm.slane %v5115_v57, 6  ;;  %v4297_v23 = vld [vmem:[%s6511_s3 + $0x434] sm:$0xf]  ;;  %v3897_v34 = vld [vmem:[%s6511_s3 + $0x430] sm:$0xf] }
 0x3bb   :  { %1767 = vmatmul.bf16.gmra.mxu1 %v3890_v3 }
 0x3bc   :  { %v1974_v15 = vpop.f32.mrf.mxu2 }
 0x3bd   :  { %v1975_v37 = vadd.f32 %v1974_v15, %v1575_v11  ;;  %v3899_v11 = vld [vmem:[%s6511_s3 + $0x438] sm:$0xf0] }
 0x3bf   :  { %v2348_v17 = vmul.f32 %v2344_v28, %v1975_v37  ;;  %v2129_v29 = vpop.f32.mrf.mxu3  ;;  %v1583_v15 = vpop.f32.mrf.mxu0 }
 0x3c0   :  { %v1730_v21 = vpop.f32.mrf.mxu1 }
 0x3c1   :  { %v2352_v47 = vadd.f32 %v2348_v17, %v2343_v43  ;;  %4019 = vmatmul.msk.bf16.gmra.mxu2 %vm1194_vm2, %v3654_v8  ;;  %v5479_v9 = vadd.f32 %v2129_v29, %v1730_v21  ;;  %v3902_v43 = vor.u32 %v4297_v23, %v3899_v11  ;;  %v3659_v29 = vld [vmem:[%s6511_s3 + $0x258] sm:$0xf0] }
 0x3c2   :  { %v3662_v17 = vor.u32 %v4237_v13, %v3659_v29 }
 0x3c3   :  { %6557 = vst [vmem:[#allocation19_spill] sm:$0xff] %v5479_v9 }
 0x3c4   :  { %v1977_v62 = vpop.f32.mrf.mxu2  ;;  %4050 = vmatmul.msk.bf16.gmra.mxu3 %vm1194_vm2, %v3902_v43 }
 0x3c5   :  { %v1978_v28 = vadd.f32 %v1977_v62, %v1578_v50  ;;  %v4298_v62 = vld [vmem:[%s6511_s3 + $0x434] sm:$0xf0] }
 0x3c6   :  { %v3898_v3 = vor.u32 %v4298_v62, %v3897_v34  ;;  %v4299_v34 = vld [vmem:[%s6511_s3 + $0x444] sm:$0xf] }
 0x3c7   :  { %v2354_v42 = vmul.f32 %v2353_v20, %v1978_v28  ;;  %v2132_v50 = vpop.f32.mrf.mxu3  ;;  %v1585_v29 = vpop.f32.mrf.mxu0 }
 0x3c8   :  { %v1733_v39 = vpop.f32.mrf.mxu1 }
 0x3c9   :  { %v2358_v55 = vadd.f32 %v2354_v42, %v2349_v0  ;;  %v5500_v37 = vadd.f32 %v2132_v50, %v1733_v39  ;;  %v3907_v39 = vld [vmem:[%s6511_s3 + $0x448] sm:$0xf0]  ;;  %v4239_v50 = vld [vmem:[%s6511_s3 + $0x264] sm:$0xf] }
 0x3ca   :  { %v3910_v13 = vor.u32 %v4299_v34, %v3907_v39 }
 0x3cb   :  { %6558 = vst [vmem:[#allocation20_spill] sm:$0xff] %v5500_v37  ;;  %1772 = vmatmul.bf16.gmra.mxu1 %v3898_v3  ;;  %v3667_v3 = vld [vmem:[%s6511_s3 + $0x268] sm:$0xf0] }
 0x3cc   :  { %v1979_v0 = vpop.f32.mrf.mxu2 }
 0x3cd   :  { %v1980_v8 = vadd.f32 %v1979_v0, %v1580_v53 }
 0x3cf   :  { %v2355_v21 = vmul.f32 %v2353_v20, %v1980_v8  ;;  %v2134_v28 = vpop.f32.mrf.mxu3  ;;  %v3905_v8 = vld [vmem:[%s6511_s3 + $0x440] sm:$0xf]  ;;  %v1588_v39 = vpop.f32.mrf.mxu0 }
 0x3d0   :  { %v1735_v11 = vpop.f32.mrf.mxu1 }
 0x3d1   :  { %v2359_v23 = vadd.f32 %v2355_v21, %v2350_v5  ;;  %4020 = vmatmul.msk.bf16.gmra.mxu2 %vm1194_vm2, %v3662_v17  ;;  %v5503_v42 = vadd.f32 %v2134_v28, %v1735_v11 }
 0x3d3   :  { %6559 = vst [vmem:[#allocation21_spill] sm:$0xff] %v5503_v42 }
 0x3d4   :  { %v1982_v43 = vpop.f32.mrf.mxu2  ;;  %4051 = vmatmul.msk.bf16.gmra.mxu3 %vm1194_vm2, %v3910_v13 }
 0x3d5   :  { %v1983_v53 = vadd.f32 %v1982_v43, %v1583_v15  ;;  %v4300_v15 = vld [vmem:[%s6511_s3 + $0x444] sm:$0xf0]  ;;  %v3670_v43 = vor.u32 %v4239_v50, %v3667_v3 }
 0x3d6   :  { %v3906_v21 = vor.u32 %v4300_v15, %v3905_v8  ;;  %v3675_v8 = vld [vmem:[%s6511_s3 + $0x278] sm:$0xf0] }
 0x3d7   :  { %v2356_v62 = vmul.f32 %v2353_v20, %v1983_v53  ;;  %v2137_v17 = vpop.f32.mrf.mxu3 }
 0x3d8   :  { %v1738_v0 = vpop.f32.mrf.mxu1 }
 0x3d9   :  { %v2360_v5 = vadd.f32 %v2356_v62, %v2351_v46  ;;  %v5524_v11 = vadd.f32 %v2137_v17, %v1738_v0  ;;  %v2362_v62 = vperm.slane %v5115_v57, 7  ;;  %v4301_v0 = vld [vmem:[%s6511_s3 + $0x454] sm:$0xf]  ;;  %v3913_v17 = vld [vmem:[%s6511_s3 + $0x450] sm:$0xf] }
 0x3da   :  { %v4241_v57 = vld [vmem:[%s6511_s3 + $0x274] sm:$0xf] }
 0x3db   :  { %1777 = vmatmul.bf16.gmra.mxu1 %v3906_v21 }
 0x3dc   :  { %v1984_v46 = vpop.f32.mrf.mxu2 }
 0x3dd   :  { %v1985_v28 = vadd.f32 %v1984_v46, %v1585_v29  ;;  %v3915_v29 = vld [vmem:[%s6511_s3 + $0x458] sm:$0xf0] }
 0x3de   :  { %v3918_v50 = vor.u32 %v4301_v0, %v3915_v29 }
 0x3df   :  { %v2357_v34 = vmul.f32 %v2353_v20, %v1985_v28  ;;  %v2139_v42 = vpop.f32.mrf.mxu3 }
 0x3e0   :  { %v1740_v13 = vpop.f32.mrf.mxu1 }
 0x3e1   :  { %v2361_v53 = vadd.f32 %v2357_v34, %v2352_v47  ;;  %4021 = vmatmul.msk.bf16.gmra.mxu2 %vm1194_vm2, %v3670_v43  ;;  %v5528_v9 = vadd.f32 %v2139_v42, %v1740_v13  ;;  %v1590_v42 = vpop.f32.mrf.mxu0  ;;  %v3678_v34 = vor.u32 %v4241_v57, %v3675_v8 }
 0x3e4   :  { %v1987_v37 = vpop.f32.mrf.mxu2  ;;  %4052 = vmatmul.msk.bf16.gmra.mxu3 %vm1194_vm2, %v3918_v50 }
 0x3e5   :  { %v1988_v20 = vadd.f32 %v1987_v37, %v1588_v39  ;;  %v4302_v37 = vld [vmem:[%s6511_s3 + $0x454] sm:$0xf0] }
 0x3e7   :  { %v2363_v47 = vmul.f32 %v2362_v62, %v1988_v20  ;;  %v2142_v21 = vpop.f32.mrf.mxu3 }
 0x3e8   :  { %v1743_v15 = vpop.f32.mrf.mxu1 }
 0x3e9   :  { %v2367_v3 = vadd.f32 %v2363_v47, %v2358_v55  ;;  %v3914_v55 = vor.u32 %v4302_v37, %v3913_v17  ;;  %v5549_v28 = vadd.f32 %v2142_v21, %v1743_v15  ;;  %v4303_v47 = vld [vmem:[%s6511_s3 + $0x464] sm:$0xf]  ;;  %v3923_v15 = vld [vmem:[%s6511_s3 + $0x468] sm:$0xf0] }
 0x3ea   :  { %v4243_v17 = vld [vmem:[%s6511_s3 + $0x284] sm:$0xf]  ;;  %v3683_v37 = vld [vmem:[%s6511_s3 + $0x288] sm:$0xf0] }
 0x3eb   :  { %1782 = vmatmul.bf16.gmra.mxu1 %v3914_v55  ;;  %v3921_v55 = vld [vmem:[%s6511_s3 + $0x460] sm:$0xf] }
 0x3ec   :  { %v1989_v46 = vpop.f32.mrf.mxu2 }
 0x3ed   :  { %v1990_v43 = vadd.f32 %v1989_v46, %v1590_v42  ;;  %v3926_v42 = vor.u32 %v4303_v47, %v3923_v15  ;;  %v5581_v15 = vld [vmem:[%s6509_s0 + $0x10] sm:$0xff] }
 0x3ef   :  { %v2364_v39 = vmul.f32 %v2362_v62, %v1990_v43  ;;  %v2144_v29 = vpop.f32.mrf.mxu3 }
 0x3f0   :  { %v1745_v0 = vpop.f32.mrf.mxu1 }
 0x3f1   :  { %v2368_v13 = vadd.f32 %v2364_v39, %v2359_v23  ;;  %4022 = vmatmul.msk.bf16.gmra.mxu2 %vm1194_vm2, %v3678_v34  ;;  %v5552_v50 = vadd.f32 %v2144_v29, %v1745_v0  ;;  %v3686_v0 = vor.u32 %v4243_v17, %v3683_v37 }
 0x3f3   :  { %6560 = vst [vmem:[#allocation22_spill] sm:$0xff] %v5552_v50 }
 0x3f4   :  { %v1992_v20 = vpop.f32.mrf.mxu2  ;;  %4053 = vmatmul.msk.bf16.gmra.mxu3 %vm1194_vm2, %v3926_v42 }
 0x3f5   :  { %v1993_v57 = vadd.f32 %v1992_v20, %v4693_v4  ;;  %v4304_v4 = vld [vmem:[%s6511_s3 + $0x464] sm:$0xf0] }
 0x3f6   :  { %v3922_v43 = vor.u32 %v4304_v4, %v3921_v55  ;;  %v4245_v4 = vld [vmem:[%s6511_s3 + $0x294] sm:$0xf] }
 0x3f7   :  { %v2365_v8 = vmul.f32 %v2362_v62, %v1993_v57  ;;  %v2147_v46 = vpop.f32.mrf.mxu3  ;;  %v2371_v57 = vperm.slane %v5581_v15, 0 }
 0x3f8   :  { %v1748_v21 = vpop.f32.mrf.mxu1 }
 0x3f9   :  { %v2369_v23 = vadd.f32 %v2365_v8, %v2360_v5  ;;  %v5574_v34 = vadd.f32 %v2147_v46, %v1748_v21  ;;  %v3691_v46 = vld [vmem:[%s6511_s3 + $0x298] sm:$0xf0] }
 0x3fb   :  { %1787 = vmatmul.bf16.gmra.mxu1 %v3922_v43 }
 0x3fc   :  { %v1994_v5 = vpop.f32.mrf.mxu2 }
 0x3fd   :  { %v1995_v39 = vadd.f32 %v1994_v5, %v4706_v16  ;;  %v4305_v16 = vld [vmem:[%s6511_s3 + $0x474] sm:$0xf]  ;;  %v3929_v5 = vld [vmem:[%s6511_s3 + $0x470] sm:$0xf] }
 0x3ff   :  { %v2366_v29 = vmul.f32 %v2362_v62, %v1995_v39  ;;  %v2149_v42 = vpop.f32.mrf.mxu3 }
 0x400   :  { %v1750_v47 = vpop.f32.mrf.mxu1 }
 0x401   :  { %v2370_v20 = vadd.f32 %v2366_v29, %v2361_v53  ;;  %4023 = vmatmul.msk.bf16.gmra.mxu2 %vm1194_vm2, %v3686_v0  ;;  %v5584_v21 = vadd.f32 %v2149_v42, %v1750_v47  ;;  %v3931_v53 = vld [vmem:[%s6511_s3 + $0x478] sm:$0xf0]  ;;  %v3694_v42 = vor.u32 %v4245_v4, %v3691_v46 }
 0x402   :  { %v3934_v17 = vor.u32 %v4305_v16, %v3931_v53 }
 0x404   :  { %v1997_v8 = vpop.f32.mrf.mxu2  ;;  %4054 = vmatmul.msk.bf16.gmra.mxu3 %vm1194_vm2, %v3934_v17 }
 0x405   :  { %v1998_v62 = vadd.f32 %v1997_v8, %v4718_v26  ;;  %v4306_v26 = vld [vmem:[%s6511_s3 + $0x474] sm:$0xf0] }
 0x406   :  { %v3930_v0 = vor.u32 %v4306_v26, %v3929_v5  ;;  %v4307_v5 = vld [vmem:[%s6511_s3 + $0x484] sm:$0xf] }
 0x407   :  { %v2372_v37 = vmul.f32 %v2371_v57, %v1998_v62  ;;  %v2152_v39 = vpop.f32.mrf.mxu3  ;;  %v4247_v26 = vld [vmem:[%s6511_s3 + $0x2a4] sm:$0xf] }
 0x408   :  { %v1753_v43 = vpop.f32.mrf.mxu1 }
 0x409   :  { %v2376_v55 = vadd.f32 %v2372_v37, %v2367_v3  ;;  %v5606_v29 = vadd.f32 %v2152_v39, %v1753_v43  ;;  %v3939_v43 = vld [vmem:[%s6511_s3 + $0x488] sm:$0xf0] }
 0x40a   :  { %v3942_v4 = vor.u32 %v4307_v5, %v3939_v43  ;;  %v3699_v39 = vld [vmem:[%s6511_s3 + $0x2a8] sm:$0xf0] }
 0x40b   :  { %1792 = vmatmul.bf16.gmra.mxu1 %v3930_v0 }
 0x40c   :  { %v1999_v3 = vpop.f32.mrf.mxu2 }
 0x40d   :  { %v2000_v47 = vadd.f32 %v1999_v3, %v4731_v38  ;;  %v3937_v3 = vld [vmem:[%s6511_s3 + $0x480] sm:$0xf] }
 0x40f   :  { %v2373_v8 = vmul.f32 %v2371_v57, %v2000_v47  ;;  %v2154_v62 = vpop.f32.mrf.mxu3 }
 0x410   :  { %v1755_v53 = vpop.f32.mrf.mxu1 }
 0x411   :  { %v2377_v16 = vadd.f32 %v2373_v8, %v2368_v13  ;;  %4024 = vmatmul.msk.bf16.gmra.mxu2 %vm1194_vm2, %v3694_v42  ;;  %v5610_v37 = vadd.f32 %v2154_v62, %v1755_v53  ;;  %v3702_v62 = vor.u32 %v4247_v26, %v3699_v39 }
 0x413   :  { %6561 = vst [vmem:[#allocation23_spill] sm:$0xff] %v5610_v37 }
 0x414   :  { %v2002_v17 = vpop.f32.mrf.mxu2  ;;  %4055 = vmatmul.msk.bf16.gmra.mxu3 %vm1194_vm2, %v3942_v4 }
 0x415   :  { %v2003_v38 = vadd.f32 %v2002_v17, %v4743_v48  ;;  %v4308_v48 = vld [vmem:[%s6511_s3 + $0x484] sm:$0xf0] }
 0x416   :  { %v3938_v42 = vor.u32 %v4308_v48, %v3937_v3  ;;  %v4249_v3 = vld [vmem:[%s6511_s3 + $0x2b4] sm:$0xf]  ;;  %v3707_v48 = vld [vmem:[%s6511_s3 + $0x2b8] sm:$0xf0] }
 0x417   :  { %v2374_v46 = vmul.f32 %v2371_v57, %v2003_v38  ;;  %v2157_v47 = vpop.f32.mrf.mxu3  ;;  %v2380_v38 = vperm.slane %v5581_v15, 1 }
 0x418   :  { %v1758_v0 = vpop.f32.mrf.mxu1 }
 0x419   :  { %v2378_v13 = vadd.f32 %v2374_v46, %v2369_v23  ;;  %v5632_v8 = vadd.f32 %v2157_v47, %v1758_v0  ;;  %v4309_v0 = vld [vmem:[%s6511_s3 + $0x494] sm:$0xf] }
 0x41b   :  { %1797 = vmatmul.bf16.gmra.mxu1 %v3938_v42  ;;  %v3945_v42 = vld [vmem:[%s6511_s3 + $0x490] sm:$0xf] }
 0x41c   :  { %v2004_v23 = vpop.f32.mrf.mxu2 }
 0x41d   :  { %v2005_v53 = vadd.f32 %v2004_v23, %v4755_v59  ;;  %v3947_v59 = vld [vmem:[%s6511_s3 + $0x498] sm:$0xf0] }
 0x41f   :  { %v2375_v17 = vmul.f32 %v2371_v57, %v2005_v53  ;;  %v2159_v4 = vpop.f32.mrf.mxu3 }
 0x420   :  { %v1760_v43 = vpop.f32.mrf.mxu1 }
 0x421   :  { %v2379_v5 = vadd.f32 %v2375_v17, %v2370_v20  ;;  %4025 = vmatmul.msk.bf16.gmra.mxu2 %vm1194_vm2, %v3702_v62  ;;  %v5637_v37 = vadd.f32 %v2159_v4, %v1760_v43  ;;  %v3950_v20 = vor.u32 %v4309_v0, %v3947_v59  ;;  %v3710_v43 = vor.u32 %v4249_v3, %v3707_v48 }
 0x424   :  { %v2007_v46 = vpop.f32.mrf.mxu2  ;;  %4056 = vmatmul.msk.bf16.gmra.mxu3 %vm1194_vm2, %v3950_v20 }
 0x425   :  { %v2008_v57 = vadd.f32 %v2007_v46, %v4766_v7  ;;  %v4310_v7 = vld [vmem:[%s6511_s3 + $0x494] sm:$0xf0] }
 0x426   :  { %v3946_v53 = vor.u32 %v4310_v7, %v3945_v42  ;;  %v4251_v42 = vld [vmem:[%s6511_s3 + $0x2c4] sm:$0xf]  ;;  %v3715_v7 = vld [vmem:[%s6511_s3 + $0x2c8] sm:$0xf0] }
 0x427   :  { %v2381_v26 = vmul.f32 %v2380_v38, %v2008_v57  ;;  %v2162_v23 = vpop.f32.mrf.mxu3 }
 0x428   :  { %v1763_v47 = vpop.f32.mrf.mxu1 }
 0x429   :  { %v2385_v39 = vadd.f32 %v2381_v26, %v2376_v55  ;;  %v5659_v62 = vadd.f32 %v2162_v23, %v1763_v47  ;;  %v4311_v26 = vld [vmem:[%s6511_s3 + $0x4a4] sm:$0xf]  ;;  %v3955_v47 = vld [vmem:[%s6511_s3 + $0x4a8] sm:$0xf0] }
 0x42a   :  { %v3958_v3 = vor.u32 %v4311_v26, %v3955_v47  ;;  %v2389_v47 = vperm.slane %v5581_v15, 2 }
 0x42b   :  { %6562 = vst [vmem:[#allocation24_spill] sm:$0xff] %v5659_v62  ;;  %1802 = vmatmul.bf16.gmra.mxu1 %v3946_v53  ;;  %v3953_v53 = vld [vmem:[%s6511_s3 + $0x4a0] sm:$0xf] }
 0x42c   :  { %v2009_v55 = vpop.f32.mrf.mxu2 }
 0x42d   :  { %v2010_v17 = vadd.f32 %v2009_v55, %v4778_v19 }
 0x42f   :  { %v2382_v4 = vmul.f32 %v2380_v38, %v2010_v17  ;;  %v2164_v59 = vpop.f32.mrf.mxu3 }
 0x430   :  { %v1765_v0 = vpop.f32.mrf.mxu1 }
 0x431   :  { %v2386_v46 = vadd.f32 %v2382_v4, %v2377_v16  ;;  %4026 = vmatmul.msk.bf16.gmra.mxu2 %vm1194_vm2, %v3710_v43  ;;  %v5663_v20 = vadd.f32 %v2164_v59, %v1765_v0  ;;  %v3718_v0 = vor.u32 %v4251_v42, %v3715_v7 }
 0x433   :  { %6563 = vst [vmem:[#allocation25_spill] sm:$0xff] %v5663_v20 }
 0x434   :  { %v2012_v57 = vpop.f32.mrf.mxu2  ;;  %4057 = vmatmul.msk.bf16.gmra.mxu3 %vm1194_vm2, %v3958_v3 }
 0x435   :  { %v2013_v19 = vadd.f32 %v2012_v57, %v4790_v31  ;;  %v4312_v31 = vld [vmem:[%s6511_s3 + $0x4a4] sm:$0xf0] }
 0x436   :  { %v3954_v17 = vor.u32 %v4312_v31, %v3953_v53  ;;  %v3723_v53 = vld [vmem:[%s6511_s3 + $0x2d8] sm:$0xf0] }
 0x437   :  { %v2383_v48 = vmul.f32 %v2380_v38, %v2013_v19  ;;  %v2167_v55 = vpop.f32.mrf.mxu3 }
 0x438   :  { %v1768_v23 = vpop.f32.mrf.mxu1 }
 0x439   :  { %v2387_v16 = vadd.f32 %v2383_v48, %v2378_v13  ;;  %v5685_v43 = vadd.f32 %v2167_v55, %v1768_v23  ;;  %v4313_v48 = vld [vmem:[%s6511_s3 + $0x4b4] sm:$0xf]  ;;  %v3961_v55 = vld [vmem:[%s6511_s3 + $0x4b0] sm:$0xf] }
 0x43a   :  { %v4253_v23 = vld [vmem:[%s6511_s3 + $0x2d4] sm:$0xf] }
 0x43b   :  { %1807 = vmatmul.bf16.gmra.mxu1 %v3954_v17 }
 0x43c   :  { %v2014_v13 = vpop.f32.mrf.mxu2 }
 0x43d   :  { %v2015_v4 = vadd.f32 %v2014_v13, %v4802_v44  ;;  %v3963_v44 = vld [vmem:[%s6511_s3 + $0x4b8] sm:$0xf0] }
 0x43f   :  { %v2384_v59 = vmul.f32 %v2380_v38, %v2015_v4  ;;  %v5692_v19 = vpop.f32.mrf.mxu3 }
 0x440   :  { %v5689_v26 = vpop.f32.mrf.mxu1 }
 0x441   :  { %v2388_v57 = vadd.f32 %v2384_v59, %v2379_v5  ;;  %4027 = vmatmul.msk.bf16.gmra.mxu2 %vm1194_vm2, %v3718_v0  ;;  %v3966_v5 = vor.u32 %v4313_v48, %v3963_v44  ;;  %v3726_v59 = vor.u32 %v4253_v23, %v3723_v53 }
 0x444   :  { %v2017_v3 = vpop.f32.mrf.mxu2  ;;  %4058 = vmatmul.msk.bf16.gmra.mxu3 %vm1194_vm2, %v3966_v5 }
 0x445   :  { %v2018_v38 = vadd.f32 %v2017_v3, %v4813_v54  ;;  %v4314_v54 = vld [vmem:[%s6511_s3 + $0x4b4] sm:$0xf0] }
 0x446   :  { %v3962_v13 = vor.u32 %v4314_v54, %v3961_v55  ;;  %v4255_v55 = vld [vmem:[%s6511_s3 + $0x2e4] sm:$0xf]  ;;  %v3731_v54 = vld [vmem:[%s6511_s3 + $0x2e8] sm:$0xf0] }
 0x447   :  { %v2390_v42 = vmul.f32 %v2389_v47, %v2018_v38  ;;  %v2172_v17 = vpop.f32.mrf.mxu3 }
 0x448   :  { %v1773_v31 = vpop.f32.mrf.mxu1 }
 0x449   :  { %v2394_v7 = vadd.f32 %v2390_v42, %v2385_v39  ;;  %v5714_v4 = vadd.f32 %v2172_v17, %v1773_v31  ;;  %v4315_v42 = vld [vmem:[%s6511_s3 + $0x4c4] sm:$0xf]  ;;  %v3971_v31 = vld [vmem:[%s6511_s3 + $0x4c8] sm:$0xf0] }
 0x44a   :  { %v3974_v23 = vor.u32 %v4315_v42, %v3971_v31 }
 0x44b   :  { %6564 = vst [vmem:[#allocation26_spill] sm:$0xff] %v5714_v4  ;;  %1812 = vmatmul.bf16.gmra.mxu1 %v3962_v13  ;;  %v3969_v13 = vld [vmem:[%s6511_s3 + $0x4c0] sm:$0xf] }
 0x44c   :  { %v2019_v39 = vpop.f32.mrf.mxu2 }
 0x44d   :  { %v2020_v0 = vadd.f32 %v2019_v39, %v4825_v2 }
 0x44f   :  { %v2391_v3 = vmul.f32 %v2389_v47, %v2020_v0  ;;  %v5720_v38 = vpop.f32.mrf.mxu3 }
 0x450   :  { %v5718_v44 = vpop.f32.mrf.mxu1  ;;  %6566 = vst [vmem:[#allocation28_spill] sm:$0xff] %v5720_v38 }
 0x451   :  { %v2395_v48 = vadd.f32 %v2391_v3, %v2386_v46  ;;  %4028 = vmatmul.msk.bf16.gmra.mxu2 %vm1194_vm2, %v3726_v59  ;;  %6565 = vst [vmem:[#allocation27_spill] sm:$0xff] %v5718_v44 }
 0x454   :  { %v2022_v5 = vpop.f32.mrf.mxu2  ;;  %4059 = vmatmul.msk.bf16.gmra.mxu3 %vm1194_vm2, %v3974_v23  ;;  %v2398_v23 = vperm.slane %v5581_v15, 3 }
 0x455   :  { %v2023_v2 = vadd.f32 %v2022_v5, %v4840_v18  ;;  %v4316_v18 = vld [vmem:[%s6511_s3 + $0x4c4] sm:$0xf0]  ;;  %v3734_v5 = vor.u32 %v4255_v55, %v3731_v54 }
 0x456   :  { %v3970_v0 = vor.u32 %v4316_v18, %v3969_v13  ;;  %v4257_v13 = vld [vmem:[%s6511_s3 + $0x2f4] sm:$0xf]  ;;  %v3739_v18 = vld [vmem:[%s6511_s3 + $0x2f8] sm:$0xf0] }
 0x457   :  { %v2392_v53 = vmul.f32 %v2389_v47, %v2023_v2  ;;  %v2177_v39 = vpop.f32.mrf.mxu3 }
 0x458   :  { %v1778_v17 = vpop.f32.mrf.mxu1 }
 0x459   :  { %v2396_v46 = vadd.f32 %v2392_v53, %v2387_v16  ;;  %v5742_v59 = vadd.f32 %v2177_v39, %v1778_v17  ;;  %v4317_v17 = vld [vmem:[%s6511_s3 + $0x4d4] sm:$0xf] }
 0x45b   :  { %1817 = vmatmul.bf16.gmra.mxu1 %v3970_v0  ;;  %v3977_v0 = vld [vmem:[%s6511_s3 + $0x4d0] sm:$0xf] }
 0x45c   :  { %v2024_v16 = vpop.f32.mrf.mxu2 }
 0x45d   :  { %v2025_v3 = vadd.f32 %v2024_v16, %v4849_v30  ;;  %v3979_v30 = vld [vmem:[%s6511_s3 + $0x4d8] sm:$0xf0] }
 0x45f   :  { %v2393_v42 = vmul.f32 %v2389_v47, %v2025_v3  ;;  %v5749_v53 = vpop.f32.mrf.mxu3 }
 0x460   :  { %v5746_v2 = vpop.f32.mrf.mxu1 }
 0x461   :  { %v2397_v31 = vadd.f32 %v2393_v42, %v2388_v57  ;;  %4029 = vmatmul.msk.bf16.gmra.mxu2 %vm1194_vm2, %v3734_v5  ;;  %v3982_v57 = vor.u32 %v4317_v17, %v3979_v30  ;;  %v3742_v42 = vor.u32 %v4257_v13, %v3739_v18 }
 0x464   :  { %v2027_v20 = vpop.f32.mrf.mxu2  ;;  %4060 = vmatmul.msk.bf16.gmra.mxu3 %vm1194_vm2, %v3982_v57 }
 0x465   :  { %v2028_v47 = vadd.f32 %v2027_v20, %v4863_v45  ;;  %v4318_v45 = vld [vmem:[%s6511_s3 + $0x4d4] sm:$0xf0] }
 0x466   :  { %v3978_v16 = vor.u32 %v4318_v45, %v3977_v0 }
 0x467   :  { %v2399_v55 = vmul.f32 %v2398_v23, %v2028_v47  ;;  %v2182_v20 = vpop.f32.mrf.mxu3 }
 0x468   :  { %v1783_v39 = vpop.f32.mrf.mxu1 }
 0x469   :  { %v2403_v54 = vadd.f32 %v2399_v55, %v2394_v7  ;;  %v5771_v3 = vadd.f32 %v2182_v20, %v1783_v39 }
 0x46b   :  { %6567 = vst [vmem:[#allocation29_spill] sm:$0xff] %v5771_v3  ;;  %1822 = vmatmul.bf16.gmra.mxu1 %v3978_v16  ;;  %v2407_v16 = vperm.slane %v5581_v15, 4 }
 0x46c   :  { %v2029_v7 = vpop.f32.mrf.mxu2 }
 0x46d   :  { %v2030_v5 = vadd.f32 %v2029_v7, %v4872_v56 }
 0x46f   :  { %v2400_v17 = vmul.f32 %v2398_v23, %v2030_v5  ;;  %v5777_v57 = vpop.f32.mrf.mxu3 }
 0x470   :  { %v5775_v47 = vpop.f32.mrf.mxu1  ;;  %6569 = vst [vmem:[#allocation31_spill] sm:$0xff] %v5777_v57 }
 0x471   :  { %v2404_v30 = vadd.f32 %v2400_v17, %v2395_v48  ;;  %4030 = vmatmul.msk.bf16.gmra.mxu2 %vm1194_vm2, %v3742_v42  ;;  %6568 = vst [vmem:[#allocation30_spill] sm:$0xff] %v5775_v47 }
 0x474   :  { %v2032_v55 = vpop.f32.mrf.mxu2 }
 0x475   :  { %v2033_v38 = vadd.f32 %v2032_v55, %v4887_v10 }
 0x477   :  { %v2401_v44 = vmul.f32 %v2398_v23, %v2033_v38  ;;  %v2187_v39 = vpop.f32.mrf.mxu3 }
 0x478   :  { %v1788_v45 = vpop.f32.mrf.mxu1 }
 0x479   :  { %v2405_v0 = vadd.f32 %v2401_v44, %v2396_v46  ;;  %v5780_v3 = vadd.f32 %v2187_v39, %v1788_v45 }
 0x47c   :  { %v2034_v20 = vpop.f32.mrf.mxu2 }
 0x47d   :  { %v2035_v56 = vadd.f32 %v2034_v20, %v4896_v22 }
 0x47f   :  { %v2402_v13 = vmul.f32 %v2398_v23, %v2035_v56  ;;  %v5786_v7 = vpop.f32.mrf.mxu3 }
 0x480   :  { %v5783_v18 = vpop.f32.mrf.mxu1 }
 0x481   :  { %v2406_v48 = vadd.f32 %v2402_v13, %v2397_v31 }
 0x484   :  { %v2037_v5 = vpop.f32.mrf.mxu2 }
 0x485   :  { %v2038_v10 = vadd.f32 %v2037_v5, %v4917_v33 }
 0x487   :  { %v2408_v38 = vmul.f32 %v2407_v16, %v2038_v10  ;;  %v2192_v42 = vpop.f32.mrf.mxu3 }
 0x488   :  { %v1793_v46 = vpop.f32.mrf.mxu1 }
 0x489   :  { %v2412_v44 = vadd.f32 %v2408_v38, %v2403_v54  ;;  %v5789_v55 = vadd.f32 %v2192_v42, %v1793_v46 }
 0x48b   :  { %6570 = vst [vmem:[#allocation32_spill] sm:$0xff] %v5789_v55 }
 0x48c   :  { %v2039_v17 = vpop.f32.mrf.mxu2 }
 0x48d   :  { %v2040_v22 = vadd.f32 %v2039_v17, %v4926_v58  ;;  %v5805_v17 = vperm.slane %v5581_v15, 5 }
 0x48f   :  { %v2409_v23 = vmul.f32 %v2407_v16, %v2040_v22  ;;  %v5794_v39 = vpop.f32.mrf.mxu3 }
 0x490   :  { %v5792_v45 = vpop.f32.mrf.mxu1  ;;  %6572 = vst [vmem:[#allocation34_spill] sm:$0xff] %v5794_v39 }
 0x491   :  { %v2413_v31 = vadd.f32 %v2409_v23, %v2404_v30  ;;  %6571 = vst [vmem:[#allocation33_spill] sm:$0xff] %v5792_v45 }
 0x494   :  { %v2042_v20 = vpop.f32.mrf.mxu2 }
 0x495   :  { %v2043_v56 = vadd.f32 %v2042_v20, %v4948_v60 }
 0x497   :  { %v2410_v13 = vmul.f32 %v2407_v16, %v2043_v56  ;;  %v2197_v54 = vpop.f32.mrf.mxu3 }
 0x498   :  { %v1798_v5 = vpop.f32.mrf.mxu1 }
 0x499   :  { %v2414_v33 = vadd.f32 %v2410_v13, %v2405_v0  ;;  %v5797_v38 = vadd.f32 %v2197_v54, %v1798_v5 }
 0x49c   :  { %v2044_v10 = vpop.f32.mrf.mxu2 }
 0x49d   :  { %v2045_v46 = vadd.f32 %v2044_v10, %v4957_v32 }
 0x49f   :  { %v2411_v42 = vmul.f32 %v2407_v16, %v2045_v46  ;;  %v5807_v22 = vpop.f32.mrf.mxu3 }
 0x4a0   :  { %v5802_v30 = vpop.f32.mrf.mxu1 }
 0x4a1   :  { %v5800_v58 = vadd.f32 %v2411_v42, %v2406_v48 }
 0x4a4   :  { %v2047_v60 = vpop.f32.mrf.mxu2 }
 0x4a5   :  { %v2048_v0 = vadd.f32 %v2047_v60, %v4978_v25 }
 0x4a7   :  { %v2417_v23 = vmul.f32 %v5805_v17, %v2048_v0  ;;  %v2202_v13 = vpop.f32.mrf.mxu3 }
 0x4a8   :  { %v1803_v56 = vpop.f32.mrf.mxu1 }
 0x4a9   :  { %v2421_v20 = vadd.f32 %v2417_v23, %v2412_v44  ;;  %v5811_v32 = vadd.f32 %v2202_v13, %v1803_v56 }
 0x4ab   :  { %6573 = vst [vmem:[#allocation35_spill] sm:$0xff] %v5811_v32 }
 0x4ac   :  { %v2049_v5 = vpop.f32.mrf.mxu2 }
 0x4ad   :  { %v2050_v48 = vadd.f32 %v2049_v5, %v4987_v6 }
 0x4af   :  { %v2418_v16 = vmul.f32 %v5805_v17, %v2050_v48  ;;  %v5823_v0 = vpop.f32.mrf.mxu3  ;;  %v5837_v48 = vperm.slane %v5581_v15, 6 }
 0x4b0   :  { %v5821_v60 = vpop.f32.mrf.mxu1  ;;  %6575 = vst [vmem:[#allocation37_spill] sm:$0xff] %v5823_v0 }
 0x4b1   :  { %v2422_v54 = vadd.f32 %v2418_v16, %v2413_v31  ;;  %6574 = vst [vmem:[#allocation36_spill] sm:$0xff] %v5821_v60  ;;  %v4361_v60 = vld [vmem:[%s6509_s0 + $0x18] sm:$0xff] }
 0x4b2   :  { %v2443_v45 = vperm.slane %v4361_v60, 0  ;;  %v2461_v47 = vperm.slane %v4361_v60, 2  ;;  %v2470_v55 = vperm.slane %v4361_v60, 3 }
 0x4b4   :  { %v2052_v10 = vpop.f32.mrf.mxu2 }
 0x4b5   :  { %v2053_v46 = vadd.f32 %v2052_v10, %v5011_v63  ;;  %v5841_v10 = vperm.slane %v5581_v15, 7  ;;  %v2444_v15 = vmul.f32 %v2443_v45, %v5183_v49 }
 0x4b7   :  { %v2419_v42 = vmul.f32 %v5805_v17, %v2053_v46  ;;  %v5827_v6 = vpop.f32.mrf.mxu3 }
 0x4b8   :  { %v5825_v56 = vpop.f32.mrf.mxu1 }
 0x4b9   :  { %v5817_v39 = vadd.f32 %v2419_v42, %v2414_v33 }
 0x4bc   :  { %v5819_v25 = vpop.f32.mrf.mxu2 }
 0x4bf   :  { %v5831_v63 = vpop.f32.mrf.mxu3 }
 0x4c0   :  { %v5829_v13 = vpop.f32.mrf.mxu1  ;;  %6576 = vst [vmem:[#allocation38_spill] sm:$0xff] %v5831_v63  ;;  %v2462_v63 = vmul.f32 %v2461_v47, %v5327_v61  ;;  %v2445_v61 = vmul.f32 %v2443_v45, %v5191_v40  ;;  %v6585_v40 = vld [vmem:[#allocation10_spill] sm:$0xff] }
 0x4c4   :  { %v2057_v44 = vpop.f32.mrf.mxu2 }
 0x4c5   :  { %v2058_v33 = vadd.f32 %v2057_v44, %v5041_v35  ;;  %v2452_v44 = vperm.slane %v4361_v60, 1 }
 0x4c7   :  { %v2426_v16 = vmul.f32 %v5837_v48, %v2058_v33  ;;  %v5845_v0 = vpop.f32.mrf.mxu3 }
 0x4c8   :  { %v5843_v46 = vpop.f32.mrf.mxu1  ;;  %6578 = vst [vmem:[#allocation40_spill] sm:$0xff] %v5845_v0  ;;  %v2453_v0 = vmul.f32 %v2452_v44, %v5263_v52 }
 0x4c9   :  { %6577 = vst [vmem:[#allocation39_spill] sm:$0xff] %v5843_v46  ;;  %v2430_v32 = vadd.f32 %v2426_v16, %v2421_v20  ;;  %v5861_v16 = vperm.slane %v4361_v60, 5 }
 0x4cc   :  { %v2059_v23 = vpop.f32.mrf.mxu2 }
 0x4cd   :  { %v2060_v57 = vadd.f32 %v2059_v23, %v5050_v36  ;;  %v2471_v23 = vmul.f32 %v2470_v55, %v5377_v14  ;;  %v5874_v14 = vperm.slane %v4361_v60, 6 }
 0x4cf   :  { %v2427_v50 = vmul.f32 %v5837_v48, %v2060_v57 }
 0x4d0   :  { %v5863_v49 = vpop.f32.mrf.mxu1 }
 0x4d1   :  { %6579 = vst [vmem:[#allocation41_spill] sm:$0xff] %v5863_v49  ;;  %v2431_v52 = vadd.f32 %v2427_v50, %v2422_v54 }
 0x4d4   :  { %v2062_v31 = vpop.f32.mrf.mxu2 }
 0x4d5   :  { %v2063_v57 = vadd.f32 %v2062_v31, %v5071_v12  ;;  %v6583_v12 = vld [vmem:[#allocation8_spill] sm:$0xff] }
 0x4d6   :  { %v2455_v31 = vmul.f32 %v2452_v44, %v6583_v12  ;;  %v6591_v12 = vld [vmem:[#allocation3_spill] sm:$0xff] }
 0x4dc   :  { %v5833_v5 = vpop.f32.mrf.mxu2 }
 0x4e4   :  { %v2067_v42 = vpop.f32.mrf.mxu2 }
 0x4e5   :  { %v2068_v35 = vadd.f32 %v2067_v42, %v5101_v51  ;;  %v5857_v51 = vperm.slane %v4361_v60, 4 }
 0x4e7   :  { %v2435_v33 = vmul.f32 %v5841_v10, %v2068_v35 }
 0x4e9   :  { %v2439_v46 = vadd.f32 %v2435_v33, %v2430_v32  ;;  %v5865_v32 = vpop.f32.mrf.mxu3  ;;  %v2480_v33 = vmul.f32 %v5857_v51, %v5426_v41 }
 0x4ea   :  { %6580 = vst [vmem:[#allocation42_spill] sm:$0xff] %v5865_v32  ;;  %v6586_v32 = vld [vmem:[#allocation11_spill] sm:$0xff] }
 0x4eb   :  { %v2448_v4 = vadd.f32 %v2444_v15, %v2439_v46  ;;  %v2464_v41 = vmul.f32 %v2461_v47, %v6586_v32 }
 0x4ec   :  { %v2069_v62 = vpop.f32.mrf.mxu2 }
 0x4ed   :  { %v2457_v20 = vadd.f32 %v2453_v0, %v2448_v4  ;;  %v2070_v36 = vadd.f32 %v2069_v62, %v5110_v27  ;;  %v2446_v4 = vmul.f32 %v2443_v45, %v5223_v1  ;;  %v6581_v0 = vld [vmem:[#allocation6_spill] sm:$0xff]  ;;  %v6582_v62 = vld [vmem:[#allocation7_spill] sm:$0xff]  ;;  %v5884_v1 = vperm.slane %v4361_v60, 7 }
 0x4ee   :  { %v5872_v27 = vmul.f32 %v2443_v45, %v6581_v0  ;;  %v2454_v35 = vmul.f32 %v2452_v44, %v6582_v62  ;;  %v2489_v45 = vmul.f32 %v5861_v16, %v5475_v24  ;;  %v5900_v24 = vld [vmem:[%s6509_s0 + $0x20] sm:$0xff] }
 0x4ef   :  { %v2466_v46 = vadd.f32 %v2462_v63, %v2457_v20  ;;  %v2436_v42 = vmul.f32 %v5841_v10, %v2070_v36  ;;  %v6584_v63 = vld [vmem:[#allocation9_spill] sm:$0xff]  ;;  %v2463_v20 = vmul.f32 %v2461_v47, %v6585_v40  ;;  %v2428_v36 = vmul.f32 %v5837_v48, %v2063_v57 }
 0x4f0   :  { %v5881_v15 = vmul.f32 %v2452_v44, %v6584_v63  ;;  %v2498_v44 = vmul.f32 %v5874_v14, %v5524_v11  ;;  %v5903_v57 = vperm.slane %v5900_v24, 0  ;;  %v2507_v11 = vmul.f32 %v5884_v1, %v5574_v34 }
 0x4f1   :  { %v2475_v50 = vadd.f32 %v2471_v23, %v2466_v46  ;;  %v2440_v54 = vadd.f32 %v2436_v42, %v2431_v52  ;;  %v6587_v23 = vld [vmem:[#allocation12_spill] sm:$0xff]  ;;  %v6588_v46 = vld [vmem:[#allocation2_spill] sm:$0xff]  ;;  %v2065_v63 = vadd.f32 %v5833_v5, %v6591_v12  ;;  %v2432_v40 = vadd.f32 %v2428_v36, %v5817_v39  ;;  %v2217_v49 = vpop.f32.mrf.mxu3 }
 0x4f2   :  { %v5891_v52 = vmul.f32 %v2461_v47, %v6587_v23  ;;  %v2055_v42 = vadd.f32 %v5819_v25, %v6588_v46  ;;  %v5910_v25 = vperm.slane %v5900_v24, 1  ;;  %v2516_v5 = vmul.f32 %v5903_v57, %v5632_v8 }
 0x4f3   :  { %v2484_v0 = vadd.f32 %v2480_v33, %v2475_v50  ;;  %v2449_v62 = vadd.f32 %v2445_v61, %v2440_v54  ;;  %v6589_v33 = vld [vmem:[#allocation4_spill] sm:$0xff]  ;;  %v6590_v50 = vld [vmem:[#allocation13_spill] sm:$0xff]  ;;  %v5931_v12 = vperm.slane %v5900_v24, 3 }
 0x4f4   :  { %v2072_v60 = vpop.f32.mrf.mxu2  ;;  %v2472_v54 = vmul.f32 %v2470_v55, %v6590_v50  ;;  %v2420_v34 = vmul.f32 %v5805_v17, %v2055_v42  ;;  %v1818_v50 = vpop.f32.mrf.mxu1  ;;  %v2525_v17 = vmul.f32 %v5910_v25, %v5685_v43 }
 0x4f5   :  { %v2493_v61 = vadd.f32 %v2489_v45, %v2484_v0  ;;  %v2458_v32 = vadd.f32 %v2454_v35, %v2449_v62  ;;  %v2073_v47 = vadd.f32 %v2072_v60, %v6589_v33  ;;  %v6592_v35 = vld [vmem:[#allocation14_spill] sm:$0xff]  ;;  %v6593_v62 = vld [vmem:[#allocation16_spill] sm:$0xff]  ;;  %v5920_v33 = vperm.slane %v5900_v24, 2 }
 0x4f6   :  { %v2473_v0 = vmul.f32 %v2470_v55, %v6592_v35  ;;  %v2481_v60 = vmul.f32 %v5857_v51, %v6593_v62  ;;  %v2429_v35 = vmul.f32 %v5837_v48, %v2065_v63  ;;  %v6596_v63 = vld [vmem:[#allocation5_spill] sm:$0xff] }
 0x4f7   :  { %v2502_v23 = vadd.f32 %v2498_v44, %v2493_v61  ;;  %v2467_v46 = vadd.f32 %v2463_v20, %v2458_v32  ;;  %v2437_v45 = vmul.f32 %v5841_v10, %v2073_v47  ;;  %v6594_v44 = vld [vmem:[#allocation15_spill] sm:$0xff] }
 0x4f8   :  { %v5926_v61 = vmul.f32 %v2470_v55, %v6594_v44  ;;  %v6595_v32 = vld [vmem:[#allocation19_spill] sm:$0xff]  ;;  %v2534_v55 = vmul.f32 %v5920_v33, %v5742_v59  ;;  %v2543_v59 = vmul.f32 %v5931_v12, %v5780_v3 }
 0x4f9   :  { %v2476_v39 = vadd.f32 %v2472_v54, %v2467_v46  ;;  %v2441_v36 = vadd.f32 %v2437_v45, %v2432_v40  ;;  %v2511_v20 = vadd.f32 %v2507_v11, %v2502_v23  ;;  %v2490_v47 = vmul.f32 %v5861_v16, %v6595_v32 }
 0x4fa   :  { %v2499_v54 = vmul.f32 %v5874_v14, %v5528_v9  ;;  %v5941_v11 = vperm.slane %v5900_v24, 4  ;;  %v2424_v40 = vadd.f32 %v2420_v34, %v5800_v58  ;;  %v2170_v9 = vadd.f32 %v5692_v19, %v5689_v26 }
 0x4fb   :  { %v2485_v42 = vadd.f32 %v2481_v60, %v2476_v39  ;;  %v2450_v62 = vadd.f32 %v2446_v4, %v2441_v36  ;;  %v2520_v8 = vadd.f32 %v2516_v5, %v2511_v20  ;;  %v2508_v4 = vmul.f32 %v5884_v1, %v5584_v21  ;;  %v6597_v36 = vld [vmem:[#allocation17_spill] sm:$0xff] }
 0x4fc   :  { %v2074_v23 = vpop.f32.mrf.mxu2  ;;  %v2433_v60 = vadd.f32 %v2429_v35, %v2424_v40  ;;  %v2517_v20 = vmul.f32 %v5903_v57, %v5637_v37  ;;  %v2180_v21 = vadd.f32 %v5749_v53, %v5746_v2  ;;  %v2552_v26 = vmul.f32 %v5941_v11, %v5797_v38  ;;  %v2219_v2 = vpop.f32.mrf.mxu3 }
 0x4fd   :  { %v2494_v46 = vadd.f32 %v2490_v47, %v2485_v42  ;;  %v2459_v48 = vadd.f32 %v2455_v31, %v2450_v62  ;;  %v2075_v45 = vadd.f32 %v2074_v23, %v6596_v63  ;;  %v2529_v43 = vadd.f32 %v2525_v17, %v2520_v8  ;;  %v6599_v47 = vld [vmem:[#allocation20_spill] sm:$0xff]  ;;  %v1820_v42 = vpop.f32.mrf.mxu1 }
 0x4fe   :  { %v2482_v31 = vmul.f32 %v5857_v51, %v6597_v36  ;;  %v2491_v35 = vmul.f32 %v5861_v16, %v6599_v47  ;;  %v2526_v17 = vmul.f32 %v5910_v25, %v2170_v9  ;;  %v2190_v37 = vadd.f32 %v5786_v7, %v5783_v18  ;;  %v6604_v36 = vld [vmem:[#allocation22_spill] sm:$0xff] }
 0x4ff   :  { %v2503_v5 = vadd.f32 %v2499_v54, %v2494_v46  ;;  %v2468_v39 = vadd.f32 %v2464_v41, %v2459_v48  ;;  %v2438_v58 = vmul.f32 %v5841_v10, %v2075_v45  ;;  %v2538_v34 = vadd.f32 %v2534_v55, %v2529_v43  ;;  %v6598_v41 = vld [vmem:[#allocation18_spill] sm:$0xff]  ;;  %v6602_v43 = vld [vmem:[#allocation24_spill] sm:$0xff] }
 0x500   :  { %v2483_v10 = vmul.f32 %v5857_v51, %v6598_v41  ;;  %v2500_v8 = vmul.f32 %v5874_v14, %v5549_v28  ;;  %v2535_v51 = vmul.f32 %v5920_v33, %v2180_v21  ;;  %v2208_v54 = vadd.f32 %v5827_v6, %v5825_v56  ;;  %v6600_v28 = vld [vmem:[#allocation38_spill] sm:$0xff] }
 0x501   :  { %v2477_v19 = vadd.f32 %v2473_v0, %v2468_v39  ;;  %v2442_v3 = vadd.f32 %v2438_v58, %v2433_v60  ;;  %v2512_v44 = vadd.f32 %v2508_v4, %v2503_v5  ;;  %v2547_v32 = vadd.f32 %v2543_v59, %v2538_v34  ;;  %v6603_v59 = vld [vmem:[#allocation26_spill] sm:$0xff] }
 0x502   :  { %v5974_v55 = vperm.slane %v5900_v24, 5  ;;  %v2200_v18 = vadd.f32 %v5807_v22, %v5802_v30  ;;  %v2509_v23 = vmul.f32 %v5884_v1, %v5606_v29  ;;  %v2210_v46 = vadd.f32 %v6600_v28, %v5829_v13  ;;  %v6601_v22 = vld [vmem:[#allocation21_spill] sm:$0xff] }
 0x503   :  { %v2486_v53 = vadd.f32 %v2482_v31, %v2477_v19  ;;  %v2451_v38 = vadd.f32 %v5872_v27, %v2442_v3  ;;  %v2521_v0 = vadd.f32 %v2517_v20, %v2512_v44  ;;  %v2556_v62 = vadd.f32 %v2552_v26, %v2547_v32  ;;  %v6605_v20 = vld [vmem:[#allocation29_spill] sm:$0xff]  ;;  %v2893_v44 = vld [vmem:[%s6512_s4] sm:$0xff] }
 0x504   :  { %v2218_v48 = vadd.f32 %v2217_v49, %v1818_v50  ;;  %v5984_v63 = vperm.slane %v5900_v24, 6  ;;  %v2544_v56 = vmul.f32 %v5931_v12, %v2190_v37  ;;  %v2518_v4 = vmul.f32 %v5903_v57, %v6602_v43  ;;  %v2222_v19 = vpop.f32.mrf.mxu3  ;;  %v6617_v43 = vld [vmem:[#allocation37_spill] sm:$0xff] }
 0x505   :  { %v2495_v7 = vadd.f32 %v2491_v35, %v2486_v53  ;;  %v2460_v40 = vadd.f32 %v5881_v15, %v2451_v38  ;;  %v2530_v27 = vadd.f32 %v2526_v17, %v2521_v0  ;;  %v2492_v15 = vmul.f32 %v5861_v16, %v6601_v22  ;;  %v1823_v26 = vpop.f32.mrf.mxu1  ;;  %v6607_v35 = vld [vmem:[#allocation27_spill] sm:$0xff]  ;;  %v6608_v17 = vld [vmem:[#allocation28_spill] sm:$0xff] }
 0x506   :  { %v2561_v29 = vmul.f32 %v5974_v55, %v2208_v54  ;;  %v2220_v9 = vadd.f32 %v2219_v2, %v1820_v42  ;;  %v2553_v13 = vmul.f32 %v5941_v11, %v2200_v18  ;;  %v2527_v60 = vmul.f32 %v5910_v25, %v6603_v59  ;;  %v6609_v42 = vld [vmem:[#allocation32_spill] sm:$0xff]  ;;  %v6611_v54 = vld [vmem:[#allocation30_spill] sm:$0xff]  ;;  %v6612_v18 = vld [vmem:[#allocation31_spill] sm:$0xff] }
 0x507   :  { %v2504_v6 = vadd.f32 %v2500_v8, %v2495_v7  ;;  %v2469_v45 = vadd.f32 %v5891_v52, %v2460_v40  ;;  %v2539_v30 = vadd.f32 %v2535_v51, %v2530_v27  ;;  %v2562_v52 = vmul.f32 %v5974_v55, %v2210_v46  ;;  %v6610_v8 = vld [vmem:[#allocation25_spill] sm:$0xff]  ;;  %v6613_v40 = vld [vmem:[#allocation35_spill] sm:$0xff] }
 0x508   :  { %v2570_v5 = vmul.f32 %v5984_v63, %v2218_v48  ;;  %v2565_v16 = vadd.f32 %v2561_v29, %v2556_v62  ;;  %v2501_v31 = vmul.f32 %v5874_v14, %v6604_v36  ;;  %v2536_v21 = vmul.f32 %v5920_v33, %v6605_v20  ;;  %v6606_v14 = vld [vmem:[#allocation23_spill] sm:$0xff]  ;;  %v6614_v48 = vld [vmem:[#allocation33_spill] sm:$0xff] }
 0x509   :  { %v2478_v49 = vadd.f32 %v5926_v61, %v2469_v45  ;;  %v2513_v24 = vadd.f32 %v2509_v23, %v2504_v6  ;;  %v2548_v50 = vadd.f32 %v2544_v56, %v2539_v30  ;;  %v2571_v61 = vmul.f32 %v5984_v63, %v2220_v9  ;;  %v6615_v56 = vld [vmem:[#allocation34_spill] sm:$0xff]  ;;  %v6618_v29 = vld [vmem:[#allocation39_spill] sm:$0xff]  ;;  %v6619_v9 = vld [vmem:[#allocation40_spill] sm:$0xff] }
 0x50a   :  { %v4363_v3 = vmov 0   ;;  %v2510_v47 = vmul.f32 %v5884_v1, %v6606_v14  ;;  %v2175_v37 = vadd.f32 %v6608_v17, %v6607_v35  ;;  %v2545_v2 = vmul.f32 %v5931_v12, %v6609_v42  ;;  %v6620_v59 = vld [vmem:[#allocation41_spill] sm:$0xff]  ;;  %v4324_v14 = vld [vmem:[%s6514_s6 + $0x28] sm:$0xff]  ;;  %v2895_v17 = vld [vmem:[%s6512_s4 + $0x10] sm:$0xff] }
 0x50b   :  { %v2487_v39 = vadd.f32 %v2483_v10, %v2478_v49  ;;  %v2522_v58 = vadd.f32 %v2518_v4, %v2513_v24  ;;  %v2557_v34 = vadd.f32 %v2553_v13, %v2548_v50  ;;  %4351 = vset.pattern.permute.xlu0 %v4363_v3  ;;  %4352 = vset.pattern.permute.xlu1 %v4363_v3  ;;  %v4326_v35 = vld [vmem:[%s6514_s6 + $0x38] sm:$0xff]  ;;  %v2899_v42 = vld [vmem:[%s6513_s5 + $0x10] sm:$0xff] }
 0x50c   :  { %2903 = vperm.xlu0 %4351, %v2893_v44   ;;  %4353 = vset.pattern.permute.xlu2 %v4363_v3  ;;  %v2574_v0 = vadd.f32 %v2570_v5, %v2565_v16  ;;  %v2519_v51 = vmul.f32 %v5903_v57, %v6610_v8  ;;  %v2185_v7 = vadd.f32 %v6612_v18, %v6611_v54  ;;  %v2897_v57 = vld [vmem:[%s6513_s5] sm:$0xff]  ;;  %v2224_v24 = vpop.f32.mrf.mxu3  ;;  %v4329_v8 = vld [vmem:[%s6514_s6 + $0x50] sm:$0xff]  ;;  %v2896_v54 = vld [vmem:[%s6512_s4 + $0x18] sm:$0xff] }
 0x50d   :  { %v2496_v32 = vadd.f32 %v2492_v15, %v2487_v39  ;;  %v2531_v41 = vadd.f32 %v2527_v60, %v2522_v58  ;;  %v2566_v10 = vadd.f32 %v2562_v52, %v2557_v34  ;;  %v2554_v27 = vmul.f32 %v5941_v11, %v6613_v40  ;;  %v6616_v15 = vld [vmem:[#allocation36_spill] sm:$0xff]  ;;  %v6621_v60 = vld [vmem:[#allocation42_spill] sm:$0xff]  ;;  %2913 = vperm.xlu2 %4353, %v2895_v17   ;;  %v2900_v18 = vld [vmem:[%s6513_s5 + $0x18] sm:$0xff] }
 0x50e   :  { %v2528_v46 = vmul.f32 %v5910_v25, %v2175_v37  ;;  %v2195_v6 = vadd.f32 %v6615_v56, %v6614_v48  ;;  %v2537_v22 = vmul.f32 %v5920_v33, %v2185_v7  ;;  %v2205_v4 = vadd.f32 %v6617_v43, %v6616_v15  ;;  %v1825_v25 = vpop.f32.mrf.mxu1  ;;  %v4327_v37 = vld [vmem:[%s6514_s6 + $0x40] sm:$0xff]  ;;  %v4330_v40 = vld [vmem:[%s6514_s6 + $0x58] sm:$0xff]  ;;  %v4332_v48 = vld [vmem:[%s6514_s6 + $0x68] sm:$0xff] }
 0x50f   :  { %v2505_v53 = vadd.f32 %v2501_v31, %v2496_v32  ;;  %v2540_v38 = vadd.f32 %v2536_v21, %v2531_v41  ;;  %v2575_v62 = vadd.f32 %v2571_v61, %v2566_v10  ;;  %v2213_v13 = vadd.f32 %v6619_v9, %v6618_v29  ;;  %v4322_v41 = vld [vmem:[%s6514_s6 + $0x18] sm:$0xff]  ;;  %v4323_v10 = vld [vmem:[%s6514_s6 + $0x20] sm:$0xff] }
 0x510   :  { %v2546_v50 = vmul.f32 %v5931_v12, %v2195_v6  ;;  %v2215_v52 = vadd.f32 %v6621_v60, %v6620_v59  ;;  %v2223_v5 = vadd.f32 %v2222_v19, %v1823_v26  ;;  %v2555_v39 = vmul.f32 %v5941_v11, %v2205_v4  ;;  %v4319_v11 = vld [vmem:[%s6514_s6] sm:$0xff]  ;;  %v2894_v26 = vld [vmem:[%s6512_s4 + $0x8] sm:$0xff]  ;;  %v4334_v15 = vld [vmem:[%s6514_s6 + $0x78] sm:$0xff] }
 0x511   :  { %v2514_v1 = vadd.f32 %v2510_v47, %v2505_v53  ;;  %v2549_v23 = vadd.f32 %v2545_v2, %v2540_v38  ;;  %v2634_v28 = vpack.c.bf16 %v2575_v62, %v2574_v0  ;;  %v2563_v33 = vmul.f32 %v5974_v55, %v2213_v13  ;;  %2908 = vperm.xlu1 %4352, %v2894_v26   ;;  %v2898_v19 = vld [vmem:[%s6513_s5 + $0x8] sm:$0xff]  ;;  %v4325_v47 = vld [vmem:[%s6514_s6 + $0x30] sm:$0xff]  ;;  %v4335_v29 = vld [vmem:[%s6514_s6 + $0x80] sm:$0xff] }
 0x512   :  { %v2225_v58 = vadd.f32 %v2224_v24, %v1825_v25  ;;  %v2564_v36 = vmul.f32 %v5974_v55, %v2215_v52  ;;  %v2572_v31 = vmul.f32 %v5984_v63, %v2223_v5  ;;  %v4320_v55 = vld [vmem:[%s6514_s6 + $0x8] sm:$0xff]  ;;  %v2578_v24 = vld [vmem:[%s6516_s1] sm:$0x7] }
 0x513   :  { %v2523_v45 = vadd.f32 %v2519_v51, %v2514_v1  ;;  %v2558_v30 = vadd.f32 %v2554_v27, %v2549_v23  ;;  %v4328_v38 = vld [vmem:[%s6514_s6 + $0x48] sm:$0xff]  ;;  %v4331_v23 = vld [vmem:[%s6514_s6 + $0x60] sm:$0xff]  ;;  %v2580_v59 = vsel %vm2579_vm4, %v2578_v24, -inf }
 0x514   :  { %2928 = vperm.xlu0 %4351, %v2897_v57   ;;  %v2573_v61 = vmul.f32 %v5984_v63, %v2225_v58  ;;  %v4321_v63 = vld [vmem:[%s6514_s6 + $0x10] sm:$0xff]  ;;  %v2633_v13 = vld [vmem:[%s6514_s6 + $0x88] sm:$0x1]  ;;  %v2581_v60 = vrot.slane %v2580_v59, 4  ;;  %v2877_v52 = vld [vmem:[%s6515_s7] sm:$0xff] }
 0x515   :  { %v2532_v49 = vadd.f32 %v2528_v46, %v2523_v45  ;;  %v2567_v21 = vadd.f32 %v2563_v33, %v2558_v30  ;;  %2938 = vperm.xlu2 %4353, %v2899_v42   ;;  %v4333_v45 = vld [vmem:[%s6514_s6 + $0x70] sm:$0xff]  ;;  %v2878_v30 = vld [vmem:[%s6515_s7 + $0x8] sm:$0x1] }
 0x517   :  { %v2541_v16 = vadd.f32 %v2537_v22, %v2532_v49  ;;  %v2576_v3 = vadd.f32 %v2572_v31, %v2567_v21  ;;  %v2705_v49 = vunpack.c.l.b16 %v2633_v13 }
 0x519   :  { %v2550_v34 = vadd.f32 %v2546_v50, %v2541_v16  ;;  %2933 = vperm.xlu1 %4352, %v2898_v19   ;;  %v2723_v50 = vpack.c.b16 %v2705_v49, %v2705_v49  ;;  %v2582_v16 = vmax.f32 %v2580_v59, %v2581_v60 }
 0x51b   :  { %v2559_v20 = vadd.f32 %v2555_v39, %v2550_v34  ;;  %v2583_v39 = vrot.slane %v2582_v16, 2 }
 0x51c   :  { %2918 = vperm.xlu0 %4351, %v2896_v54  }
 0x51d   :  { %v2568_v12 = vadd.f32 %v2564_v36, %v2559_v20  ;;  %2881 = vperm.xlu2 %4353, %v2877_v52   ;;  %v2584_v58 = vmax.f32 %v2582_v16, %v2583_v39 }
 0x51f   :  { %v2577_v44 = vadd.f32 %v2573_v61, %v2568_v12  ;;  %v2585_v34 = vrot.slane %v2584_v58, 1 }
 0x521   :  { %v2635_v32 = vpack.c.bf16 %v2577_v44, %v2576_v3  ;;  %2943 = vperm.xlu1 %4352, %v2900_v18   ;;  %v2586_v31 = vmax.f32 %v2584_v58, %v2585_v34 }
 0x523   :  { %2785 = vmatpush.bf16.msrb.mxu3 %v2635_v32  ;;  %v2587_v20 = vsub.f32 %v2578_v24, %v2586_v31 }
 0x524   :  { %2886 = vperm.xlu0 %4351, %v2878_v30  }
 0x525   :  { %v2588_v61 = vmul.f32 1.442695, %v2587_v20 }
 0x527   :  { %2786 = vmatpush.bf16.msrb.mxu3 %v2634_v28  ;;  %4354 = vpow2.f32 %v2588_v61 }
 0x52a   :  { %4129 = vmatmul.msk.bf16.vlgmr.msrb.gmra.mxu3 %vm2724_vm3, %v4319_v11 }
 0x52d   :  { %v4355_v3 = vpop.eup %4354 }
 0x52e   :  { %v2590_v44 = vsel %vm2579_vm4, %v4355_v3, 0.0 }
 0x52f   :  { %v2591_v11 = vrot.slane %v2590_v44, 4 }
 0x53a   :  { %4130 = vmatmul.msk.bf16.gmra.mxu3 %vm2724_vm3, %v4320_v55  ;;  %v2592_v55 = vadd.f32 %v2591_v11, %v2590_v44 }
 0x53c   :  { %v2593_v26 = vrot.slane %v2592_v55, 2 }
 0x53e   :  { %v2594_v19 = vadd.f32 %v2593_v26, %v2592_v55 }
 0x54a   :  { %4131 = vmatmul.msk.bf16.gmra.mxu3 %vm2724_vm3, %v4321_v63 }
 0x55a   :  { %4132 = vmatmul.msk.bf16.gmra.mxu3 %vm2724_vm3, %v4322_v41 }
 0x56a   :  { %4133 = vmatmul.msk.bf16.gmra.mxu3 %vm2724_vm3, %v4323_v10  ;;  %v2595_v10 = vrot.slane %v2594_v19, 1 }
 0x57a   :  { %4134 = vmatmul.msk.bf16.gmra.mxu3 %vm2724_vm3, %v4324_v14  ;;  %v2596_v14 = vadd.f32 %v2595_v10, %v2594_v19 }
 0x57c   :  { %4356 = vrcp.f32 %v2596_v14 }
 0x583   :  { %v2909_v30 = vpop.permute.xlu1 %2908 }
 0x58a   :  { %4135 = vmatmul.msk.bf16.gmra.mxu3 %vm2724_vm3, %v4325_v47 }
 0x58b   :  { %v2934_v39 = vpop.permute.xlu1 %2933 }
 0x59a   :  { %4136 = vmatmul.msk.bf16.gmra.mxu3 %vm2724_vm3, %v4326_v35  ;;  %v4357_v35 = vpop.eup %4356 }
 0x59b   :  { %v2598_v42 = vmul.f32 %v4357_v35, %v4355_v3 }
 0x59d   :  { %v6199_v54 = vperm.slane %v2598_v42, 2 }
 0x59f   :  { %v2969_v16 = vmul.f32 %v6199_v54, %v2909_v30 }
 0x5aa   :  { %4137 = vmatmul.msk.bf16.gmra.mxu3 %vm2724_vm3, %v4327_v37  ;;  %v2904_v37 = vpop.permute.xlu0 %2903 }
 0x5ad   :  { %v6086_v2 = vpop.f32.mrf.mxu3 }
 0x5b5   :  { %v6088_v53 = vpop.f32.mrf.mxu3 }
 0x5ba   :  { %4138 = vmatmul.msk.bf16.gmra.mxu3 %vm2724_vm3, %v4328_v38  ;;  %v6195_v38 = vperm.slane %v2598_v42, 0 }
 0x5bc   :  { %6637 = vst [vmem:[#allocation5_spill] sm:$0xff] %v6195_v38  ;;  %v2923_v60 = vmul.f32 %v6195_v38, %v2909_v30 }
 0x5bd   :  { %v6094_v0 = vpop.f32.mrf.mxu3 }
 0x5be   :  { %v2947_v10 = vadd.f32 %v2934_v39, %v2923_v60  ;;  %v2914_v60 = vpop.permute.xlu2 %2913 }
 0x5c5   :  { %v6096_v62 = vpop.f32.mrf.mxu3 }
 0x5ca   :  { %4139 = vmatmul.msk.bf16.gmra.mxu3 %vm2724_vm3, %v4329_v8  ;;  %v6197_v8 = vperm.slane %v2598_v42, 1  ;;  %v2973_v42 = vadd.f32 %v2969_v16, %v2934_v39 }
 0x5cc   :  { %6638 = vst [vmem:[#allocation17_spill] sm:$0xff] %v6197_v8  ;;  %v2956_v52 = vmul.f32 %v6197_v8, %v2909_v30 }
 0x5cd   :  { %v6102_v51 = vpop.f32.mrf.mxu3 }
 0x5d5   :  { %v6110_v7 = vpop.f32.mrf.mxu3 }
 0x5da   :  { %4140 = vmatmul.msk.bf16.gmra.mxu3 %vm2724_vm3, %v4330_v40  ;;  %v2922_v40 = vmul.f32 %v6195_v38, %v2904_v37 }
 0x5dd   :  { %v6116_v27 = vpop.f32.mrf.mxu3 }
 0x5e5   :  { %v6118_v1 = vpop.f32.mrf.mxu3 }
 0x5ea   :  { %4141 = vmatmul.msk.bf16.gmra.mxu3 %vm2724_vm3, %v4331_v23  ;;  %v2955_v23 = vmul.f32 %v6197_v8, %v2904_v37 }
 0x5ed   :  { %v6124_v28 = vpop.f32.mrf.mxu3 }
 0x5f5   :  { %v6126_v46 = vpop.f32.mrf.mxu3 }
 0x5fa   :  { %4142 = vmatmul.msk.bf16.gmra.mxu3 %vm2724_vm3, %v4332_v48  ;;  %v2968_v48 = vmul.f32 %v6199_v54, %v2904_v37  ;;  %v2960_v37 = vadd.f32 %v2956_v52, %v2934_v39 }
 0x5fd   :  { %v6132_v56 = vpop.f32.mrf.mxu3 }
 0x605   :  { %v6134_v6 = vpop.f32.mrf.mxu3 }
 0x60a   :  { %4143 = vmatmul.msk.bf16.gmra.mxu3 %vm2724_vm3, %v4333_v45  ;;  %v2929_v45 = vpop.permute.xlu0 %2928 }
 0x60b   :  { %v2972_v13 = vadd.f32 %v2968_v48, %v2929_v45 }
 0x60d   :  { %v6143_v57 = vpop.f32.mrf.mxu3  ;;  %v6212_v59 = vmax.f32 %v2972_v13, 0.0 }
 0x60f   :  { %v2986_v31 = vperm.slane %v6212_v59, 0  ;;  %v2995_v44 = vperm.slane %v6212_v59, 1  ;;  %v3004_v26 = vperm.slane %v6212_v59, 2  ;;  %v3013_v35 = vperm.slane %v6212_v59, 3 }
 0x610   :  { %v3031_v39 = vperm.slane %v6212_v59, 5 }
 0x615   :  { %v6145_v22 = vpop.f32.mrf.mxu3 }
 0x616   :  { %6622 = vst [vmem:[#allocation6_spill] sm:$0xff] %v6145_v22 }
 0x61a   :  { %4144 = vmatmul.msk.bf16.gmra.mxu3 %vm2724_vm3, %v4334_v15  ;;  %v2946_v15 = vadd.f32 %v2929_v45, %v2922_v40 }
 0x61c   :  { %v6208_v24 = vmax.f32 %v2946_v15, 0.0  ;;  %v2987_v15 = vmul.f32 %v2986_v31, %v6086_v2 }
 0x61d   :  { %v6151_v43 = vpop.f32.mrf.mxu3 }
 0x61e   :  { %6623 = vst [vmem:[#allocation7_spill] sm:$0xff] %v6151_v43  ;;  %v2980_v58 = vperm.slane %v6208_v24, 0  ;;  %v2989_v61 = vperm.slane %v6208_v24, 1  ;;  %v2998_v11 = vperm.slane %v6208_v24, 2  ;;  %v3007_v19 = vperm.slane %v6208_v24, 3 }
 0x620   :  { %v2981_v40 = vmul.f32 %v2980_v58, %v6086_v2  ;;  %v2990_v52 = vmul.f32 %v2989_v61, %v6088_v53  ;;  %v6242_v58 = vmax.f32 %v2947_v10, 0.0  ;;  %v2999_v31 = vmul.f32 %v2998_v11, %v6094_v0 }
 0x621   :  { %v3005_v10 = vmul.f32 %v3004_v26, %v6094_v0 }
 0x625   :  { %v6153_v4 = vpop.f32.mrf.mxu3 }
 0x626   :  { %6624 = vst [vmem:[#allocation8_spill] sm:$0xff] %v6153_v4  ;;  %v2970_v4 = vmul.f32 %v6199_v54, %v2914_v60 }
 0x62a   :  { %4145 = vmatmul.msk.bf16.gmra.mxu3 %vm2724_vm3, %v4335_v29  ;;  %v2959_v29 = vadd.f32 %v2955_v23, %v2929_v45  ;;  %v3016_v23 = vperm.slane %v6208_v24, 4  ;;  %v3022_v45 = vperm.slane %v6212_v59, 4 }
 0x62d   :  { %v6159_v9 = vpop.f32.mrf.mxu3 }
 0x62e   :  { %6625 = vst [vmem:[#allocation9_spill] sm:$0xff] %v6159_v9 }
 0x635   :  { %v6164_v25 = vpop.f32.mrf.mxu3 }
 0x636   :  { %6626 = vst [vmem:[#allocation10_spill] sm:$0xff] %v6164_v25 }
 0x63a   :  { %4146 = vmatmul.msk.bf16.gmra.mxu3 %vm2724_vm3, %v2723_v50  ;;  %v6210_v50 = vmax.f32 %v2959_v29, 0.0  ;;  %v3025_v29 = vperm.slane %v6208_v24, 5 }
 0x63c   :  { %v2983_v34 = vperm.slane %v6210_v50, 0  ;;  %v2992_v3 = vperm.slane %v6210_v50, 1  ;;  %v3001_v55 = vperm.slane %v6210_v50, 2  ;;  %v3010_v14 = vperm.slane %v6210_v50, 3 }
 0x63d   :  { %v6174_v5 = vpop.f32.mrf.mxu3  ;;  %v3019_v48 = vperm.slane %v6210_v50, 4  ;;  %v3028_v13 = vperm.slane %v6210_v50, 5  ;;  %v3037_v61 = vperm.slane %v6210_v50, 6 }
 0x63e   :  { %6627 = vst [vmem:[#allocation11_spill] sm:$0xff] %v6174_v5  ;;  %v2984_v30 = vmul.f32 %v2983_v34, %v6086_v2  ;;  %v2993_v16 = vmul.f32 %v2992_v3, %v6088_v53  ;;  %v6246_v34 = vmax.f32 %v2960_v37, 0.0  ;;  %v6248_v2 = vmax.f32 %v2973_v42, 0.0 }
 0x63f   :  { %v3040_v3 = vperm.slane %v6212_v59, 6  ;;  %v3049_v37 = vperm.slane %v6212_v59, 7  ;;  %v3008_v42 = vmul.f32 %v3007_v19, %v6096_v62  ;;  %v3011_v11 = vmul.f32 %v3010_v14, %v6096_v62 }
 0x640   :  { %v3061_v59 = vperm.slane %v6242_v58, 1  ;;  %v3064_v26 = vperm.slane %v6246_v34, 1  ;;  %v6279_v19 = vmul.f32 %v3025_v29, %v6110_v7  ;;  %v6282_v14 = vmul.f32 %v3028_v13, %v6110_v7 }
 0x641   :  { %v6297_v29 = vmul.f32 %v3040_v3, %v6116_v27  ;;  %v3079_v13 = vperm.slane %v6242_v58, 3  ;;  %v3091_v3 = vperm.slane %v6246_v34, 4  ;;  %v2957_v5 = vmul.f32 %v6197_v8, %v2914_v60 }
 0x645   :  { %v6176_v33 = vpop.f32.mrf.mxu3 }
 0x646   :  { %6628 = vst [vmem:[#allocation12_spill] sm:$0xff] %v6176_v33  ;;  %v2924_v33 = vmul.f32 %v6195_v38, %v2914_v60 }
 0x64d   :  { %v6178_v36 = vpop.f32.mrf.mxu3 }
 0x64e   :  { %6629 = vst [vmem:[#allocation2_spill] sm:$0xff] %v6178_v36  ;;  %v3094_v36 = vperm.slane %v6248_v2, 4 }
 0x655   :  { %v6180_v21 = vpop.f32.mrf.mxu3 }
 0x656   :  { %6630 = vst [vmem:[#allocation4_spill] sm:$0xff] %v6180_v21  ;;  %v3097_v21 = vperm.slane %v6242_v58, 5 }
 0x65d   :  { %v6182_v12 = vpop.f32.mrf.mxu3 }
 0x65e   :  { %6631 = vst [vmem:[#allocation13_spill] sm:$0xff] %v6182_v12  ;;  %v6309_v12 = vmul.f32 %v3049_v37, %v6118_v1 }
 0x665   :  { %v6185_v32 = vpop.f32.mrf.mxu3 }
 0x666   :  { %6632 = vst [vmem:[#allocation3_spill] sm:$0xff] %v6185_v32  ;;  %v2939_v32 = vpop.permute.xlu2 %2938 }
 0x66d   :  { %v6187_v63 = vpop.f32.mrf.mxu3 }
 0x66e   :  { %6633 = vst [vmem:[#allocation14_spill] sm:$0xff] %v6187_v63  ;;  %v3076_v63 = vperm.slane %v6248_v2, 2  ;;  %v2882_v60 = vpop.permute.xlu2 %2881 }
 0x675   :  { %v6189_v41 = vpop.f32.mrf.mxu3 }
 0x676   :  { %6634 = vst [vmem:[#allocation16_spill] sm:$0xff] %v6189_v41  ;;  %v6265_v41 = vmul.f32 %v3016_v23, %v6102_v51  ;;  %v3070_v23 = vperm.slane %v6242_v58, 2 }
 0x67d   :  { %v6191_v47 = vpop.f32.mrf.mxu3 }
 0x67e   :  { %6635 = vst [vmem:[#allocation15_spill] sm:$0xff] %v6191_v47  ;;  %v3052_v47 = vperm.slane %v6242_v58, 0 }
 0x685   :  { %v6193_v17 = vpop.f32.mrf.mxu3 }
 0x686   :  { %6636 = vst [vmem:[#allocation19_spill] sm:$0xff] %v6193_v17 }
 0x68d   :  { %v6201_v18 = vpop.f32.mrf.mxu3 }
 0x68e   :  { %6639 = vst [vmem:[#allocation18_spill] sm:$0xff] %v6201_v18  ;;  %v3002_v18 = vmul.f32 %v3001_v55, %v6094_v0  ;;  %v3014_v55 = vmul.f32 %v3013_v35, %v6096_v62  ;;  %v3055_v0 = vperm.slane %v6246_v34, 0  ;;  %v3067_v62 = vperm.slane %v6248_v2, 1 }
 0x68f   :  { %v6285_v35 = vmul.f32 %v3031_v39, %v6110_v7  ;;  %v3082_v7 = vperm.slane %v6246_v34, 3  ;;  %v3085_v39 = vperm.slane %v6248_v2, 3 }
 0x695   :  { %v6206_v49 = vpop.f32.mrf.mxu3 }
 0x696   :  { %6640 = vst [vmem:[#allocation20_spill] sm:$0xff] %v6206_v49  ;;  %v3034_v49 = vperm.slane %v6208_v24, 6 }
 0x69d   :  { %v6220_v20 = vpop.f32.mrf.mxu3 }
 0x69e   :  { %6641 = vst [vmem:[#allocation38_spill] sm:$0xff] %v6220_v20  ;;  %v2996_v20 = vmul.f32 %v2995_v44, %v6088_v53  ;;  %v3043_v53 = vperm.slane %v6208_v24, 7  ;;  %v3046_v44 = vperm.slane %v6210_v50, 7  ;;  %v3058_v24 = vperm.slane %v6248_v2, 0 }
 0x69f   :  { %v6273_v50 = vmul.f32 %v3022_v45, %v6102_v51  ;;  %v3073_v45 = vperm.slane %v6246_v34, 2 }
 0x6a0   :  { %v6323_v37 = vmul.f32 %v3058_v24, %v6124_v28  ;;  %v3065_v24 = vmul.f32 %v3064_v26, %v6126_v46 }
 0x6a2   :  { %6643 = vst [vmem:[#allocation24_spill] sm:$0xff] %v6323_v37  ;;  %v3068_v37 = vmul.f32 %v3067_v62, %v6126_v46 }
 0x6a5   :  { %v6254_v17 = vpop.f32.mrf.mxu3 }
 0x6a6   :  { %6642 = vst [vmem:[#allocation21_spill] sm:$0xff] %v6254_v17  ;;  %v6268_v17 = vmul.f32 %v3019_v48, %v6102_v51  ;;  %v6289_v51 = vmul.f32 %v3034_v49, %v6116_v27  ;;  %v6292_v48 = vmul.f32 %v3037_v61, %v6116_v27  ;;  %v6303_v49 = vmul.f32 %v3043_v53, %v6118_v1 }
 0x6a7   :  { %v6306_v61 = vmul.f32 %v3046_v44, %v6118_v1  ;;  %v6317_v44 = vmul.f32 %v3052_v47, %v6124_v28  ;;  %v6320_v1 = vmul.f32 %v3055_v0, %v6124_v28  ;;  %v3103_v47 = vperm.slane %v6248_v2, 5 }
 0x6a8   :  { %v2961_v0 = vadd.f32 %v2957_v5, %v2939_v32  ;;  %v3071_v5 = vmul.f32 %v3070_v23, %v6132_v56 }
 0x6ad   :  { %v2868_v27 = vpop.f32.mrf.mxu3 }
 0x6ae   :  { %v2982_v25 = vadd.f32 %v2981_v40, %v2868_v27  ;;  %v2985_v53 = vadd.f32 %v2984_v30, %v2868_v27  ;;  %v2988_v9 = vadd.f32 %v2987_v15, %v2868_v27  ;;  %v3100_v40 = vperm.slane %v6246_v34, 5 }
 0x6af   :  { %v6329_v30 = vmul.f32 %v3061_v59, %v6126_v46  ;;  %v2948_v15 = vadd.f32 %v2939_v32, %v2924_v33  ;;  %v6341_v33 = vmax.f32 %v2961_v0, 0.0  ;;  %v6343_v46 = vpop.permute.xlu0 %2918 }
 0x6b0   :  { %v2991_v43 = vadd.f32 %v2990_v52, %v2982_v25  ;;  %v2994_v38 = vadd.f32 %v2993_v16, %v2985_v53  ;;  %v2997_v22 = vadd.f32 %v2996_v20, %v2988_v9  ;;  %v3106_v25 = vperm.slane %v6242_v58, 6 }
 0x6b1   :  { %v3109_v9 = vperm.slane %v6246_v34, 6  ;;  %v2974_v20 = vadd.f32 %v2970_v4, %v2939_v32  ;;  %v3112_v53 = vperm.slane %v6248_v2, 6 }
 0x6b2   :  { %v3000_v27 = vadd.f32 %v2999_v31, %v2991_v43  ;;  %v3003_v8 = vadd.f32 %v3002_v18, %v2994_v38  ;;  %v3006_v28 = vadd.f32 %v3005_v10, %v2997_v22  ;;  %v3074_v43 = vmul.f32 %v3073_v45, %v6132_v56 }
 0x6b3   :  { %v6339_v22 = vmax.f32 %v2948_v15, 0.0  ;;  %v3077_v31 = vmul.f32 %v3076_v63, %v6132_v56  ;;  %v3115_v10 = vperm.slane %v6242_v58, 7  ;;  %v3080_v56 = vmul.f32 %v3079_v13, %v6134_v6 }
 0x6b4   :  { %v3009_v52 = vadd.f32 %v3008_v42, %v3000_v27  ;;  %v3012_v16 = vadd.f32 %v3011_v11, %v3003_v8  ;;  %v3015_v59 = vadd.f32 %v3014_v55, %v3006_v28  ;;  %v3118_v42 = vperm.slane %v6246_v34, 7  ;;  %v6646_v28 = vld [vmem:[#allocation24_spill] sm:$0xff] }
 0x6b5   :  { %v2870_v38 = vpop.f32.mrf.mxu3  ;;  %v6351_v11 = vmax.f32 %v2974_v20, 0.0  ;;  %v3083_v63 = vmul.f32 %v3082_v7, %v6134_v6  ;;  %v3124_v34 = vperm.slane %v6339_v22, 0  ;;  %v3092_v45 = vmul.f32 %v3091_v3, %v6143_v57 }
 0x6b6   :  { %v3018_v18 = vadd.f32 %v6265_v41, %v3009_v52  ;;  %v3021_v4 = vadd.f32 %v6268_v17, %v3012_v16  ;;  %v3024_v32 = vadd.f32 %v6273_v50, %v3015_v59  ;;  %v2889_v8 = vadd.f32 %v2882_v60, %v2870_v38  ;;  %v6647_v38 = vld [vmem:[#allocation7_spill] sm:$0xff] }
 0x6b7   :  { %v3121_v41 = vperm.slane %v6248_v2, 7  ;;  %v3086_v17 = vmul.f32 %v3085_v39, %v6134_v6  ;;  %v3127_v2 = vperm.slane %v6341_v33, 0  ;;  %v3095_v13 = vmul.f32 %v3094_v36, %v6143_v57  ;;  %v6645_v39 = vld [vmem:[#allocation6_spill] sm:$0xff]  ;;  %v2887_v27 = vpop.permute.xlu0 %2886 }
 0x6b8   :  { %v3027_v55 = vadd.f32 %v6279_v19, %v3018_v18  ;;  %v3030_v26 = vadd.f32 %v6282_v14, %v3021_v4  ;;  %v3033_v62 = vadd.f32 %v6285_v35, %v3024_v32  ;;  %2891 = vst [vmem:[%s6517_s9] sm:$0xff] %v2889_v8  ;;  %v6644_v35 = vperm.slane %v6242_v58, 4 }
 0x6b9   :  { %v3130_v6 = vperm.slane %v6351_v11, 0  ;;  %v3098_v15 = vmul.f32 %v3097_v21, %v6645_v39  ;;  %v3101_v0 = vmul.f32 %v3100_v40, %v6645_v39  ;;  %v3136_v58 = vperm.slane %v6341_v33, 1 }
 0x6ba   :  { %v3036_v50 = vadd.f32 %v6289_v51, %v3027_v55  ;;  %v3039_v19 = vadd.f32 %v6292_v48, %v3030_v26  ;;  %v3042_v14 = vadd.f32 %v6297_v29, %v3033_v62  ;;  %v3089_v23 = vmul.f32 %v6644_v35, %v6143_v57 }
 0x6bb   :  { %v3133_v29 = vperm.slane %v6339_v22, 1  ;;  %v3139_v3 = vperm.slane %v6351_v11, 1  ;;  %v3142_v60 = vperm.slane %v6339_v22, 2  ;;  %v3145_v21 = vperm.slane %v6341_v33, 2 }
 0x6bc   :  { %v3045_v7 = vadd.f32 %v6303_v49, %v3036_v50  ;;  %v3048_v51 = vadd.f32 %v6306_v61, %v3039_v19  ;;  %v3051_v48 = vadd.f32 %v6309_v12, %v3042_v14  ;;  %v3104_v12 = vmul.f32 %v3103_v47, %v6645_v39 }
 0x6bd   :  { %v2873_v57 = vpop.f32.mrf.mxu3  ;;  %v3148_v40 = vperm.slane %v6351_v11, 2  ;;  %v3107_v18 = vmul.f32 %v3106_v25, %v6647_v38  ;;  %v3151_v47 = vperm.slane %v6339_v22, 3  ;;  %v3154_v4 = vperm.slane %v6341_v33, 3 }
 0x6be   :  { %v3054_v36 = vadd.f32 %v6317_v44, %v3045_v7  ;;  %v3057_v49 = vadd.f32 %v6320_v1, %v3048_v51  ;;  %v3060_v61 = vadd.f32 %v6646_v28, %v3051_v48  ;;  %v2890_v20 = vadd.f32 %v2887_v27, %v2873_v57 }
 0x6bf   :  { %v3110_v44 = vmul.f32 %v3109_v9, %v6647_v38  ;;  %v3113_v1 = vmul.f32 %v3112_v53, %v6647_v38  ;;  %v3160_v62 = vperm.slane %v6339_v22, 4  ;;  %v3163_v19 = vperm.slane %v6341_v33, 4 }
 0x6c0   :  { %v3063_v52 = vadd.f32 %v6329_v30, %v3054_v36  ;;  %v3066_v16 = vadd.f32 %v3065_v24, %v3057_v49  ;;  %v3069_v59 = vadd.f32 %v3068_v37, %v3060_v61  ;;  %2892 = vst [vmem:[%s6517_s9 + $0x8] sm:$0x1] %v2890_v20  ;;  %v3157_v30 = vperm.slane %v6351_v11, 3  ;;  %v6648_v37 = vld [vmem:[#allocation8_spill] sm:$0xff] }
 0x6c1   :  { %v3116_v24 = vmul.f32 %v3115_v10, %v6648_v37  ;;  %v3119_v25 = vmul.f32 %v3118_v42, %v6648_v37  ;;  %v3122_v26 = vmul.f32 %v3121_v41, %v6648_v37  ;;  %v3166_v14 = vperm.slane %v6351_v11, 4 }
 0x6c2   :  { %v3072_v32 = vadd.f32 %v3071_v5, %v3063_v52  ;;  %v3075_v8 = vadd.f32 %v3074_v43, %v3066_v16  ;;  %v3078_v55 = vadd.f32 %v3077_v31, %v3069_v59  ;;  %v6649_v5 = vld [vmem:[#allocation5_spill] sm:$0xff]  ;;  %v2971_v10 = vmul.f32 %v6199_v54, %v6343_v46 }
 0x6c3   :  { %v2925_v43 = vmul.f32 %v6649_v5, %v6343_v46  ;;  %v6650_v31 = vld [vmem:[#allocation17_spill] sm:$0xff]  ;;  %v3169_v27 = vperm.slane %v6339_v22, 5  ;;  %v3172_v57 = vperm.slane %v6341_v33, 5  ;;  %v3175_v54 = vperm.slane %v6351_v11, 5 }
 0x6c4   :  { %v3081_v9 = vadd.f32 %v3080_v56, %v3072_v32  ;;  %v3084_v50 = vadd.f32 %v3083_v63, %v3075_v8  ;;  %v3087_v53 = vadd.f32 %v3086_v17, %v3078_v55  ;;  %v2958_v35 = vmul.f32 %v6650_v31, %v6343_v46  ;;  %v6651_v56 = vld [vmem:[#allocation9_spill] sm:$0xff]  ;;  %v2944_v17 = vpop.permute.xlu1 %2943  ;;  %v6652_v46 = vld [vmem:[#allocation10_spill] sm:$0xff] }
 0x6c5   :  { %v2875_v42 = vpop.f32.mrf.mxu3  ;;  %v3125_v63 = vmul.f32 %v3124_v34, %v6651_v56  ;;  %v3128_v48 = vmul.f32 %v3127_v2, %v6651_v56  ;;  %v3131_v39 = vmul.f32 %v3130_v6, %v6651_v56  ;;  %v2975_v61 = vadd.f32 %v2971_v10, %v2944_v17 }
 0x6c6   :  { %v3090_v41 = vadd.f32 %v3089_v23, %v3081_v9  ;;  %v3093_v7 = vadd.f32 %v3092_v45, %v3084_v50  ;;  %v3096_v51 = vadd.f32 %v3095_v13, %v3087_v53  ;;  %v3134_v23 = vmul.f32 %v3133_v29, %v6652_v46  ;;  %v6653_v29 = vld [vmem:[#allocation11_spill] sm:$0xff]  ;;  %v6655_v42 = vld [vmem:[#allocation2_spill] sm:$0xff] }
 0x6c7   :  { %v2949_v45 = vadd.f32 %v2944_v17, %v2925_v43  ;;  %v2962_v13 = vadd.f32 %v2958_v35, %v2944_v17  ;;  %v3137_v2 = vmul.f32 %v3136_v58, %v6652_v46  ;;  %v3140_v6 = vmul.f32 %v3139_v3, %v6652_v46  ;;  %v6656_v17 = vld [vmem:[#allocation4_spill] sm:$0xff]  ;;  %v6657_v46 = vld [vmem:[#allocation13_spill] sm:$0xff] }
 0x6c8   :  { %v3099_v36 = vadd.f32 %v3098_v15, %v3090_v41  ;;  %v3102_v49 = vadd.f32 %v3101_v0, %v3093_v7  ;;  %v3105_v28 = vadd.f32 %v3104_v12, %v3096_v51  ;;  %v3178_v16 = vperm.slane %v6339_v22, 6 }
 0x6c9   :  { %v3181_v15 = vperm.slane %v6341_v33, 6  ;;  %v3184_v0 = vperm.slane %v6351_v11, 6  ;;  %v3143_v32 = vmul.f32 %v3142_v60, %v6653_v29  ;;  %v3146_v8 = vmul.f32 %v3145_v21, %v6653_v29 }
 0x6ca   :  { %v3108_v34 = vadd.f32 %v3107_v18, %v3099_v36  ;;  %v3111_v20 = vadd.f32 %v3110_v44, %v3102_v49  ;;  %v3114_v52 = vadd.f32 %v3113_v1, %v3105_v28  ;;  %v6425_v18 = vmax.f32 %v2949_v45, 0.0 }
 0x6cb   :  { %v6427_v44 = vmax.f32 %v2962_v13, 0.0  ;;  %v6429_v58 = vmax.f32 %v2975_v61, 0.0  ;;  %v3149_v37 = vmul.f32 %v3148_v40, %v6653_v29  ;;  %v3190_v60 = vperm.slane %v6341_v33, 7 }
 0x6cc   :  { %v3117_v12 = vadd.f32 %v3116_v24, %v3108_v34  ;;  %v3120_v59 = vadd.f32 %v3119_v25, %v3111_v20  ;;  %v3123_v38 = vadd.f32 %v3122_v26, %v3114_v52  ;;  %v6654_v24 = vld [vmem:[#allocation12_spill] sm:$0xff]  ;;  %v3187_v26 = vperm.slane %v6339_v22, 7  ;;  %v6658_v20 = vld [vmem:[#allocation3_spill] sm:$0xff] }
 0x6cd   :  { %v3152_v25 = vmul.f32 %v3151_v47, %v6654_v24  ;;  %v3193_v21 = vperm.slane %v6351_v11, 7  ;;  %v3155_v5 = vmul.f32 %v3154_v4, %v6654_v24  ;;  %v3158_v43 = vmul.f32 %v3157_v30, %v6654_v24 }
 0x6ce   :  { %v3126_v3 = vadd.f32 %v3125_v63, %v3117_v12  ;;  %v3129_v1 = vadd.f32 %v3128_v48, %v3120_v59  ;;  %v3132_v55 = vadd.f32 %v3131_v39, %v3123_v38  ;;  %v3196_v31 = vperm.slane %v6425_v18, 0  ;;  %v6659_v38 = vld [vmem:[#allocation14_spill] sm:$0xff] }
 0x6cf   :  { %v3199_v35 = vperm.slane %v6427_v44, 0  ;;  %v3202_v40 = vperm.slane %v6429_v58, 0  ;;  %v3161_v33 = vmul.f32 %v3160_v62, %v6655_v42  ;;  %v3164_v11 = vmul.f32 %v3163_v19, %v6655_v42 }
 0x6d0   :  { %v3135_v9 = vadd.f32 %v3134_v23, %v3126_v3  ;;  %v3138_v50 = vadd.f32 %v3137_v2, %v3129_v1  ;;  %v3141_v53 = vadd.f32 %v3140_v6, %v3132_v55  ;;  %v3167_v41 = vmul.f32 %v3166_v14, %v6655_v42 }
 0x6d1   :  { %v3205_v7 = vperm.slane %v6425_v18, 1  ;;  %v3208_v4 = vperm.slane %v6427_v44, 1  ;;  %v3211_v63 = vperm.slane %v6429_v58, 1  ;;  %v3170_v48 = vmul.f32 %v3169_v27, %v6656_v17 }
 0x6d2   :  { %v3144_v47 = vadd.f32 %v3143_v32, %v3135_v9  ;;  %v3147_v10 = vadd.f32 %v3146_v8, %v3138_v50  ;;  %v3150_v22 = vadd.f32 %v3149_v37, %v3141_v53  ;;  %v3173_v39 = vmul.f32 %v3172_v57, %v6656_v17 }
 0x6d3   :  { %v3176_v36 = vmul.f32 %v3175_v54, %v6656_v17  ;;  %v3214_v62 = vperm.slane %v6425_v18, 2  ;;  %v3217_v28 = vperm.slane %v6427_v44, 2  ;;  %v3179_v23 = vmul.f32 %v3178_v16, %v6657_v46 }
 0x6d4   :  { %v3153_v30 = vadd.f32 %v3152_v25, %v3144_v47  ;;  %v3156_v51 = vadd.f32 %v3155_v5, %v3147_v10  ;;  %v3159_v56 = vadd.f32 %v3158_v43, %v3150_v22  ;;  %v3182_v45 = vmul.f32 %v3181_v15, %v6657_v46  ;;  %v6660_v25 = vld [vmem:[#allocation16_spill] sm:$0xff] }
 0x6d5   :  { %v3185_v13 = vmul.f32 %v3184_v0, %v6657_v46  ;;  %v3220_v61 = vperm.slane %v6429_v58, 2  ;;  %v3223_v54 = vperm.slane %v6425_v18, 3  ;;  %v3188_v52 = vmul.f32 %v3187_v26, %v6658_v20 }
 0x6d6   :  { %v3162_v19 = vadd.f32 %v3161_v33, %v3153_v30  ;;  %v3165_v49 = vadd.f32 %v3164_v11, %v3156_v51  ;;  %v3168_v14 = vadd.f32 %v3167_v41, %v3159_v56  ;;  %v3191_v2 = vmul.f32 %v3190_v60, %v6658_v20  ;;  %v6662_v41 = vld [vmem:[#allocation19_spill] sm:$0xff] }
 0x6d7   :  { %v3226_v6 = vperm.slane %v6427_v44, 3  ;;  %v3229_v12 = vperm.slane %v6429_v58, 3  ;;  %v3194_v0 = vmul.f32 %v3193_v21, %v6658_v20  ;;  %v3197_v29 = vmul.f32 %v3196_v31, %v6659_v38  ;;  %v6661_v31 = vld [vmem:[#allocation15_spill] sm:$0xff] }
 0x6d8   :  { %v3171_v27 = vadd.f32 %v3170_v48, %v3162_v19  ;;  %v3174_v34 = vadd.f32 %v3173_v39, %v3165_v49  ;;  %v3177_v57 = vadd.f32 %v3176_v36, %v3168_v14  ;;  %v3200_v32 = vmul.f32 %v3199_v35, %v6659_v38  ;;  %v6663_v39 = vld [vmem:[#allocation18_spill] sm:$0xff] }
 0x6d9   :  { %v3232_v8 = vperm.slane %v6425_v18, 4  ;;  %v3235_v3 = vperm.slane %v6427_v44, 4  ;;  %v3203_v24 = vmul.f32 %v3202_v40, %v6659_v38  ;;  %v3206_v26 = vmul.f32 %v3205_v7, %v6660_v25 }
 0x6da   :  { %v3180_v16 = vadd.f32 %v3179_v23, %v3171_v27  ;;  %v3183_v59 = vadd.f32 %v3182_v45, %v3174_v34  ;;  %v3186_v15 = vadd.f32 %v3185_v13, %v3177_v57  ;;  %v3209_v60 = vmul.f32 %v3208_v4, %v6660_v25  ;;  %v6664_v45 = vld [vmem:[#allocation20_spill] sm:$0xff] }
 0x6db   :  { %v3238_v9 = vperm.slane %v6429_v58, 4  ;;  %v3241_v21 = vperm.slane %v6425_v18, 5  ;;  %v3212_v43 = vmul.f32 %v3211_v63, %v6660_v25  ;;  %v3215_v35 = vmul.f32 %v3214_v62, %v6661_v31 }
 0x6dc   :  { %v3189_v1 = vadd.f32 %v3188_v52, %v3180_v16  ;;  %v3192_v55 = vadd.f32 %v3191_v2, %v3183_v59  ;;  %v3195_v37 = vadd.f32 %v3194_v0, %v3186_v15  ;;  %v3218_v47 = vmul.f32 %v3217_v28, %v6661_v31  ;;  %v6665_v2 = vld [vmem:[#allocation38_spill] sm:$0xff]  ;;  %v6666_v0 = vld [vmem:[#allocation21_spill] sm:$0xff] }
 0x6dd   :  { %v3244_v10 = vperm.slane %v6427_v44, 5  ;;  %v3247_v40 = vperm.slane %v6429_v58, 5  ;;  %v3221_v11 = vmul.f32 %v3220_v61, %v6661_v31  ;;  %v3224_v7 = vmul.f32 %v3223_v54, %v6662_v41 }
 0x6de   :  { %v3198_v50 = vadd.f32 %v3197_v29, %v3189_v1  ;;  %v3201_v53 = vadd.f32 %v3200_v32, %v3192_v55  ;;  %v3204_v5 = vadd.f32 %v3203_v24, %v3195_v37  ;;  %v3227_v4 = vmul.f32 %v3226_v6, %v6662_v41 }
 0x6df   :  { %v3250_v30 = vperm.slane %v6425_v18, 6  ;;  %v3253_v51 = vperm.slane %v6427_v44, 6  ;;  %v3230_v48 = vmul.f32 %v3229_v12, %v6662_v41  ;;  %v3233_v36 = vmul.f32 %v3232_v8, %v6663_v39 }
 0x6e0   :  { %v3207_v22 = vadd.f32 %v3206_v26, %v3198_v50  ;;  %v3210_v42 = vadd.f32 %v3209_v60, %v3201_v53  ;;  %v3213_v33 = vadd.f32 %v3212_v43, %v3204_v5  ;;  %v3236_v62 = vmul.f32 %v3235_v3, %v6663_v39 }
 0x6e1   :  { %v3256_v19 = vperm.slane %v6429_v58, 6  ;;  %v3259_v49 = vperm.slane %v6425_v18, 7  ;;  %v3239_v23 = vmul.f32 %v3238_v9, %v6663_v39  ;;  %v3242_v13 = vmul.f32 %v3241_v21, %v6664_v45 }
 0x6e2   :  { %v3216_v56 = vadd.f32 %v3215_v35, %v3207_v22  ;;  %v3219_v63 = vadd.f32 %v3218_v47, %v3210_v42  ;;  %v3222_v17 = vadd.f32 %v3221_v11, %v3213_v33  ;;  %v3245_v61 = vmul.f32 %v3244_v10, %v6664_v45 }
 0x6e3   :  { %v3262_v27 = vperm.slane %v6427_v44, 7  ;;  %v3265_v34 = vperm.slane %v6429_v58, 7  ;;  %v3248_v52 = vmul.f32 %v3247_v40, %v6664_v45  ;;  %v3251_v18 = vmul.f32 %v3250_v30, %v6665_v2 }
 0x6e4   :  { %v3225_v14 = vadd.f32 %v3224_v7, %v3216_v56  ;;  %v3228_v28 = vadd.f32 %v3227_v4, %v3219_v63  ;;  %v3231_v46 = vadd.f32 %v3230_v48, %v3222_v17  ;;  %v3254_v6 = vmul.f32 %v3253_v51, %v6665_v2 }
 0x6e5   :  { %v3257_v15 = vmul.f32 %v3256_v19, %v6665_v2  ;;  %v3260_v38 = vmul.f32 %v3259_v49, %v6666_v0  ;;  %v3263_v44 = vmul.f32 %v3262_v27, %v6666_v0  ;;  %v3266_v8 = vmul.f32 %v3265_v34, %v6666_v0 }
 0x6e6   :  { %v3234_v57 = vadd.f32 %v3233_v36, %v3225_v14  ;;  %v3237_v54 = vadd.f32 %v3236_v62, %v3228_v28  ;;  %v3240_v20 = vadd.f32 %v3239_v23, %v3231_v46 }
 0x6e8   :  { %v3243_v12 = vadd.f32 %v3242_v13, %v3234_v57  ;;  %v3246_v16 = vadd.f32 %v3245_v61, %v3237_v54  ;;  %v3249_v59 = vadd.f32 %v3248_v52, %v3240_v20 }
 0x6ea   :  { %v3252_v29 = vadd.f32 %v3251_v18, %v3243_v12  ;;  %v3255_v58 = vadd.f32 %v3254_v6, %v3246_v16  ;;  %v3258_v32 = vadd.f32 %v3257_v15, %v3249_v59 }
 0x6ec   :  { %v3261_v3 = vadd.f32 %v3260_v38, %v3252_v29  ;;  %v3264_v1 = vadd.f32 %v3263_v44, %v3255_v58  ;;  %v3267_v55 = vadd.f32 %v3266_v8, %v3258_v32 }
 0x6ee   :  { %3268 = vst [vmem:[%s6518_s8] sm:$0xff] %v3261_v3 }
 0x6ef   :  { %3269 = vst [vmem:[%s6518_s8 + $0x8] sm:$0xff] %v3264_v1 }
 0x6f0   :  { %3270 = vst [vmem:[%s6518_s8 + $0x10] sm:$0xff] %v3267_v55 }

</bundles_post_ra>
